<compile_context>
chip_gen: v5e
topology: v5e:2x2
jax: 0.10.0
libtpu: 0.0.40
codegen_flags: <defaults>
</compile_context>

<pallas_src>
import functools

import jax
import jax.numpy as jnp
from jax import lax
from jax.experimental import pallas as pl
from jax.experimental.pallas import tpu as pltpu

KERNEL_SIZES = (39, 19, 9)            # _make_odd(39 // 2**i) for i in 0..2
PAD_MAX = KERNEL_SIZES[0] // 2        # 19  (largest "same" padding)
TAP_GROUP = 8                         # taps grouped along the MXU contraction dim
NUM_TAPS = ((KERNEL_SIZES[0] + TAP_GROUP - 1) // TAP_GROUP) * TAP_GROUP   # 40
NGROUPS = NUM_TAPS // TAP_GROUP       # 5
BN_EPS = 1e-5

# MXU operand dtype (accumulation stays f32 via preferred_element_type).
# bf16 is native on v6e/v7x (and halves scratch/intermediate bytes everywhere);
# flip to jnp.float32 for bit-tight numerics (tolerance below adapts).
MATMUL_DTYPE = jnp.bfloat16
PRE_DTYPE = MATMUL_DTYPE              # pre-BN intermediate written to HBM


# --------------------------------------------------------------------------- #
# Pass 1: bottleneck + 3 fused "same" convs + maxpool branch + BN partial stats
# --------------------------------------------------------------------------- #
def _branches_kernel(x_ref, wbt_ref, wg_ref, wmp_ref,
                     pre_ref, sum_ref, ssq_ref,
                     xbpad_ref, col_ref):
    NB, _, L = x_ref.shape
    Cb = wbt_ref.shape[0]
    C4 = wg_ref.shape[1]
    GK = wg_ref.shape[2]                      # TAP_GROUP * Cb
    cdt = xbpad_ref.dtype                     # MXU operand dtype
    P = PAD_MAX
    RPAD = xbpad_ref.shape[2] - P - L         # right halo width

    # ---- re-zero the conv halos of the padded bottleneck scratch (lane axis) ----
    xbpad_ref[:, :, 0:P] = jnp.zeros((NB, Cb, P), cdt)
    xbpad_ref[:, :, P + L:P + L + RPAD] = jnp.zeros((NB, Cb, RPAD), cdt)

    # ---- bottleneck 1x1 conv (no bias): channels-first, L stays on lanes ----
    for n in range(NB):
        xb_n = jnp.dot(wbt_ref[...], x_ref[n],
                       preferred_element_type=jnp.float32)        # (Cb, L)
        xbpad_ref[n, :, P:P + L] = xb_n.astype(cdt)

    # ---- one-time im2col: col[:, t*Cb:(t+1)*Cb, :] = xbpad[:, :, t:t+L] ----
    # (40 lane-shifted copies once; the per-group matmul operands below are
    #  sublane-aligned (offset g*8*Cb) slices of this scratch.)
    for t in range(NUM_TAPS):
        col_ref[:, t * Cb:(t + 1) * Cb, :] = xbpad_ref[:, :, t:t + L]

    # ---- maxpool(k=3, s=1, p=1) boundaries: poison the two pad columns that
    #      neighbour the valid range (conv/im2col above needed zeros there) ----
    neg = jnp.full((NB, Cb, 1), float(jnp.finfo(cdt).min), cdt)
    xbpad_ref[:, :, P - 1:P] = neg
    xbpad_ref[:, :, P + L:P + L + 1] = neg

    # ---- per-sample fused branches: (C4, L) f32 accumulator, L on the MXU
    #      output/lane axis, contraction depth GK = 8*Cb = 256 ----
    sums = jnp.zeros((C4, 1), jnp.float32)
    ssqs = jnp.zeros((C4, 1), jnp.float32)
    for n in range(NB):
        out_n = jnp.zeros((C4, L), jnp.float32)
        for g in range(NGROUPS):
            out_n = out_n + jnp.dot(
                wg_ref[g], col_ref[n, g * GK:(g + 1) * GK, :],
                preferred_element_type=jnp.float32)
        # maxpool branch: max over the 3 lane-shifted windows, then 1x1 conv
        # (weights zero-padded to C4 rows so it adds into the same accumulator).
        center = xbpad_ref[n, :, P:P + L]
        left = xbpad_ref[n, :, P - 1:P - 1 + L]
        right = xbpad_ref[n, :, P + 1:P + 1 + L]
        mp = jnp.maximum(center, jnp.maximum(left, right))
        out_n = out_n + jnp.dot(wmp_ref[...], mp,
                                preferred_element_type=jnp.float32)
        # per-block BatchNorm partial statistics from the f32 accumulator
        sums = sums + jnp.sum(out_n, axis=1, keepdims=True)
        ssqs = ssqs + jnp.sum(out_n * out_n, axis=1, keepdims=True)
        pre_ref[n] = out_n.astype(pre_ref.dtype)   # lane-dense NCL store

    sum_ref[...] = sums.reshape(1, C4, 1)
    ssq_ref[...] = ssqs.reshape(1, C4, 1)


# --------------------------------------------------------------------------- #
# Pass 2: BatchNorm apply + ReLU
# --------------------------------------------------------------------------- #
def _bn_relu_kernel(pre_ref, scale_ref, shift_ref, o_ref):
    # pre: (NB, C4, L); scale/shift: (C4, 1) broadcast over batch and lanes.
    o_ref[...] = jnp.maximum(
        pre_ref[...].astype(jnp.float32) * scale_ref[...] + shift_ref[...], 0.0)


# --------------------------------------------------------------------------- #
# Weight preparation
# --------------------------------------------------------------------------- #
def _build_grouped_weights(w1, w2, w3):
    """Fuse the three conv branches into per-tap weights and regroup them as
    (NGROUPS, C4, TAP_GROUP*Cb): wg[g, o, i*Cb + c] = fused_tap[g*8 + i, c, o]."""
    _, Cb, Co = w1.shape
    C4 = 4 * Co
    taps = jnp.zeros((NUM_TAPS, Cb, C4), jnp.float32)
    for b, wk in enumerate((w1, w2, w3)):
        k = wk.shape[0]
        t0 = PAD_MAX - k // 2          # tap index of this branch's first weight
        taps = taps.at[t0:t0 + k, :, b * Co:(b + 1) * Co].set(
            wk.astype(jnp.float32))
    taps_t = jnp.transpose(taps, (0, 2, 1))                        # (40, C4, Cb)
    wg = taps_t.reshape(NGROUPS, TAP_GROUP, C4, Cb)
    wg = jnp.transpose(wg, (0, 2, 1, 3)).reshape(NGROUPS, C4, TAP_GROUP * Cb)
    return wg


# --------------------------------------------------------------------------- #
# VMEM budgeting
# --------------------------------------------------------------------------- #
def _vmem_budget():
    """Generation-aware (scoped-VMEM limit, per-step block budget) in bytes."""
    try:
        cap = int(pltpu.get_tpu_info().vmem_capacity_bytes)
    except Exception:
        cap = 64 * 1024 * 1024          # conservative: v7x physical VMEM
    limit = min(cap * 3 // 4, 100 * 1024 * 1024)
    budget = min(cap * 3 // 8, 40 * 1024 * 1024)
    return limit, budget


def _pick_block_n(N, L, Cin, Cb, Co, budget_bytes):
    """Largest batch block whose per-step footprint (double-buffered blocks +
    weights + scratch + in-flight operands/accumulator) fits the budget, capped
    at N//2 so the 'parallel' batch grid has >= 2 steps (v7x: 2 TensorCores)."""
    C4 = 4 * Co
    elt = 2 if MATMUL_DTYPE == jnp.bfloat16 else 4
    pre_elt = 2 if PRE_DTYPE == jnp.bfloat16 else 4
    gk = TAP_GROUP * Cb
    per_sample = (
        2 * 4 * Cin * L                 # x block (f32), double-buffered
        + 2 * pre_elt * C4 * L          # pre-activation output block, double-buffered
        + elt * Cb * (L + NUM_TAPS)     # padded bottleneck scratch
        + elt * NUM_TAPS * Cb * L       # im2col scratch
        + 4 * C4 * L                    # f32 accumulator (vregs / spill)
        + elt * gk * L)                 # matmul B operand in flight
    fixed = 2 * (4 * Cb * Cin + elt * NGROUPS * C4 * gk + elt * C4 * Cb) + (2 << 20)
    avail = max(budget_bytes - fixed, per_sample)
    nb = max(1, min(N, int(avail // per_sample)))
    return max(1, min(nb, max(1, N // 2)))


# --------------------------------------------------------------------------- #
# Entry point
# --------------------------------------------------------------------------- #
@functools.partial(jax.jit, static_argnames=("block_n",))
def inception_block(x_ncl, params, block_n=None):
    """x_ncl: (N, C_in, L) float32. Returns (N, 4*out_channels, L) float32."""
    wb, w1, w2, w3, wmp, gamma, beta = params
    x_ncl = x_ncl.astype(jnp.float32)
    N, Cin, L = x_ncl.shape
    Cb = wb.shape[1]
    Co = wmp.shape[1]
    C4 = 4 * Co
    GK = TAP_GROUP * Cb

    vmem_limit, budget = _vmem_budget()
    if block_n is None:
        block_n = _pick_block_n(N, L, Cin, Cb, Co, budget)

    # Pad the batch to a multiple of block_n. Zero samples contribute exactly
    # zero to the BN sums / sums-of-squares, so statistics use the real N.
    Np = ((N + block_n - 1) // block_n) * block_n
    if Np != N:
        x_ncl = jnp.concatenate(
            [x_ncl, jnp.zeros((Np - N, Cin, L), jnp.float32)], axis=0)
    gn = Np // block_n

    # ---- weights: branch-fused, tap-grouped, channels-first rows ----
    wbt = jnp.transpose(wb.astype(jnp.float32))                    # (Cb, Cin) f32
    wg = _build_grouped_weights(w1, w2, w3).astype(MATMUL_DTYPE)   # (5, C4, 8*Cb)
    wmp_c4 = (jnp.zeros((C4, Cb), jnp.float32)
              .at[3 * Co:, :].set(jnp.transpose(wmp.astype(jnp.float32)))
              ).astype(MATMUL_DTYPE)

    # ---- pass 1: all four branches, fused, + per-block BN statistics ----
    pre, bsum, bssq = pl.pallas_call(
        _branches_kernel,
        out_shape=(jax.ShapeDtypeStruct((Np, C4, L), PRE_DTYPE),
                   jax.ShapeDtypeStruct((gn, C4, 1), jnp.float32),
                   jax.ShapeDtypeStruct((gn, C4, 1), jnp.float32)),
        grid_spec=pltpu.PrefetchScalarGridSpec(
            num_scalar_prefetch=0,
            grid=(gn,),
            in_specs=[
                pl.BlockSpec((block_n, Cin, L), lambda i: (i, 0, 0)),
                pl.BlockSpec((Cb, Cin), lambda i: (0, 0)),
                pl.BlockSpec((NGROUPS, C4, GK), lambda i: (0, 0, 0)),
                pl.BlockSpec((C4, Cb), lambda i: (0, 0)),
            ],
            out_specs=[
                pl.BlockSpec((block_n, C4, L), lambda i: (i, 0, 0)),
                pl.BlockSpec((1, C4, 1), lambda i: (i, 0, 0)),
                pl.BlockSpec((1, C4, 1), lambda i: (i, 0, 0)),
            ],
            scratch_shapes=[
                pltpu.VMEM((block_n, Cb, L + NUM_TAPS), MATMUL_DTYPE),
                pltpu.VMEM((block_n, NUM_TAPS * Cb, L), MATMUL_DTYPE),
            ],
        ),
        compiler_params=pltpu.CompilerParams(
            dimension_semantics=("parallel",),
            vmem_limit_bytes=vmem_limit),
    )(x_ncl, wbt, wg, wmp_c4)

    # ---- global training-mode BN stats: tiny cross-block reduction in JAX ----
    # Single-pass E[x^2] - mean^2 from f32 partial sums; adequate at these
    # scales (see review note re: Welford-style combine for N*L >~ 1e7).
    cnt = jnp.float32(N * L)
    mean = jnp.sum(bsum, axis=(0, 2)) / cnt
    var = jnp.maximum(jnp.sum(bssq, axis=(0, 2)) / cnt - mean * mean, 0.0)
    inv = lax.rsqrt(var + BN_EPS)
    gamma = gamma.astype(jnp.float32)
    scale = (gamma * inv).reshape(C4, 1)
    shift = (beta.astype(jnp.float32) - gamma * inv * mean).reshape(C4, 1)

    # ---- pass 2: BatchNorm apply + ReLU over larger batch blocks ----
    pre_elt = 2 if PRE_DTYPE == jnp.bfloat16 else 4
    per2 = 2 * (pre_elt + 4) * C4 * L
    bn2 = max(1, min(Np, int(max(budget - (1 << 20), per2) // per2),
                     max(1, Np // 2)))
    while Np % bn2:
        bn2 -= 1
    gn2 = Np // bn2

    y = pl.pallas_call(
        _bn_relu_kernel,
        out_shape=jax.ShapeDtypeStruct((Np, C4, L), jnp.float32),
        grid_spec=pltpu.PrefetchScalarGridSpec(
            num_scalar_prefetch=0,
            grid=(gn2,),
            in_specs=[
                pl.BlockSpec((bn2, C4, L), lambda i: (i, 0, 0)),
                pl.BlockSpec((C4, 1), lambda i: (0, 0)),
                pl.BlockSpec((C4, 1), lambda i: (0, 0)),
            ],
            out_specs=pl.BlockSpec((bn2, C4, L), lambda i: (i, 0, 0)),
        ),
        compiler_params=pltpu.CompilerParams(
            dimension_semantics=("parallel",),
            vmem_limit_bytes=vmem_limit),
    )(pre, scale, shift)
    return y[:N] if Np != N else y


# --------------------------------------------------------------------------- #
# Pure-JAX reference (mirrors the PyTorch forward, NCL layout)
# --------------------------------------------------------------------------- #
def inception_block_reference(x_ncl, params):
    wb, w1, w2, w3, wmp, gamma, beta = params
    xb = jnp.einsum('ncl,cd->ndl', x_ncl, wb)          # bottleneck 1x1

    def conv1d(x, w):                                  # x (N,Ci,L), w (K,Ci,Co)
        k = w.shape[0]
        w_oik = jnp.transpose(w, (2, 1, 0))
        return lax.conv_general_dilated(
            x, w_oik, window_strides=(1,), padding=[(k // 2, k // 2)],
            dimension_numbers=('NCH', 'OIH', 'NCH'))

    o1, o2, o3 = conv1d(xb, w1), conv1d(xb, w2), conv1d(xb, w3)
    mp = lax.reduce_window(xb, -jnp.inf, lax.max,
                           (1, 1, 3), (1, 1, 1), [(0, 0), (0, 0), (1, 1)])
    o4 = jnp.einsum('ncl,cd->ndl', mp, wmp)
    out = jnp.concatenate([o1, o2, o3, o4], axis=1)
    mean = out.mean(axis=(0, 2), keepdims=True)
    var = ((out - mean) ** 2).mean(axis=(0, 2), keepdims=True)
    y = (out - mean) / jnp.sqrt(var + BN_EPS)
    y = y * gamma.reshape(1, -1, 1) + beta.reshape(1, -1, 1)
    return jnp.maximum(y, 0.0)


if __name__ == "__main__":
    N, Cin, L = 4, 8, 64
    Cb, Co = 32, 8              # bottleneck_channels, out_channels

    key = jax.random.PRNGKey(0)
    ks = jax.random.split(key, 8)
    x = jax.random.normal(ks[0], (N, Cin, L), jnp.float32)
    wb = jax.random.normal(ks[1], (Cin, Cb), jnp.float32) * 0.2
    w1 = jax.random.normal(ks[2], (KERNEL_SIZES[0], Cb, Co), jnp.float32) * 0.05
    w2 = jax.random.normal(ks[3], (KERNEL_SIZES[1], Cb, Co), jnp.float32) * 0.08
    w3 = jax.random.normal(ks[4], (KERNEL_SIZES[2], Cb, Co), jnp.float32) * 0.10
    wmp = jax.random.normal(ks[5], (Cb, Co), jnp.float32) * 0.2
    gamma = jax.random.uniform(ks[6], (4 * Co,), jnp.float32, 0.5, 1.5)
    beta = jax.random.normal(ks[7], (4 * Co,), jnp.float32) * 0.1
    params = (wb, w1, w2, w3, wmp, gamma, beta)

    # block_n=2 -> a 2-step batch grid: exercises pipelined batch tiling and
    # the cross-block BatchNorm statistics reduction.
    y = jax.block_until_ready(inception_block(x, params, block_n=2))
    y_ref = jax.block_until_ready(inception_block_reference(x, params))

    assert y.shape == (N, 4 * Co, L), y.shape
    max_err = float(jnp.max(jnp.abs(y - y_ref)))
    # bf16 MXU operands + bf16 pre-BN intermediate -> looser tolerance.
    tol = 2e-3 if MATMUL_DTYPE == jnp.float32 else 6e-2
    assert max_err < tol, f"max abs error {max_err}"
    print("KERNEL_OK")
</pallas_src>

<mosaic_0001>
module attributes {stable_mosaic.version = 11 : i64} {
  func.func @_branches_kernel(%arg0: i32, %arg1: memref<2x8x64xf32, #tpu.memory_space<vmem>>, %arg2: memref<32x8xf32, #tpu.memory_space<vmem>>, %arg3: memref<5x32x256xbf16, #tpu.memory_space<vmem>>, %arg4: memref<32x32xbf16, #tpu.memory_space<vmem>>, %arg5: memref<2x32x64xbf16, #tpu.memory_space<vmem>>, %arg6: memref<1x32x1xf32, #tpu.memory_space<vmem>>, %arg7: memref<1x32x1xf32, #tpu.memory_space<vmem>>, %arg8: memref<2x32x104xbf16, #tpu.memory_space<vmem>>, %arg9: memref<2x1280x64xbf16, #tpu.memory_space<vmem>>) attributes {dimension_semantics = [#tpu.dimension_semantics<parallel>], iteration_bounds = array<i64: 2>, scalar_prefetch = 0 : i64, scratch_operands = 2 : i64, tpu.core_type = #tpu.core_type<tc>, window_params = [{transform_indices = @transform_0, window_bounds = array<i64: 2, 8, 64>}, {pipeline_mode = #tpu.pipeline_mode<synchronous>, transform_indices = @transform_1, window_bounds = array<i64: 32, 8>}, {pipeline_mode = #tpu.pipeline_mode<synchronous>, transform_indices = @transform_2, window_bounds = array<i64: 5, 32, 256>}, {pipeline_mode = #tpu.pipeline_mode<synchronous>, transform_indices = @transform_3, window_bounds = array<i64: 32, 32>}, {transform_indices = @transform_4, window_bounds = array<i64: 2, 32, 64>}, {transform_indices = @transform_5, window_bounds = array<i64: 1, 32, 1>}, {transform_indices = @transform_6, window_bounds = array<i64: 1, 32, 1>}]} {
    %cst = arith.constant 0.000000e+00 : bf16
    %0 = vector.broadcast %cst : bf16 to vector<2x32x19xbf16>
    %c0 = arith.constant 0 : index
    %c0_0 = arith.constant 0 : index
    %c0_1 = arith.constant 0 : index
    %1 = vector.load %arg8[%c0, %c0_0, %c0_1] : memref<2x32x104xbf16, #tpu.memory_space<vmem>>, vector<2x32x19xbf16>
    tpu.vector_store %arg8[%c0, %c0_0, %c0_1], %0 {strides = array<i32>} : memref<2x32x104xbf16, #tpu.memory_space<vmem>>, vector<2x32x19xbf16>,
    %cst_2 = arith.constant 0.000000e+00 : bf16
    %2 = vector.broadcast %cst_2 : bf16 to vector<2x32x21xbf16>
    %c0_3 = arith.constant 0 : index
    %c0_4 = arith.constant 0 : index
    %c83 = arith.constant 83 : index
    %3 = vector.load %arg8[%c0_3, %c0_4, %c83] : memref<2x32x104xbf16, #tpu.memory_space<vmem>>, vector<2x32x21xbf16>
    tpu.vector_store %arg8[%c0_3, %c0_4, %c83], %2 {strides = array<i32>} : memref<2x32x104xbf16, #tpu.memory_space<vmem>>, vector<2x32x21xbf16>,
    %c0_5 = arith.constant 0 : index
    %c0_6 = arith.constant 0 : index
    %4 = vector.load %arg2[%c0_5, %c0_6] : memref<32x8xf32, #tpu.memory_space<vmem>>, vector<32x8xf32>
    %c0_7 = arith.constant 0 : index
    %c0_8 = arith.constant 0 : index
    %c0_9 = arith.constant 0 : index
    %5 = vector.load %arg1[%c0_7, %c0_8, %c0_9] : memref<2x8x64xf32, #tpu.memory_space<vmem>>, vector<1x8x64xf32>
    %6 = vector.shape_cast %5 : vector<1x8x64xf32> to vector<8x64xf32>
    %cst_10 = arith.constant dense<0.000000e+00> : vector<32x64xf32>
    %7 = tpu.matmul %4, %6, %cst_10 {dimension_numbers = #tpu.dot_dimension_numbers<[1], [0], [0], [1], [0, 0, 1, 1], [], []>} : vector<32x8xf32>, vector<8x64xf32>, vector<32x64xf32> -> vector<32x64xf32>
    %8 = arith.truncf %7 : vector<32x64xf32> to vector<32x64xbf16>
    %c0_11 = arith.constant 0 : index
    %c0_12 = arith.constant 0 : index
    %c19 = arith.constant 19 : index
    %9 = vector.load %arg8[%c0_11, %c0_12, %c19] : memref<2x32x104xbf16, #tpu.memory_space<vmem>>, vector<1x32x64xbf16>
    %10 = vector.shape_cast %9 : vector<1x32x64xbf16> to vector<32x64xbf16>
    %11 = vector.shape_cast %8 : vector<32x64xbf16> to vector<1x32x64xbf16>
    tpu.vector_store %arg8[%c0_11, %c0_12, %c19], %11 {strides = array<i32>} : memref<2x32x104xbf16, #tpu.memory_space<vmem>>, vector<1x32x64xbf16>,
    %c0_13 = arith.constant 0 : index
    %c0_14 = arith.constant 0 : index
    %12 = vector.load %arg2[%c0_13, %c0_14] : memref<32x8xf32, #tpu.memory_space<vmem>>, vector<32x8xf32>
    %c1 = arith.constant 1 : index
    %c0_15 = arith.constant 0 : index
    %c0_16 = arith.constant 0 : index
    %13 = vector.load %arg1[%c1, %c0_15, %c0_16] : memref<2x8x64xf32, #tpu.memory_space<vmem>>, vector<1x8x64xf32>
    %14 = vector.shape_cast %13 : vector<1x8x64xf32> to vector<8x64xf32>
    %cst_17 = arith.constant dense<0.000000e+00> : vector<32x64xf32>
    %15 = tpu.matmul %12, %14, %cst_17 {dimension_numbers = #tpu.dot_dimension_numbers<[1], [0], [0], [1], [0, 0, 1, 1], [], []>} : vector<32x8xf32>, vector<8x64xf32>, vector<32x64xf32> -> vector<32x64xf32>
    %16 = arith.truncf %15 : vector<32x64xf32> to vector<32x64xbf16>
    %c1_18 = arith.constant 1 : index
    %c0_19 = arith.constant 0 : index
    %c19_20 = arith.constant 19 : index
    %17 = vector.load %arg8[%c1_18, %c0_19, %c19_20] : memref<2x32x104xbf16, #tpu.memory_space<vmem>>, vector<1x32x64xbf16>
    %18 = vector.shape_cast %17 : vector<1x32x64xbf16> to vector<32x64xbf16>
    %19 = vector.shape_cast %16 : vector<32x64xbf16> to vector<1x32x64xbf16>
    tpu.vector_store %arg8[%c1_18, %c0_19, %c19_20], %19 {strides = array<i32>} : memref<2x32x104xbf16, #tpu.memory_space<vmem>>, vector<1x32x64xbf16>,
    %c0_21 = arith.constant 0 : index
    %c0_22 = arith.constant 0 : index
    %c0_23 = arith.constant 0 : index
    %20 = vector.load %arg8[%c0_21, %c0_22, %c0_23] : memref<2x32x104xbf16, #tpu.memory_space<vmem>>, vector<2x32x64xbf16>
    %c0_24 = arith.constant 0 : index
    %c0_25 = arith.constant 0 : index
    %c0_26 = arith.constant 0 : index
    %21 = vector.load %arg9[%c0_24, %c0_25, %c0_26] : memref<2x1280x64xbf16, #tpu.memory_space<vmem>>, vector<2x32x64xbf16>
    tpu.vector_store %arg9[%c0_24, %c0_25, %c0_26], %20 {strides = array<i32>} : memref<2x1280x64xbf16, #tpu.memory_space<vmem>>, vector<2x32x64xbf16>,
    %c0_27 = arith.constant 0 : index
    %c0_28 = arith.constant 0 : index
    %c1_29 = arith.constant 1 : index
    %22 = vector.load %arg8[%c0_27, %c0_28, %c1_29] : memref<2x32x104xbf16, #tpu.memory_space<vmem>>, vector<2x32x64xbf16>
    %c0_30 = arith.constant 0 : index
    %c32 = arith.constant 32 : index
    %c0_31 = arith.constant 0 : index
    %23 = vector.load %arg9[%c0_30, %c32, %c0_31] : memref<2x1280x64xbf16, #tpu.memory_space<vmem>>, vector<2x32x64xbf16>
    tpu.vector_store %arg9[%c0_30, %c32, %c0_31], %22 {strides = array<i32>} : memref<2x1280x64xbf16, #tpu.memory_space<vmem>>, vector<2x32x64xbf16>,
    %c0_32 = arith.constant 0 : index
    %c0_33 = arith.constant 0 : index
    %c2 = arith.constant 2 : index
    %24 = vector.load %arg8[%c0_32, %c0_33, %c2] : memref<2x32x104xbf16, #tpu.memory_space<vmem>>, vector<2x32x64xbf16>
    %c0_34 = arith.constant 0 : index
    %c64 = arith.constant 64 : index
    %c0_35 = arith.constant 0 : index
    %25 = vector.load %arg9[%c0_34, %c64, %c0_35] : memref<2x1280x64xbf16, #tpu.memory_space<vmem>>, vector<2x32x64xbf16>
    tpu.vector_store %arg9[%c0_34, %c64, %c0_35], %24 {strides = array<i32>} : memref<2x1280x64xbf16, #tpu.memory_space<vmem>>, vector<2x32x64xbf16>,
    %c0_36 = arith.constant 0 : index
    %c0_37 = arith.constant 0 : index
    %c3 = arith.constant 3 : index
    %26 = vector.load %arg8[%c0_36, %c0_37, %c3] : memref<2x32x104xbf16, #tpu.memory_space<vmem>>, vector<2x32x64xbf16>
    %c0_38 = arith.constant 0 : index
    %c96 = arith.constant 96 : index
    %c0_39 = arith.constant 0 : index
    %27 = vector.load %arg9[%c0_38, %c96, %c0_39] : memref<2x1280x64xbf16, #tpu.memory_space<vmem>>, vector<2x32x64xbf16>
    tpu.vector_store %arg9[%c0_38, %c96, %c0_39], %26 {strides = array<i32>} : memref<2x1280x64xbf16, #tpu.memory_space<vmem>>, vector<2x32x64xbf16>,
    %c0_40 = arith.constant 0 : index
    %c0_41 = arith.constant 0 : index
    %c4 = arith.constant 4 : index
    %28 = vector.load %arg8[%c0_40, %c0_41, %c4] : memref<2x32x104xbf16, #tpu.memory_space<vmem>>, vector<2x32x64xbf16>
    %c0_42 = arith.constant 0 : index
    %c128 = arith.constant 128 : index
    %c0_43 = arith.constant 0 : index
    %29 = vector.load %arg9[%c0_42, %c128, %c0_43] : memref<2x1280x64xbf16, #tpu.memory_space<vmem>>, vector<2x32x64xbf16>
    tpu.vector_store %arg9[%c0_42, %c128, %c0_43], %28 {strides = array<i32>} : memref<2x1280x64xbf16, #tpu.memory_space<vmem>>, vector<2x32x64xbf16>,
    %c0_44 = arith.constant 0 : index
    %c0_45 = arith.constant 0 : index
    %c5 = arith.constant 5 : index
    %30 = vector.load %arg8[%c0_44, %c0_45, %c5] : memref<2x32x104xbf16, #tpu.memory_space<vmem>>, vector<2x32x64xbf16>
    %c0_46 = arith.constant 0 : index
    %c160 = arith.constant 160 : index
    %c0_47 = arith.constant 0 : index
    %31 = vector.load %arg9[%c0_46, %c160, %c0_47] : memref<2x1280x64xbf16, #tpu.memory_space<vmem>>, vector<2x32x64xbf16>
    tpu.vector_store %arg9[%c0_46, %c160, %c0_47], %30 {strides = array<i32>} : memref<2x1280x64xbf16, #tpu.memory_space<vmem>>, vector<2x32x64xbf16>,
    %c0_48 = arith.constant 0 : index
    %c0_49 = arith.constant 0 : index
    %c6 = arith.constant 6 : index
    %32 = vector.load %arg8[%c0_48, %c0_49, %c6] : memref<2x32x104xbf16, #tpu.memory_space<vmem>>, vector<2x32x64xbf16>
    %c0_50 = arith.constant 0 : index
    %c192 = arith.constant 192 : index
    %c0_51 = arith.constant 0 : index
    %33 = vector.load %arg9[%c0_50, %c192, %c0_51] : memref<2x1280x64xbf16, #tpu.memory_space<vmem>>, vector<2x32x64xbf16>
    tpu.vector_store %arg9[%c0_50, %c192, %c0_51], %32 {strides = array<i32>} : memref<2x1280x64xbf16, #tpu.memory_space<vmem>>, vector<2x32x64xbf16>,
    %c0_52 = arith.constant 0 : index
    %c0_53 = arith.constant 0 : index
    %c7 = arith.constant 7 : index
    %34 = vector.load %arg8[%c0_52, %c0_53, %c7] : memref<2x32x104xbf16, #tpu.memory_space<vmem>>, vector<2x32x64xbf16>
    %c0_54 = arith.constant 0 : index
    %c224 = arith.constant 224 : index
    %c0_55 = arith.constant 0 : index
    %35 = vector.load %arg9[%c0_54, %c224, %c0_55] : memref<2x1280x64xbf16, #tpu.memory_space<vmem>>, vector<2x32x64xbf16>
    tpu.vector_store %arg9[%c0_54, %c224, %c0_55], %34 {strides = array<i32>} : memref<2x1280x64xbf16, #tpu.memory_space<vmem>>, vector<2x32x64xbf16>,
    %c0_56 = arith.constant 0 : index
    %c0_57 = arith.constant 0 : index
    %c8 = arith.constant 8 : index
    %36 = vector.load %arg8[%c0_56, %c0_57, %c8] : memref<2x32x104xbf16, #tpu.memory_space<vmem>>, vector<2x32x64xbf16>
    %c0_58 = arith.constant 0 : index
    %c256 = arith.constant 256 : index
    %c0_59 = arith.constant 0 : index
    %37 = vector.load %arg9[%c0_58, %c256, %c0_59] : memref<2x1280x64xbf16, #tpu.memory_space<vmem>>, vector<2x32x64xbf16>
    tpu.vector_store %arg9[%c0_58, %c256, %c0_59], %36 {strides = array<i32>} : memref<2x1280x64xbf16, #tpu.memory_space<vmem>>, vector<2x32x64xbf16>,
    %c0_60 = arith.constant 0 : index
    %c0_61 = arith.constant 0 : index
    %c9 = arith.constant 9 : index
    %38 = vector.load %arg8[%c0_60, %c0_61, %c9] : memref<2x32x104xbf16, #tpu.memory_space<vmem>>, vector<2x32x64xbf16>
    %c0_62 = arith.constant 0 : index
    %c288 = arith.constant 288 : index
    %c0_63 = arith.constant 0 : index
    %39 = vector.load %arg9[%c0_62, %c288, %c0_63] : memref<2x1280x64xbf16, #tpu.memory_space<vmem>>, vector<2x32x64xbf16>
    tpu.vector_store %arg9[%c0_62, %c288, %c0_63], %38 {strides = array<i32>} : memref<2x1280x64xbf16, #tpu.memory_space<vmem>>, vector<2x32x64xbf16>,
    %c0_64 = arith.constant 0 : index
    %c0_65 = arith.constant 0 : index
    %c10 = arith.constant 10 : index
    %40 = vector.load %arg8[%c0_64, %c0_65, %c10] : memref<2x32x104xbf16, #tpu.memory_space<vmem>>, vector<2x32x64xbf16>
    %c0_66 = arith.constant 0 : index
    %c320 = arith.constant 320 : index
    %c0_67 = arith.constant 0 : index
    %41 = vector.load %arg9[%c0_66, %c320, %c0_67] : memref<2x1280x64xbf16, #tpu.memory_space<vmem>>, vector<2x32x64xbf16>
    tpu.vector_store %arg9[%c0_66, %c320, %c0_67], %40 {strides = array<i32>} : memref<2x1280x64xbf16, #tpu.memory_space<vmem>>, vector<2x32x64xbf16>,
    %c0_68 = arith.constant 0 : index
    %c0_69 = arith.constant 0 : index
    %c11 = arith.constant 11 : index
    %42 = vector.load %arg8[%c0_68, %c0_69, %c11] : memref<2x32x104xbf16, #tpu.memory_space<vmem>>, vector<2x32x64xbf16>
    %c0_70 = arith.constant 0 : index
    %c352 = arith.constant 352 : index
    %c0_71 = arith.constant 0 : index
    %43 = vector.load %arg9[%c0_70, %c352, %c0_71] : memref<2x1280x64xbf16, #tpu.memory_space<vmem>>, vector<2x32x64xbf16>
    tpu.vector_store %arg9[%c0_70, %c352, %c0_71], %42 {strides = array<i32>} : memref<2x1280x64xbf16, #tpu.memory_space<vmem>>, vector<2x32x64xbf16>,
    %c0_72 = arith.constant 0 : index
    %c0_73 = arith.constant 0 : index
    %c12 = arith.constant 12 : index
    %44 = vector.load %arg8[%c0_72, %c0_73, %c12] : memref<2x32x104xbf16, #tpu.memory_space<vmem>>, vector<2x32x64xbf16>
    %c0_74 = arith.constant 0 : index
    %c384 = arith.constant 384 : index
    %c0_75 = arith.constant 0 : index
    %45 = vector.load %arg9[%c0_74, %c384, %c0_75] : memref<2x1280x64xbf16, #tpu.memory_space<vmem>>, vector<2x32x64xbf16>
    tpu.vector_store %arg9[%c0_74, %c384, %c0_75], %44 {strides = array<i32>} : memref<2x1280x64xbf16, #tpu.memory_space<vmem>>, vector<2x32x64xbf16>,
    %c0_76 = arith.constant 0 : index
    %c0_77 = arith.constant 0 : index
    %c13 = arith.constant 13 : index
    %46 = vector.load %arg8[%c0_76, %c0_77, %c13] : memref<2x32x104xbf16, #tpu.memory_space<vmem>>, vector<2x32x64xbf16>
    %c0_78 = arith.constant 0 : index
    %c416 = arith.constant 416 : index
    %c0_79 = arith.constant 0 : index
    %47 = vector.load %arg9[%c0_78, %c416, %c0_79] : memref<2x1280x64xbf16, #tpu.memory_space<vmem>>, vector<2x32x64xbf16>
    tpu.vector_store %arg9[%c0_78, %c416, %c0_79], %46 {strides = array<i32>} : memref<2x1280x64xbf16, #tpu.memory_space<vmem>>, vector<2x32x64xbf16>,
    %c0_80 = arith.constant 0 : index
    %c0_81 = arith.constant 0 : index
    %c14 = arith.constant 14 : index
    %48 = vector.load %arg8[%c0_80, %c0_81, %c14] : memref<2x32x104xbf16, #tpu.memory_space<vmem>>, vector<2x32x64xbf16>
    %c0_82 = arith.constant 0 : index
    %c448 = arith.constant 448 : index
    %c0_83 = arith.constant 0 : index
    %49 = vector.load %arg9[%c0_82, %c448, %c0_83] : memref<2x1280x64xbf16, #tpu.memory_space<vmem>>, vector<2x32x64xbf16>
    tpu.vector_store %arg9[%c0_82, %c448, %c0_83], %48 {strides = array<i32>} : memref<2x1280x64xbf16, #tpu.memory_space<vmem>>, vector<2x32x64xbf16>,
    %c0_84 = arith.constant 0 : index
    %c0_85 = arith.constant 0 : index
    %c15 = arith.constant 15 : index
    %50 = vector.load %arg8[%c0_84, %c0_85, %c15] : memref<2x32x104xbf16, #tpu.memory_space<vmem>>, vector<2x32x64xbf16>
    %c0_86 = arith.constant 0 : index
    %c480 = arith.constant 480 : index
    %c0_87 = arith.constant 0 : index
    %51 = vector.load %arg9[%c0_86, %c480, %c0_87] : memref<2x1280x64xbf16, #tpu.memory_space<vmem>>, vector<2x32x64xbf16>
    tpu.vector_store %arg9[%c0_86, %c480, %c0_87], %50 {strides = array<i32>} : memref<2x1280x64xbf16, #tpu.memory_space<vmem>>, vector<2x32x64xbf16>,
    %c0_88 = arith.constant 0 : index
    %c0_89 = arith.constant 0 : index
    %c16 = arith.constant 16 : index
    %52 = vector.load %arg8[%c0_88, %c0_89, %c16] : memref<2x32x104xbf16, #tpu.memory_space<vmem>>, vector<2x32x64xbf16>
    %c0_90 = arith.constant 0 : index
    %c512 = arith.constant 512 : index
    %c0_91 = arith.constant 0 : index
    %53 = vector.load %arg9[%c0_90, %c512, %c0_91] : memref<2x1280x64xbf16, #tpu.memory_space<vmem>>, vector<2x32x64xbf16>
    tpu.vector_store %arg9[%c0_90, %c512, %c0_91], %52 {strides = array<i32>} : memref<2x1280x64xbf16, #tpu.memory_space<vmem>>, vector<2x32x64xbf16>,
    %c0_92 = arith.constant 0 : index
    %c0_93 = arith.constant 0 : index
    %c17 = arith.constant 17 : index
    %54 = vector.load %arg8[%c0_92, %c0_93, %c17] : memref<2x32x104xbf16, #tpu.memory_space<vmem>>, vector<2x32x64xbf16>
    %c0_94 = arith.constant 0 : index
    %c544 = arith.constant 544 : index
    %c0_95 = arith.constant 0 : index
    %55 = vector.load %arg9[%c0_94, %c544, %c0_95] : memref<2x1280x64xbf16, #tpu.memory_space<vmem>>, vector<2x32x64xbf16>
    tpu.vector_store %arg9[%c0_94, %c544, %c0_95], %54 {strides = array<i32>} : memref<2x1280x64xbf16, #tpu.memory_space<vmem>>, vector<2x32x64xbf16>,
    %c0_96 = arith.constant 0 : index
    %c0_97 = arith.constant 0 : index
    %c18 = arith.constant 18 : index
    %56 = vector.load %arg8[%c0_96, %c0_97, %c18] : memref<2x32x104xbf16, #tpu.memory_space<vmem>>, vector<2x32x64xbf16>
    %c0_98 = arith.constant 0 : index
    %c576 = arith.constant 576 : index
    %c0_99 = arith.constant 0 : index
    %57 = vector.load %arg9[%c0_98, %c576, %c0_99] : memref<2x1280x64xbf16, #tpu.memory_space<vmem>>, vector<2x32x64xbf16>
    tpu.vector_store %arg9[%c0_98, %c576, %c0_99], %56 {strides = array<i32>} : memref<2x1280x64xbf16, #tpu.memory_space<vmem>>, vector<2x32x64xbf16>,
    %c0_100 = arith.constant 0 : index
    %c0_101 = arith.constant 0 : index
    %c19_102 = arith.constant 19 : index
    %58 = vector.load %arg8[%c0_100, %c0_101, %c19_102] : memref<2x32x104xbf16, #tpu.memory_space<vmem>>, vector<2x32x64xbf16>
    %c0_103 = arith.constant 0 : index
    %c608 = arith.constant 608 : index
    %c0_104 = arith.constant 0 : index
    %59 = vector.load %arg9[%c0_103, %c608, %c0_104] : memref<2x1280x64xbf16, #tpu.memory_space<vmem>>, vector<2x32x64xbf16>
    tpu.vector_store %arg9[%c0_103, %c608, %c0_104], %58 {strides = array<i32>} : memref<2x1280x64xbf16, #tpu.memory_space<vmem>>, vector<2x32x64xbf16>,
    %c0_105 = arith.constant 0 : index
    %c0_106 = arith.constant 0 : index
    %c20 = arith.constant 20 : index
    %60 = vector.load %arg8[%c0_105, %c0_106, %c20] : memref<2x32x104xbf16, #tpu.memory_space<vmem>>, vector<2x32x64xbf16>
    %c0_107 = arith.constant 0 : index
    %c640 = arith.constant 640 : index
    %c0_108 = arith.constant 0 : index
    %61 = vector.load %arg9[%c0_107, %c640, %c0_108] : memref<2x1280x64xbf16, #tpu.memory_space<vmem>>, vector<2x32x64xbf16>
    tpu.vector_store %arg9[%c0_107, %c640, %c0_108], %60 {strides = array<i32>} : memref<2x1280x64xbf16, #tpu.memory_space<vmem>>, vector<2x32x64xbf16>,
    %c0_109 = arith.constant 0 : index
    %c0_110 = arith.constant 0 : index
    %c21 = arith.constant 21 : index
    %62 = vector.load %arg8[%c0_109, %c0_110, %c21] : memref<2x32x104xbf16, #tpu.memory_space<vmem>>, vector<2x32x64xbf16>
    %c0_111 = arith.constant 0 : index
    %c672 = arith.constant 672 : index
    %c0_112 = arith.constant 0 : index
    %63 = vector.load %arg9[%c0_111, %c672, %c0_112] : memref<2x1280x64xbf16, #tpu.memory_space<vmem>>, vector<2x32x64xbf16>
    tpu.vector_store %arg9[%c0_111, %c672, %c0_112], %62 {strides = array<i32>} : memref<2x1280x64xbf16, #tpu.memory_space<vmem>>, vector<2x32x64xbf16>,
    %c0_113 = arith.constant 0 : index
    %c0_114 = arith.constant 0 : index
    %c22 = arith.constant 22 : index
    %64 = vector.load %arg8[%c0_113, %c0_114, %c22] : memref<2x32x104xbf16, #tpu.memory_space<vmem>>, vector<2x32x64xbf16>
    %c0_115 = arith.constant 0 : index
    %c704 = arith.constant 704 : index
    %c0_116 = arith.constant 0 : index
    %65 = vector.load %arg9[%c0_115, %c704, %c0_116] : memref<2x1280x64xbf16, #tpu.memory_space<vmem>>, vector<2x32x64xbf16>
    tpu.vector_store %arg9[%c0_115, %c704, %c0_116], %64 {strides = array<i32>} : memref<2x1280x64xbf16, #tpu.memory_space<vmem>>, vector<2x32x64xbf16>,
    %c0_117 = arith.constant 0 : index
    %c0_118 = arith.constant 0 : index
    %c23 = arith.constant 23 : index
    %66 = vector.load %arg8[%c0_117, %c0_118, %c23] : memref<2x32x104xbf16, #tpu.memory_space<vmem>>, vector<2x32x64xbf16>
    %c0_119 = arith.constant 0 : index
    %c736 = arith.constant 736 : index
    %c0_120 = arith.constant 0 : index
    %67 = vector.load %arg9[%c0_119, %c736, %c0_120] : memref<2x1280x64xbf16, #tpu.memory_space<vmem>>, vector<2x32x64xbf16>
    tpu.vector_store %arg9[%c0_119, %c736, %c0_120], %66 {strides = array<i32>} : memref<2x1280x64xbf16, #tpu.memory_space<vmem>>, vector<2x32x64xbf16>,
    %c0_121 = arith.constant 0 : index
    %c0_122 = arith.constant 0 : index
    %c24 = arith.constant 24 : index
    %68 = vector.load %arg8[%c0_121, %c0_122, %c24] : memref<2x32x104xbf16, #tpu.memory_space<vmem>>, vector<2x32x64xbf16>
    %c0_123 = arith.constant 0 : index
    %c768 = arith.constant 768 : index
    %c0_124 = arith.constant 0 : index
    %69 = vector.load %arg9[%c0_123, %c768, %c0_124] : memref<2x1280x64xbf16, #tpu.memory_space<vmem>>, vector<2x32x64xbf16>
    tpu.vector_store %arg9[%c0_123, %c768, %c0_124], %68 {strides = array<i32>} : memref<2x1280x64xbf16, #tpu.memory_space<vmem>>, vector<2x32x64xbf16>,
    %c0_125 = arith.constant 0 : index
    %c0_126 = arith.constant 0 : index
    %c25 = arith.constant 25 : index
    %70 = vector.load %arg8[%c0_125, %c0_126, %c25] : memref<2x32x104xbf16, #tpu.memory_space<vmem>>, vector<2x32x64xbf16>
    %c0_127 = arith.constant 0 : index
    %c800 = arith.constant 800 : index
    %c0_128 = arith.constant 0 : index
    %71 = vector.load %arg9[%c0_127, %c800, %c0_128] : memref<2x1280x64xbf16, #tpu.memory_space<vmem>>, vector<2x32x64xbf16>
    tpu.vector_store %arg9[%c0_127, %c800, %c0_128], %70 {strides = array<i32>} : memref<2x1280x64xbf16, #tpu.memory_space<vmem>>, vector<2x32x64xbf16>,
    %c0_129 = arith.constant 0 : index
    %c0_130 = arith.constant 0 : index
    %c26 = arith.constant 26 : index
    %72 = vector.load %arg8[%c0_129, %c0_130, %c26] : memref<2x32x104xbf16, #tpu.memory_space<vmem>>, vector<2x32x64xbf16>
    %c0_131 = arith.constant 0 : index
    %c832 = arith.constant 832 : index
    %c0_132 = arith.constant 0 : index
    %73 = vector.load %arg9[%c0_131, %c832, %c0_132] : memref<2x1280x64xbf16, #tpu.memory_space<vmem>>, vector<2x32x64xbf16>
    tpu.vector_store %arg9[%c0_131, %c832, %c0_132], %72 {strides = array<i32>} : memref<2x1280x64xbf16, #tpu.memory_space<vmem>>, vector<2x32x64xbf16>,
    %c0_133 = arith.constant 0 : index
    %c0_134 = arith.constant 0 : index
    %c27 = arith.constant 27 : index
    %74 = vector.load %arg8[%c0_133, %c0_134, %c27] : memref<2x32x104xbf16, #tpu.memory_space<vmem>>, vector<2x32x64xbf16>
    %c0_135 = arith.constant 0 : index
    %c864 = arith.constant 864 : index
    %c0_136 = arith.constant 0 : index
    %75 = vector.load %arg9[%c0_135, %c864, %c0_136] : memref<2x1280x64xbf16, #tpu.memory_space<vmem>>, vector<2x32x64xbf16>
    tpu.vector_store %arg9[%c0_135, %c864, %c0_136], %74 {strides = array<i32>} : memref<2x1280x64xbf16, #tpu.memory_space<vmem>>, vector<2x32x64xbf16>,
    %c0_137 = arith.constant 0 : index
    %c0_138 = arith.constant 0 : index
    %c28 = arith.constant 28 : index
    %76 = vector.load %arg8[%c0_137, %c0_138, %c28] : memref<2x32x104xbf16, #tpu.memory_space<vmem>>, vector<2x32x64xbf16>
    %c0_139 = arith.constant 0 : index
    %c896 = arith.constant 896 : index
    %c0_140 = arith.constant 0 : index
    %77 = vector.load %arg9[%c0_139, %c896, %c0_140] : memref<2x1280x64xbf16, #tpu.memory_space<vmem>>, vector<2x32x64xbf16>
    tpu.vector_store %arg9[%c0_139, %c896, %c0_140], %76 {strides = array<i32>} : memref<2x1280x64xbf16, #tpu.memory_space<vmem>>, vector<2x32x64xbf16>,
    %c0_141 = arith.constant 0 : index
    %c0_142 = arith.constant 0 : index
    %c29 = arith.constant 29 : index
    %78 = vector.load %arg8[%c0_141, %c0_142, %c29] : memref<2x32x104xbf16, #tpu.memory_space<vmem>>, vector<2x32x64xbf16>
    %c0_143 = arith.constant 0 : index
    %c928 = arith.constant 928 : index
    %c0_144 = arith.constant 0 : index
    %79 = vector.load %arg9[%c0_143, %c928, %c0_144] : memref<2x1280x64xbf16, #tpu.memory_space<vmem>>, vector<2x32x64xbf16>
    tpu.vector_store %arg9[%c0_143, %c928, %c0_144], %78 {strides = array<i32>} : memref<2x1280x64xbf16, #tpu.memory_space<vmem>>, vector<2x32x64xbf16>,
    %c0_145 = arith.constant 0 : index
    %c0_146 = arith.constant 0 : index
    %c30 = arith.constant 30 : index
    %80 = vector.load %arg8[%c0_145, %c0_146, %c30] : memref<2x32x104xbf16, #tpu.memory_space<vmem>>, vector<2x32x64xbf16>
    %c0_147 = arith.constant 0 : index
    %c960 = arith.constant 960 : index
    %c0_148 = arith.constant 0 : index
    %81 = vector.load %arg9[%c0_147, %c960, %c0_148] : memref<2x1280x64xbf16, #tpu.memory_space<vmem>>, vector<2x32x64xbf16>
    tpu.vector_store %arg9[%c0_147, %c960, %c0_148], %80 {strides = array<i32>} : memref<2x1280x64xbf16, #tpu.memory_space<vmem>>, vector<2x32x64xbf16>,
    %c0_149 = arith.constant 0 : index
    %c0_150 = arith.constant 0 : index
    %c31 = arith.constant 31 : index
    %82 = vector.load %arg8[%c0_149, %c0_150, %c31] : memref<2x32x104xbf16, #tpu.memory_space<vmem>>, vector<2x32x64xbf16>
    %c0_151 = arith.constant 0 : index
    %c992 = arith.constant 992 : index
    %c0_152 = arith.constant 0 : index
    %83 = vector.load %arg9[%c0_151, %c992, %c0_152] : memref<2x1280x64xbf16, #tpu.memory_space<vmem>>, vector<2x32x64xbf16>
    tpu.vector_store %arg9[%c0_151, %c992, %c0_152], %82 {strides = array<i32>} : memref<2x1280x64xbf16, #tpu.memory_space<vmem>>, vector<2x32x64xbf16>,
    %c0_153 = arith.constant 0 : index
    %c0_154 = arith.constant 0 : index
    %c32_155 = arith.constant 32 : index
    %84 = vector.load %arg8[%c0_153, %c0_154, %c32_155] : memref<2x32x104xbf16, #tpu.memory_space<vmem>>, vector<2x32x64xbf16>
    %c0_156 = arith.constant 0 : index
    %c1024 = arith.constant 1024 : index
    %c0_157 = arith.constant 0 : index
    %85 = vector.load %arg9[%c0_156, %c1024, %c0_157] : memref<2x1280x64xbf16, #tpu.memory_space<vmem>>, vector<2x32x64xbf16>
    tpu.vector_store %arg9[%c0_156, %c1024, %c0_157], %84 {strides = array<i32>} : memref<2x1280x64xbf16, #tpu.memory_space<vmem>>, vector<2x32x64xbf16>,
    %c0_158 = arith.constant 0 : index
    %c0_159 = arith.constant 0 : index
    %c33 = arith.constant 33 : index
    %86 = vector.load %arg8[%c0_158, %c0_159, %c33] : memref<2x32x104xbf16, #tpu.memory_space<vmem>>, vector<2x32x64xbf16>
    %c0_160 = arith.constant 0 : index
    %c1056 = arith.constant 1056 : index
    %c0_161 = arith.constant 0 : index
    %87 = vector.load %arg9[%c0_160, %c1056, %c0_161] : memref<2x1280x64xbf16, #tpu.memory_space<vmem>>, vector<2x32x64xbf16>
    tpu.vector_store %arg9[%c0_160, %c1056, %c0_161], %86 {strides = array<i32>} : memref<2x1280x64xbf16, #tpu.memory_space<vmem>>, vector<2x32x64xbf16>,
    %c0_162 = arith.constant 0 : index
    %c0_163 = arith.constant 0 : index
    %c34 = arith.constant 34 : index
    %88 = vector.load %arg8[%c0_162, %c0_163, %c34] : memref<2x32x104xbf16, #tpu.memory_space<vmem>>, vector<2x32x64xbf16>
    %c0_164 = arith.constant 0 : index
    %c1088 = arith.constant 1088 : index
    %c0_165 = arith.constant 0 : index
    %89 = vector.load %arg9[%c0_164, %c1088, %c0_165] : memref<2x1280x64xbf16, #tpu.memory_space<vmem>>, vector<2x32x64xbf16>
    tpu.vector_store %arg9[%c0_164, %c1088, %c0_165], %88 {strides = array<i32>} : memref<2x1280x64xbf16, #tpu.memory_space<vmem>>, vector<2x32x64xbf16>,
    %c0_166 = arith.constant 0 : index
    %c0_167 = arith.constant 0 : index
    %c35 = arith.constant 35 : index
    %90 = vector.load %arg8[%c0_166, %c0_167, %c35] : memref<2x32x104xbf16, #tpu.memory_space<vmem>>, vector<2x32x64xbf16>
    %c0_168 = arith.constant 0 : index
    %c1120 = arith.constant 1120 : index
    %c0_169 = arith.constant 0 : index
    %91 = vector.load %arg9[%c0_168, %c1120, %c0_169] : memref<2x1280x64xbf16, #tpu.memory_space<vmem>>, vector<2x32x64xbf16>
    tpu.vector_store %arg9[%c0_168, %c1120, %c0_169], %90 {strides = array<i32>} : memref<2x1280x64xbf16, #tpu.memory_space<vmem>>, vector<2x32x64xbf16>,
    %c0_170 = arith.constant 0 : index
    %c0_171 = arith.constant 0 : index
    %c36 = arith.constant 36 : index
    %92 = vector.load %arg8[%c0_170, %c0_171, %c36] : memref<2x32x104xbf16, #tpu.memory_space<vmem>>, vector<2x32x64xbf16>
    %c0_172 = arith.constant 0 : index
    %c1152 = arith.constant 1152 : index
    %c0_173 = arith.constant 0 : index
    %93 = vector.load %arg9[%c0_172, %c1152, %c0_173] : memref<2x1280x64xbf16, #tpu.memory_space<vmem>>, vector<2x32x64xbf16>
    tpu.vector_store %arg9[%c0_172, %c1152, %c0_173], %92 {strides = array<i32>} : memref<2x1280x64xbf16, #tpu.memory_space<vmem>>, vector<2x32x64xbf16>,
    %c0_174 = arith.constant 0 : index
    %c0_175 = arith.constant 0 : index
    %c37 = arith.constant 37 : index
    %94 = vector.load %arg8[%c0_174, %c0_175, %c37] : memref<2x32x104xbf16, #tpu.memory_space<vmem>>, vector<2x32x64xbf16>
    %c0_176 = arith.constant 0 : index
    %c1184 = arith.constant 1184 : index
    %c0_177 = arith.constant 0 : index
    %95 = vector.load %arg9[%c0_176, %c1184, %c0_177] : memref<2x1280x64xbf16, #tpu.memory_space<vmem>>, vector<2x32x64xbf16>
    tpu.vector_store %arg9[%c0_176, %c1184, %c0_177], %94 {strides = array<i32>} : memref<2x1280x64xbf16, #tpu.memory_space<vmem>>, vector<2x32x64xbf16>,
    %c0_178 = arith.constant 0 : index
    %c0_179 = arith.constant 0 : index
    %c38 = arith.constant 38 : index
    %96 = vector.load %arg8[%c0_178, %c0_179, %c38] : memref<2x32x104xbf16, #tpu.memory_space<vmem>>, vector<2x32x64xbf16>
    %c0_180 = arith.constant 0 : index
    %c1216 = arith.constant 1216 : index
    %c0_181 = arith.constant 0 : index
    %97 = vector.load %arg9[%c0_180, %c1216, %c0_181] : memref<2x1280x64xbf16, #tpu.memory_space<vmem>>, vector<2x32x64xbf16>
    tpu.vector_store %arg9[%c0_180, %c1216, %c0_181], %96 {strides = array<i32>} : memref<2x1280x64xbf16, #tpu.memory_space<vmem>>, vector<2x32x64xbf16>,
    %c0_182 = arith.constant 0 : index
    %c0_183 = arith.constant 0 : index
    %c39 = arith.constant 39 : index
    %98 = vector.load %arg8[%c0_182, %c0_183, %c39] : memref<2x32x104xbf16, #tpu.memory_space<vmem>>, vector<2x32x64xbf16>
    %c0_184 = arith.constant 0 : index
    %c1248 = arith.constant 1248 : index
    %c0_185 = arith.constant 0 : index
    %99 = vector.load %arg9[%c0_184, %c1248, %c0_185] : memref<2x1280x64xbf16, #tpu.memory_space<vmem>>, vector<2x32x64xbf16>
    tpu.vector_store %arg9[%c0_184, %c1248, %c0_185], %98 {strides = array<i32>} : memref<2x1280x64xbf16, #tpu.memory_space<vmem>>, vector<2x32x64xbf16>,
    %cst_186 = arith.constant -3.389530e+38 : bf16
    %100 = vector.broadcast %cst_186 : bf16 to vector<2x32x1xbf16>
    %c0_187 = arith.constant 0 : index
    %c0_188 = arith.constant 0 : index
    %c18_189 = arith.constant 18 : index
    %101 = vector.load %arg8[%c0_187, %c0_188, %c18_189] : memref<2x32x104xbf16, #tpu.memory_space<vmem>>, vector<2x32x1xbf16>
    tpu.vector_store %arg8[%c0_187, %c0_188, %c18_189], %100 {strides = array<i32>} : memref<2x32x104xbf16, #tpu.memory_space<vmem>>, vector<2x32x1xbf16>,
    %c0_190 = arith.constant 0 : index
    %c0_191 = arith.constant 0 : index
    %c83_192 = arith.constant 83 : index
    %102 = vector.load %arg8[%c0_190, %c0_191, %c83_192] : memref<2x32x104xbf16, #tpu.memory_space<vmem>>, vector<2x32x1xbf16>
    tpu.vector_store %arg8[%c0_190, %c0_191, %c83_192], %100 {strides = array<i32>} : memref<2x32x104xbf16, #tpu.memory_space<vmem>>, vector<2x32x1xbf16>,
    %cst_193 = arith.constant 0.000000e+00 : f32
    %103 = vector.broadcast %cst_193 : f32 to vector<32x1xf32>
    %cst_194 = arith.constant 0.000000e+00 : f32
    %104 = vector.broadcast %cst_194 : f32 to vector<32x1xf32>
    %cst_195 = arith.constant 0.000000e+00 : f32
    %105 = vector.broadcast %cst_195 : f32 to vector<32x64xf32>
    %c0_196 = arith.constant 0 : index
    %c0_197 = arith.constant 0 : index
    %c0_198 = arith.constant 0 : index
    %106 = vector.load %arg3[%c0_196, %c0_197, %c0_198] : memref<5x32x256xbf16, #tpu.memory_space<vmem>>, vector<1x32x256xbf16>
    %107 = vector.shape_cast %106 : vector<1x32x256xbf16> to vector<32x256xbf16>
    %c0_199 = arith.constant 0 : index
    %c0_200 = arith.constant 0 : index
    %c0_201 = arith.constant 0 : index
    %108 = vector.load %arg9[%c0_199, %c0_200, %c0_201] : memref<2x1280x64xbf16, #tpu.memory_space<vmem>>, vector<1x256x64xbf16>
    %109 = vector.shape_cast %108 : vector<1x256x64xbf16> to vector<256x64xbf16>
    %cst_202 = arith.constant dense<0.000000e+00> : vector<32x64xf32>
    %110 = tpu.matmul %107, %109, %cst_202 {dimension_numbers = #tpu.dot_dimension_numbers<[1], [0], [0], [1], [0, 0, 1, 1], [], []>} : vector<32x256xbf16>, vector<256x64xbf16>, vector<32x64xf32> -> vector<32x64xf32>
    %111 = arith.addf %105, %110 : vector<32x64xf32>
    %c1_203 = arith.constant 1 : index
    %c0_204 = arith.constant 0 : index
    %c0_205 = arith.constant 0 : index
    %112 = vector.load %arg3[%c1_203, %c0_204, %c0_205] : memref<5x32x256xbf16, #tpu.memory_space<vmem>>, vector<1x32x256xbf16>
    %113 = vector.shape_cast %112 : vector<1x32x256xbf16> to vector<32x256xbf16>
    %c0_206 = arith.constant 0 : index
    %c256_207 = arith.constant 256 : index
    %c0_208 = arith.constant 0 : index
    %114 = vector.load %arg9[%c0_206, %c256_207, %c0_208] : memref<2x1280x64xbf16, #tpu.memory_space<vmem>>, vector<1x256x64xbf16>
    %115 = vector.shape_cast %114 : vector<1x256x64xbf16> to vector<256x64xbf16>
    %cst_209 = arith.constant dense<0.000000e+00> : vector<32x64xf32>
    %116 = tpu.matmul %113, %115, %cst_209 {dimension_numbers = #tpu.dot_dimension_numbers<[1], [0], [0], [1], [0, 0, 1, 1], [], []>} : vector<32x256xbf16>, vector<256x64xbf16>, vector<32x64xf32> -> vector<32x64xf32>
    %117 = arith.addf %111, %116 : vector<32x64xf32>
    %c2_210 = arith.constant 2 : index
    %c0_211 = arith.constant 0 : index
    %c0_212 = arith.constant 0 : index
    %118 = vector.load %arg3[%c2_210, %c0_211, %c0_212] : memref<5x32x256xbf16, #tpu.memory_space<vmem>>, vector<1x32x256xbf16>
    %119 = vector.shape_cast %118 : vector<1x32x256xbf16> to vector<32x256xbf16>
    %c0_213 = arith.constant 0 : index
    %c512_214 = arith.constant 512 : index
    %c0_215 = arith.constant 0 : index
    %120 = vector.load %arg9[%c0_213, %c512_214, %c0_215] : memref<2x1280x64xbf16, #tpu.memory_space<vmem>>, vector<1x256x64xbf16>
    %121 = vector.shape_cast %120 : vector<1x256x64xbf16> to vector<256x64xbf16>
    %cst_216 = arith.constant dense<0.000000e+00> : vector<32x64xf32>
    %122 = tpu.matmul %119, %121, %cst_216 {dimension_numbers = #tpu.dot_dimension_numbers<[1], [0], [0], [1], [0, 0, 1, 1], [], []>} : vector<32x256xbf16>, vector<256x64xbf16>, vector<32x64xf32> -> vector<32x64xf32>
    %123 = arith.addf %117, %122 : vector<32x64xf32>
    %c3_217 = arith.constant 3 : index
    %c0_218 = arith.constant 0 : index
    %c0_219 = arith.constant 0 : index
    %124 = vector.load %arg3[%c3_217, %c0_218, %c0_219] : memref<5x32x256xbf16, #tpu.memory_space<vmem>>, vector<1x32x256xbf16>
    %125 = vector.shape_cast %124 : vector<1x32x256xbf16> to vector<32x256xbf16>
    %c0_220 = arith.constant 0 : index
    %c768_221 = arith.constant 768 : index
    %c0_222 = arith.constant 0 : index
    %126 = vector.load %arg9[%c0_220, %c768_221, %c0_222] : memref<2x1280x64xbf16, #tpu.memory_space<vmem>>, vector<1x256x64xbf16>
    %127 = vector.shape_cast %126 : vector<1x256x64xbf16> to vector<256x64xbf16>
    %cst_223 = arith.constant dense<0.000000e+00> : vector<32x64xf32>
    %128 = tpu.matmul %125, %127, %cst_223 {dimension_numbers = #tpu.dot_dimension_numbers<[1], [0], [0], [1], [0, 0, 1, 1], [], []>} : vector<32x256xbf16>, vector<256x64xbf16>, vector<32x64xf32> -> vector<32x64xf32>
    %129 = arith.addf %123, %128 : vector<32x64xf32>
    %c4_224 = arith.constant 4 : index
    %c0_225 = arith.constant 0 : index
    %c0_226 = arith.constant 0 : index
    %130 = vector.load %arg3[%c4_224, %c0_225, %c0_226] : memref<5x32x256xbf16, #tpu.memory_space<vmem>>, vector<1x32x256xbf16>
    %131 = vector.shape_cast %130 : vector<1x32x256xbf16> to vector<32x256xbf16>
    %c0_227 = arith.constant 0 : index
    %c1024_228 = arith.constant 1024 : index
    %c0_229 = arith.constant 0 : index
    %132 = vector.load %arg9[%c0_227, %c1024_228, %c0_229] : memref<2x1280x64xbf16, #tpu.memory_space<vmem>>, vector<1x256x64xbf16>
    %133 = vector.shape_cast %132 : vector<1x256x64xbf16> to vector<256x64xbf16>
    %cst_230 = arith.constant dense<0.000000e+00> : vector<32x64xf32>
    %134 = tpu.matmul %131, %133, %cst_230 {dimension_numbers = #tpu.dot_dimension_numbers<[1], [0], [0], [1], [0, 0, 1, 1], [], []>} : vector<32x256xbf16>, vector<256x64xbf16>, vector<32x64xf32> -> vector<32x64xf32>
    %135 = arith.addf %129, %134 : vector<32x64xf32>
    %c0_231 = arith.constant 0 : index
    %c0_232 = arith.constant 0 : index
    %c19_233 = arith.constant 19 : index
    %136 = vector.load %arg8[%c0_231, %c0_232, %c19_233] : memref<2x32x104xbf16, #tpu.memory_space<vmem>>, vector<1x32x64xbf16>
    %137 = vector.shape_cast %136 : vector<1x32x64xbf16> to vector<32x64xbf16>
    %c0_234 = arith.constant 0 : index
    %c0_235 = arith.constant 0 : index
    %c18_236 = arith.constant 18 : index
    %138 = vector.load %arg8[%c0_234, %c0_235, %c18_236] : memref<2x32x104xbf16, #tpu.memory_space<vmem>>, vector<1x32x64xbf16>
    %139 = vector.shape_cast %138 : vector<1x32x64xbf16> to vector<32x64xbf16>
    %c0_237 = arith.constant 0 : index
    %c0_238 = arith.constant 0 : index
    %c20_239 = arith.constant 20 : index
    %140 = vector.load %arg8[%c0_237, %c0_238, %c20_239] : memref<2x32x104xbf16, #tpu.memory_space<vmem>>, vector<1x32x64xbf16>
    %141 = vector.shape_cast %140 : vector<1x32x64xbf16> to vector<32x64xbf16>
    %142 = arith.maximumf %139, %141 : vector<32x64xbf16>
    %143 = arith.maximumf %137, %142 : vector<32x64xbf16>
    %c0_240 = arith.constant 0 : index
    %c0_241 = arith.constant 0 : index
    %144 = vector.load %arg4[%c0_240, %c0_241] : memref<32x32xbf16, #tpu.memory_space<vmem>>, vector<32x32xbf16>
    %cst_242 = arith.constant dense<0.000000e+00> : vector<32x64xf32>
    %145 = tpu.matmul %144, %143, %cst_242 {dimension_numbers = #tpu.dot_dimension_numbers<[1], [0], [0], [1], [0, 0, 1, 1], [], []>} : vector<32x32xbf16>, vector<32x64xbf16>, vector<32x64xf32> -> vector<32x64xf32>
    %146 = arith.addf %135, %145 : vector<32x64xf32>
    %cst_243 = arith.constant dense<0.000000e+00> : vector<32xf32>
    %147 = vector.multi_reduction <add>, %146, %cst_243 [1] : vector<32x64xf32> to vector<32xf32>
    %148 = vector.shape_cast %147 : vector<32xf32> to vector<32x1xf32>
    %149 = arith.addf %103, %148 : vector<32x1xf32>
    %150 = arith.mulf %146, %146 : vector<32x64xf32>
    %cst_244 = arith.constant dense<0.000000e+00> : vector<32xf32>
    %151 = vector.multi_reduction <add>, %150, %cst_244 [1] : vector<32x64xf32> to vector<32xf32>
    %152 = vector.shape_cast %151 : vector<32xf32> to vector<32x1xf32>
    %153 = arith.addf %104, %152 : vector<32x1xf32>
    %154 = arith.truncf %146 : vector<32x64xf32> to vector<32x64xbf16>
    %c0_245 = arith.constant 0 : index
    %c0_246 = arith.constant 0 : index
    %c0_247 = arith.constant 0 : index
    %155 = vector.load %arg5[%c0_245, %c0_246, %c0_247] : memref<2x32x64xbf16, #tpu.memory_space<vmem>>, vector<1x32x64xbf16>
    %156 = vector.shape_cast %155 : vector<1x32x64xbf16> to vector<32x64xbf16>
    %157 = vector.shape_cast %154 : vector<32x64xbf16> to vector<1x32x64xbf16>
    tpu.vector_store %arg5[%c0_245, %c0_246, %c0_247], %157 {strides = array<i32>} : memref<2x32x64xbf16, #tpu.memory_space<vmem>>, vector<1x32x64xbf16>,
    %cst_248 = arith.constant 0.000000e+00 : f32
    %158 = vector.broadcast %cst_248 : f32 to vector<32x64xf32>
    %c0_249 = arith.constant 0 : index
    %c0_250 = arith.constant 0 : index
    %c0_251 = arith.constant 0 : index
    %159 = vector.load %arg3[%c0_249, %c0_250, %c0_251] : memref<5x32x256xbf16, #tpu.memory_space<vmem>>, vector<1x32x256xbf16>
    %160 = vector.shape_cast %159 : vector<1x32x256xbf16> to vector<32x256xbf16>
    %c1_252 = arith.constant 1 : index
    %c0_253 = arith.constant 0 : index
    %c0_254 = arith.constant 0 : index
    %161 = vector.load %arg9[%c1_252, %c0_253, %c0_254] : memref<2x1280x64xbf16, #tpu.memory_space<vmem>>, vector<1x256x64xbf16>
    %162 = vector.shape_cast %161 : vector<1x256x64xbf16> to vector<256x64xbf16>
    %cst_255 = arith.constant dense<0.000000e+00> : vector<32x64xf32>
    %163 = tpu.matmul %160, %162, %cst_255 {dimension_numbers = #tpu.dot_dimension_numbers<[1], [0], [0], [1], [0, 0, 1, 1], [], []>} : vector<32x256xbf16>, vector<256x64xbf16>, vector<32x64xf32> -> vector<32x64xf32>
    %164 = arith.addf %158, %163 : vector<32x64xf32>
    %c1_256 = arith.constant 1 : index
    %c0_257 = arith.constant 0 : index
    %c0_258 = arith.constant 0 : index
    %165 = vector.load %arg3[%c1_256, %c0_257, %c0_258] : memref<5x32x256xbf16, #tpu.memory_space<vmem>>, vector<1x32x256xbf16>
    %166 = vector.shape_cast %165 : vector<1x32x256xbf16> to vector<32x256xbf16>
    %c1_259 = arith.constant 1 : index
    %c256_260 = arith.constant 256 : index
    %c0_261 = arith.constant 0 : index
    %167 = vector.load %arg9[%c1_259, %c256_260, %c0_261] : memref<2x1280x64xbf16, #tpu.memory_space<vmem>>, vector<1x256x64xbf16>
    %168 = vector.shape_cast %167 : vector<1x256x64xbf16> to vector<256x64xbf16>
    %cst_262 = arith.constant dense<0.000000e+00> : vector<32x64xf32>
    %169 = tpu.matmul %166, %168, %cst_262 {dimension_numbers = #tpu.dot_dimension_numbers<[1], [0], [0], [1], [0, 0, 1, 1], [], []>} : vector<32x256xbf16>, vector<256x64xbf16>, vector<32x64xf32> -> vector<32x64xf32>
    %170 = arith.addf %164, %169 : vector<32x64xf32>
    %c2_263 = arith.constant 2 : index
    %c0_264 = arith.constant 0 : index
    %c0_265 = arith.constant 0 : index
    %171 = vector.load %arg3[%c2_263, %c0_264, %c0_265] : memref<5x32x256xbf16, #tpu.memory_space<vmem>>, vector<1x32x256xbf16>
    %172 = vector.shape_cast %171 : vector<1x32x256xbf16> to vector<32x256xbf16>
    %c1_266 = arith.constant 1 : index
    %c512_267 = arith.constant 512 : index
    %c0_268 = arith.constant 0 : index
    %173 = vector.load %arg9[%c1_266, %c512_267, %c0_268] : memref<2x1280x64xbf16, #tpu.memory_space<vmem>>, vector<1x256x64xbf16>
    %174 = vector.shape_cast %173 : vector<1x256x64xbf16> to vector<256x64xbf16>
    %cst_269 = arith.constant dense<0.000000e+00> : vector<32x64xf32>
    %175 = tpu.matmul %172, %174, %cst_269 {dimension_numbers = #tpu.dot_dimension_numbers<[1], [0], [0], [1], [0, 0, 1, 1], [], []>} : vector<32x256xbf16>, vector<256x64xbf16>, vector<32x64xf32> -> vector<32x64xf32>
    %176 = arith.addf %170, %175 : vector<32x64xf32>
    %c3_270 = arith.constant 3 : index
    %c0_271 = arith.constant 0 : index
    %c0_272 = arith.constant 0 : index
    %177 = vector.load %arg3[%c3_270, %c0_271, %c0_272] : memref<5x32x256xbf16, #tpu.memory_space<vmem>>, vector<1x32x256xbf16>
    %178 = vector.shape_cast %177 : vector<1x32x256xbf16> to vector<32x256xbf16>
    %c1_273 = arith.constant 1 : index
    %c768_274 = arith.constant 768 : index
    %c0_275 = arith.constant 0 : index
    %179 = vector.load %arg9[%c1_273, %c768_274, %c0_275] : memref<2x1280x64xbf16, #tpu.memory_space<vmem>>, vector<1x256x64xbf16>
    %180 = vector.shape_cast %179 : vector<1x256x64xbf16> to vector<256x64xbf16>
    %cst_276 = arith.constant dense<0.000000e+00> : vector<32x64xf32>
    %181 = tpu.matmul %178, %180, %cst_276 {dimension_numbers = #tpu.dot_dimension_numbers<[1], [0], [0], [1], [0, 0, 1, 1], [], []>} : vector<32x256xbf16>, vector<256x64xbf16>, vector<32x64xf32> -> vector<32x64xf32>
    %182 = arith.addf %176, %181 : vector<32x64xf32>
    %c4_277 = arith.constant 4 : index
    %c0_278 = arith.constant 0 : index
    %c0_279 = arith.constant 0 : index
    %183 = vector.load %arg3[%c4_277, %c0_278, %c0_279] : memref<5x32x256xbf16, #tpu.memory_space<vmem>>, vector<1x32x256xbf16>
    %184 = vector.shape_cast %183 : vector<1x32x256xbf16> to vector<32x256xbf16>
    %c1_280 = arith.constant 1 : index
    %c1024_281 = arith.constant 1024 : index
    %c0_282 = arith.constant 0 : index
    %185 = vector.load %arg9[%c1_280, %c1024_281, %c0_282] : memref<2x1280x64xbf16, #tpu.memory_space<vmem>>, vector<1x256x64xbf16>
    %186 = vector.shape_cast %185 : vector<1x256x64xbf16> to vector<256x64xbf16>
    %cst_283 = arith.constant dense<0.000000e+00> : vector<32x64xf32>
    %187 = tpu.matmul %184, %186, %cst_283 {dimension_numbers = #tpu.dot_dimension_numbers<[1], [0], [0], [1], [0, 0, 1, 1], [], []>} : vector<32x256xbf16>, vector<256x64xbf16>, vector<32x64xf32> -> vector<32x64xf32>
    %188 = arith.addf %182, %187 : vector<32x64xf32>
    %c1_284 = arith.constant 1 : index
    %c0_285 = arith.constant 0 : index
    %c19_286 = arith.constant 19 : index
    %189 = vector.load %arg8[%c1_284, %c0_285, %c19_286] : memref<2x32x104xbf16, #tpu.memory_space<vmem>>, vector<1x32x64xbf16>
    %190 = vector.shape_cast %189 : vector<1x32x64xbf16> to vector<32x64xbf16>
    %c1_287 = arith.constant 1 : index
    %c0_288 = arith.constant 0 : index
    %c18_289 = arith.constant 18 : index
    %191 = vector.load %arg8[%c1_287, %c0_288, %c18_289] : memref<2x32x104xbf16, #tpu.memory_space<vmem>>, vector<1x32x64xbf16>
    %192 = vector.shape_cast %191 : vector<1x32x64xbf16> to vector<32x64xbf16>
    %c1_290 = arith.constant 1 : index
    %c0_291 = arith.constant 0 : index
    %c20_292 = arith.constant 20 : index
    %193 = vector.load %arg8[%c1_290, %c0_291, %c20_292] : memref<2x32x104xbf16, #tpu.memory_space<vmem>>, vector<1x32x64xbf16>
    %194 = vector.shape_cast %193 : vector<1x32x64xbf16> to vector<32x64xbf16>
    %195 = arith.maximumf %192, %194 : vector<32x64xbf16>
    %196 = arith.maximumf %190, %195 : vector<32x64xbf16>
    %c0_293 = arith.constant 0 : index
    %c0_294 = arith.constant 0 : index
    %197 = vector.load %arg4[%c0_293, %c0_294] : memref<32x32xbf16, #tpu.memory_space<vmem>>, vector<32x32xbf16>
    %cst_295 = arith.constant dense<0.000000e+00> : vector<32x64xf32>
    %198 = tpu.matmul %197, %196, %cst_295 {dimension_numbers = #tpu.dot_dimension_numbers<[1], [0], [0], [1], [0, 0, 1, 1], [], []>} : vector<32x32xbf16>, vector<32x64xbf16>, vector<32x64xf32> -> vector<32x64xf32>
    %199 = arith.addf %188, %198 : vector<32x64xf32>
    %cst_296 = arith.constant dense<0.000000e+00> : vector<32xf32>
    %200 = vector.multi_reduction <add>, %199, %cst_296 [1] : vector<32x64xf32> to vector<32xf32>
    %201 = vector.shape_cast %200 : vector<32xf32> to vector<32x1xf32>
    %202 = arith.addf %149, %201 : vector<32x1xf32>
    %203 = arith.mulf %199, %199 : vector<32x64xf32>
    %cst_297 = arith.constant dense<0.000000e+00> : vector<32xf32>
    %204 = vector.multi_reduction <add>, %203, %cst_297 [1] : vector<32x64xf32> to vector<32xf32>
    %205 = vector.shape_cast %204 : vector<32xf32> to vector<32x1xf32>
    %206 = arith.addf %153, %205 : vector<32x1xf32>
    %207 = arith.truncf %199 : vector<32x64xf32> to vector<32x64xbf16>
    %c1_298 = arith.constant 1 : index
    %c0_299 = arith.constant 0 : index
    %c0_300 = arith.constant 0 : index
    %208 = vector.load %arg5[%c1_298, %c0_299, %c0_300] : memref<2x32x64xbf16, #tpu.memory_space<vmem>>, vector<1x32x64xbf16>
    %209 = vector.shape_cast %208 : vector<1x32x64xbf16> to vector<32x64xbf16>
    %210 = vector.shape_cast %207 : vector<32x64xbf16> to vector<1x32x64xbf16>
    tpu.vector_store %arg5[%c1_298, %c0_299, %c0_300], %210 {strides = array<i32>} : memref<2x32x64xbf16, #tpu.memory_space<vmem>>, vector<1x32x64xbf16>,
    %211 = vector.shape_cast %202 : vector<32x1xf32> to vector<1x32x1xf32>
    %c0_301 = arith.constant 0 : index
    %c0_302 = arith.constant 0 : index
    %c0_303 = arith.constant 0 : index
    %212 = vector.load %arg6[%c0_301, %c0_302, %c0_303] : memref<1x32x1xf32, #tpu.memory_space<vmem>>, vector<1x32x1xf32>
    tpu.vector_store %arg6[%c0_301, %c0_302, %c0_303], %211 {strides = array<i32>} : memref<1x32x1xf32, #tpu.memory_space<vmem>>, vector<1x32x1xf32>,
    %213 = vector.shape_cast %206 : vector<32x1xf32> to vector<1x32x1xf32>
    %c0_304 = arith.constant 0 : index
    %c0_305 = arith.constant 0 : index
    %c0_306 = arith.constant 0 : index
    %214 = vector.load %arg7[%c0_304, %c0_305, %c0_306] : memref<1x32x1xf32, #tpu.memory_space<vmem>>, vector<1x32x1xf32>
    tpu.vector_store %arg7[%c0_304, %c0_305, %c0_306], %213 {strides = array<i32>} : memref<1x32x1xf32, #tpu.memory_space<vmem>>, vector<1x32x1xf32>,
    return
  }
  func.func @transform_0(%arg0: i32) -> (i32, i32, i32) {
    %c0_i32 = arith.constant 0 : i32
    %c0_i32_0 = arith.constant 0 : i32
    %c0_i32_1 = arith.constant 0 : i32
    return %arg0, %c0_i32, %c0_i32_0 : i32, i32, i32
  }
  func.func @transform_1(%arg0: i32) -> (i32, i32) {
    %c0_i32 = arith.constant 0 : i32
    %c0_i32_0 = arith.constant 0 : i32
    %c0_i32_1 = arith.constant 0 : i32
    return %c0_i32, %c0_i32_0 : i32, i32
  }
  func.func @transform_2(%arg0: i32) -> (i32, i32, i32) {
    %c0_i32 = arith.constant 0 : i32
    %c0_i32_0 = arith.constant 0 : i32
    %c0_i32_1 = arith.constant 0 : i32
    %c0_i32_2 = arith.constant 0 : i32
    return %c0_i32, %c0_i32_0, %c0_i32_1 : i32, i32, i32
  }
  func.func @transform_3(%arg0: i32) -> (i32, i32) {
    %c0_i32 = arith.constant 0 : i32
    %c0_i32_0 = arith.constant 0 : i32
    %c0_i32_1 = arith.constant 0 : i32
    return %c0_i32, %c0_i32_0 : i32, i32
  }
  func.func @transform_4(%arg0: i32) -> (i32, i32, i32) {
    %c0_i32 = arith.constant 0 : i32
    %c0_i32_0 = arith.constant 0 : i32
    %c0_i32_1 = arith.constant 0 : i32
    return %arg0, %c0_i32, %c0_i32_0 : i32, i32, i32
  }
  func.func @transform_5(%arg0: i32) -> (i32, i32, i32) {
    %c0_i32 = arith.constant 0 : i32
    %c0_i32_0 = arith.constant 0 : i32
    %c0_i32_1 = arith.constant 0 : i32
    return %arg0, %c0_i32, %c0_i32_0 : i32, i32, i32
  }
  func.func @transform_6(%arg0: i32) -> (i32, i32, i32) {
    %c0_i32 = arith.constant 0 : i32
    %c0_i32_0 = arith.constant 0 : i32
    %c0_i32_1 = arith.constant 0 : i32
    return %arg0, %c0_i32, %c0_i32_0 : i32, i32, i32
  }
}

module attributes {stable_mosaic.version = 11 : i64} {
  func.func @_bn_relu_kernel(%arg0: i32, %arg1: memref<2x32x64xbf16, #tpu.memory_space<vmem>>, %arg2: memref<32x1xf32, #tpu.memory_space<vmem>>, %arg3: memref<32x1xf32, #tpu.memory_space<vmem>>, %arg4: memref<2x32x64xf32, #tpu.memory_space<vmem>>) attributes {dimension_semantics = [#tpu.dimension_semantics<parallel>], iteration_bounds = array<i64: 2>, scalar_prefetch = 0 : i64, scratch_operands = 0 : i64, tpu.core_type = #tpu.core_type<tc>, window_params = [{transform_indices = @transform_0, window_bounds = array<i64: 2, 32, 64>}, {pipeline_mode = #tpu.pipeline_mode<synchronous>, transform_indices = @transform_1, window_bounds = array<i64: 32, 1>}, {pipeline_mode = #tpu.pipeline_mode<synchronous>, transform_indices = @transform_2, window_bounds = array<i64: 32, 1>}, {transform_indices = @transform_3, window_bounds = array<i64: 2, 32, 64>}]} {
    %c0 = arith.constant 0 : index
    %c0_0 = arith.constant 0 : index
    %c0_1 = arith.constant 0 : index
    %0 = vector.load %arg1[%c0, %c0_0, %c0_1] : memref<2x32x64xbf16, #tpu.memory_space<vmem>>, vector<2x32x64xbf16>
    %1 = arith.extf %0 : vector<2x32x64xbf16> to vector<2x32x64xf32>
    %c0_2 = arith.constant 0 : index
    %c0_3 = arith.constant 0 : index
    %2 = vector.load %arg2[%c0_2, %c0_3] : memref<32x1xf32, #tpu.memory_space<vmem>>, vector<32x1xf32>
    %3 = vector.shape_cast %2 : vector<32x1xf32> to vector<1x32x1xf32>
    %4 = vector.broadcast %3 : vector<1x32x1xf32> to vector<2x32x64xf32>
    %5 = arith.mulf %1, %4 : vector<2x32x64xf32>
    %c0_4 = arith.constant 0 : index
    %c0_5 = arith.constant 0 : index
    %6 = vector.load %arg3[%c0_4, %c0_5] : memref<32x1xf32, #tpu.memory_space<vmem>>, vector<32x1xf32>
    %7 = vector.shape_cast %6 : vector<32x1xf32> to vector<1x32x1xf32>
    %8 = vector.broadcast %7 : vector<1x32x1xf32> to vector<2x32x64xf32>
    %9 = arith.addf %5, %8 : vector<2x32x64xf32>
    %cst = arith.constant 0.000000e+00 : f32
    %10 = vector.broadcast %cst : f32 to vector<2x32x64xf32>
    %11 = arith.maximumf %9, %10 : vector<2x32x64xf32>
    %c0_6 = arith.constant 0 : index
    %c0_7 = arith.constant 0 : index
    %c0_8 = arith.constant 0 : index
    %12 = vector.load %arg4[%c0_6, %c0_7, %c0_8] : memref<2x32x64xf32, #tpu.memory_space<vmem>>, vector<2x32x64xf32>
    tpu.vector_store %arg4[%c0_6, %c0_7, %c0_8], %11 {strides = array<i32>} : memref<2x32x64xf32, #tpu.memory_space<vmem>>, vector<2x32x64xf32>,
    return
  }
  func.func @transform_0(%arg0: i32) -> (i32, i32, i32) {
    %c0_i32 = arith.constant 0 : i32
    %c0_i32_0 = arith.constant 0 : i32
    %c0_i32_1 = arith.constant 0 : i32
    return %arg0, %c0_i32, %c0_i32_0 : i32, i32, i32
  }
  func.func @transform_1(%arg0: i32) -> (i32, i32) {
    %c0_i32 = arith.constant 0 : i32
    %c0_i32_0 = arith.constant 0 : i32
    %c0_i32_1 = arith.constant 0 : i32
    return %c0_i32, %c0_i32_0 : i32, i32
  }
  func.func @transform_2(%arg0: i32) -> (i32, i32) {
    %c0_i32 = arith.constant 0 : i32
    %c0_i32_0 = arith.constant 0 : i32
    %c0_i32_1 = arith.constant 0 : i32
    return %c0_i32, %c0_i32_0 : i32, i32
  }
  func.func @transform_3(%arg0: i32) -> (i32, i32, i32) {
    %c0_i32 = arith.constant 0 : i32
    %c0_i32_0 = arith.constant 0 : i32
    %c0_i32_1 = arith.constant 0 : i32
    return %arg0, %c0_i32, %c0_i32_0 : i32, i32, i32
  }
}

</mosaic_0001>

<bundles_post_ra>
// kernel: inception_block.3
= control target key start
LH: loop header
LB: loop body
LE: loop exit
PB: predicated region body
PF: predicated region fallthrough
CT: control target
= control target key end

     0   :  { %8 = vsyncpa [#allocation3], 0  ;;  %s650_s0 = inlined_call_operand.vmem [shape: bf16[4,32,64], index: 0, kind: input, shape index: {}]   ;;  %s651_s1 = inlined_call_operand.vmem [shape: f32[32,1], index: 1, kind: input, shape index: {}]   ;;  %s652_s2 = inlined_call_operand.vmem [shape: f32[32,1], index: 2, kind: input, shape index: {}]   ;;  %s653_s3 = inlined_call_operand.hbm [shape: f32[4,32,64], index: 3, kind: output, shape index: {}]  }
   0x1   :  { %10 = vsyncpa [#allocation3 + $0x1], 0  ;;  %s519_s12 = smov 0   ;;  %s521_s13 = smov 0  }
   0x2   :  { %s523_s14 = smov 0   ;;  %s525_s15 = smov 0  }
   0x3 LB: > { %s540_s16 = sadd.s32 4294967295, %s494_s15   ;;  %s351_s17 = sadd.s32 4294967294, %s494_s15   ;;  %s494_s15 = sphi %s525_s15, %s659_s15   ;;  %s490_s14 = sphi %s523_s14, %s658_s14   ;;  %s486_s13 = sphi %s521_s13, %s657_s13   ;;  %s482_s12 = sphi %s519_s12, %s656_s12  }
   0x4   : > { %s544_s18 = sadd.s32 1, %s494_s15   ;;  %s91_s19 = sadd.s32 1, %s490_s14 }
   0x5   : > { %s88_s20 = ssub.s32 %s494_s15, %s544_s18  ;;  %p101_p0 = scmp.ne.s32.totalorder %s490_s14, %s486_s13 }
   0x6   : > { %p89_p1 = scmp.eq.s32.totalorder %s88_s20, 0  ;;  %p102_p2 = scmp.eq.s32.totalorder %s540_s16, 1 }
   0x7   : > { %p107_p3 = scmp.ne.s32.totalorder %s486_s13, %s482_s12  ;;  %p108_p4 = scmp.eq.s32.totalorder %s351_s17, 1 }
   0x8   : > { %s555_s21 = scalar_select %p89_p1, %s490_s14, %s91_s19  }
   0x9   : > { %p557_p5 = por %p102_p2, %p101_p0  ;;  %p561_p6 = por %p108_p4, %p107_p3 }
   0xa   : > { %p354_p7 = scmp.ge.s32.totalorder %s494_s15, 1  ;;  %p142_p8 = scmp.lt.s32.totalorder %s494_s15, 3 }
   0xc   : > { %p143_p9 = pnand %p354_p7, %p142_p8 }
   0xd   : > { %s356_s19 = sshll.u32 (!%p143_p9), %s540_s16, 1  ;;  %s164_s27 = sand.u32 (!%p143_p9), 1, %s486_s13  }
   0xe   : > { %146 = sbr.rel (%p143_p9) target bundleno = 163 (0xa3), region = 32  ;;  %p168_p10 = scmp.lt.s32.totalorder (!%p143_p9), %s356_s19, 3 }
   0xf   : > { %s355_s28 = sshll.u32 (!%p143_p9), %s164_s27, 6  ;;  %s367_s30 = sshll.u32 (!%p143_p9), %s540_s16, 6 }
  0x10   : > { %s598_s29 = scalar_lea.vmem (!%p143_p9), [#allocation2], %s355_s28  ;;  %s285_s6 = scalar_lea.hbm (!%p143_p9), %s653_s3, %s367_s30 }
  0x11   : > { %s286_s16 = sshll.u32 (!%p143_p9), %s598_s29, 4  ;;  %s288_s7 = sshll.u32 (!%p143_p9), %s285_s6, 4  ;;  %s287_s16 = int_to_ptr.vmem [resolvable:$true] %s286_s16  ;;  %s289_s7 = int_to_ptr.hbm [resolvable:$true] %s288_s7 }
  0x12   : > { %s273_s8 = scalar_lea.sflag (!%p143_p9), [#allocation3], %s164_s27  ;;  %s446_s9 = sshra.s32 (!%p143_p9), %s289_s7, 4  ;;  %s447_s9 = int_to_ptr.hbm [resolvable:$true] %s446_s9 }
  0x13   : > { %v193_v0 = vld [vmem:[%s651_s1 + $0x10] sm:$0xff]  ;;  %v191_v1 = vld [vmem:[%s651_s1] sm:$0xff]  ;;  %v496_v2 = vmov 0   ;;  %v194_v4 = vld [vmem:[%s651_s1 + $0x18] sm:$0xff]  ;;  %s661_s19 = smov (!%p168_p10, %s356_s19), 3  ;;  %vm263_vm0 = vcmask 523264   ;;  %p453_p0 = scmp.lt.s32.totalorder %s447_s9, %s653_s3 }
  0x14   : > { %430 = vset.pattern.permute.xlu1 %v496_v2  ;;  %429 = vset.pattern.permute.xlu0 %v496_v2  ;;  %v223_v3 = vld [vmem:[%s652_s2] sm:$0xff]  ;;  %v192_v5 = vld [vmem:[%s651_s1 + $0x8] sm:$0xff]  ;;  %v226_v7 = vld [vmem:[%s652_s2 + $0x18] sm:$0xff]  ;;  %s365_s20 = sshll.u32 %s661_s19, 4  ;;  %s448_s10 = scalar_lea.hbm %s447_s9, 64 }
  0x15   : > { %207 = vperm.xlu1 %430, %v193_v0   ;;  %197 = vperm.xlu0 %429, %v191_v1   ;;  %v224_v6 = vld [vmem:[%s652_s2 + $0x8] sm:$0xff]  ;;  %v225_v8 = vld [vmem:[%s652_s2 + $0x10] sm:$0xff]  ;;  %s172_s26 = scalar_lea.vmem %s650_s0, %s365_s20  ;;  %p449_p11 = scmp.ne.s32.totalorder %s447_s9, %s448_s10 }
  0x16   : > { %431 = vset.pattern.permute.xlu2 %v496_v2  ;;  %v369_v9 = vld [vmem:[%s172_s26] sm:$0xff]   ;;  %v385_v10 = vld [vmem:[%s172_s26 + $0x10] sm:$0xff]   ;;  %v384_v24 = vld [vmem:[%s172_s26 + $0x8] sm:$0xff]   ;;  %s452_s19 = scalar_lea.hbm %s653_s3, 128 }
  0x17   : > { %229 = vperm.xlu2 %431, %v223_v3   ;;  %v370_v11 = vunpack.c.l.bf16 %v369_v9  ;;  %v378_v12 = vunpack.c.l.bf16 %v385_v10  ;;  %v371_v22 = vunpack.c.h.bf16 %v369_v9  ;;  %v379_v23 = vunpack.c.h.bf16 %v385_v10  ;;  %v386_v25 = vld [vmem:[%s172_s26 + $0x18] sm:$0xff]   ;;  %p450_p12 = pnand %p449_p11, %p557_p5  ;;  %p454_p1 = scmp.lt.s32.totalorder %s452_s19, %s448_s10 }
  0x18   : > { %v374_v30 = vunpack.c.l.bf16 %v384_v24  ;;  %v382_v31 = vunpack.c.l.bf16 %v386_v25  ;;  %v375_v33 = vunpack.c.h.bf16 %v384_v24  ;;  %v383_v34 = vunpack.c.h.bf16 %v386_v25 }
  0x19   : > { %p451_p13 = pneg %p450_p12  ;;  %p455_p2 = por %p454_p1, %p453_p0 }
  0x1b   : > { %p456_p3 = pnand %p455_p2, %p451_p13 }
  0x1d   : > { %212 = vperm.xlu1 %430, %v194_v4   ;;  %202 = vperm.xlu0 %429, %v192_v5  }
  0x1f   : > { %234 = vperm.xlu2 %431, %v224_v6  }
  0x25   : > { %244 = vperm.xlu1 %430, %v226_v7   ;;  %239 = vperm.xlu0 %429, %v225_v8  }
  0x71   : > { %v230_v13 = vpop.permute.xlu2 %229 }
  0x79   : > { %v235_v32 = vpop.permute.xlu2 %234 }
  0x87   : > { %v208_v14 = vpop.permute.xlu1 %207  ;;  %v198_v15 = vpop.permute.xlu0 %197 }
  0x88   : > { %v215_v16 = vmul.f32 %v370_v11, %v198_v15  ;;  %v219_v17 = vmul.f32 %v378_v12, %v198_v15  ;;  %v217_v39 = vmul.f32 %v374_v30, %v208_v14  ;;  %v221_v40 = vmul.f32 %v382_v31, %v208_v14 }
  0x8a   : > { %v247_v18 = vadd.f32 %v230_v13, %v215_v16  ;;  %v251_v19 = vadd.f32 %v230_v13, %v219_v17 }
  0x8c   : > { %v255_v20 = vmax.f32 %v247_v18, 0.0  ;;  %v259_v21 = vmax.f32 %v251_v19, 0.0 }
  0x8e   : > { %264 = vst.msk [vmem:[%s598_s29] sm:$0xff] %vm263_vm0, %v255_v20 }
  0x8f   : > { %268 = vst.msk [vmem:[%s598_s29 + $0x20] sm:$0xff] %vm263_vm0, %v259_v21  ;;  %v213_v26 = vpop.permute.xlu1 %212  ;;  %v203_v27 = vpop.permute.xlu0 %202 }
  0x90   : > { %v216_v28 = vmul.f32 %v371_v22, %v203_v27  ;;  %v220_v29 = vmul.f32 %v379_v23, %v203_v27  ;;  %v218_v41 = vmul.f32 %v375_v33, %v213_v26  ;;  %v222_v42 = vmul.f32 %v383_v34, %v213_v26 }
  0x92   : > { %v248_v35 = vadd.f32 %v235_v32, %v216_v28  ;;  %v252_v36 = vadd.f32 %v235_v32, %v220_v29 }
  0x94   : > { %v256_v37 = vmax.f32 %v248_v35, 0.0  ;;  %v260_v38 = vmax.f32 %v252_v36, 0.0 }
  0x96   : > { %265 = vst.msk [vmem:[%s598_s29 + $0x8] sm:$0xff] %vm263_vm0, %v256_v37 }
  0x97   : > { %269 = vst.msk [vmem:[%s598_s29 + $0x28] sm:$0xff] %vm263_vm0, %v260_v38  ;;  %v245_v43 = vpop.permute.xlu1 %244  ;;  %v240_v44 = vpop.permute.xlu0 %239 }
  0x98   : > { %v250_v45 = vadd.f32 %v245_v43, %v218_v41  ;;  %v254_v46 = vadd.f32 %v245_v43, %v222_v42  ;;  %v249_v47 = vadd.f32 %v240_v44, %v217_v39  ;;  %v253_v48 = vadd.f32 %v240_v44, %v221_v40 }
  0x9a   : > { %v258_v49 = vmax.f32 %v250_v45, 0.0  ;;  %v262_v50 = vmax.f32 %v254_v46, 0.0  ;;  %v257_v51 = vmax.f32 %v249_v47, 0.0  ;;  %v261_v52 = vmax.f32 %v253_v48, 0.0 }
  0x9c   : > { %267 = vst.msk [vmem:[%s598_s29 + $0x18] sm:$0xff] %vm263_vm0, %v258_v49 }
  0x9d   : > { %271 = vst.msk [vmem:[%s598_s29 + $0x38] sm:$0xff] %vm263_vm0, %v262_v50 }
  0x9e   : > { %266 = vst.msk [vmem:[%s598_s29 + $0x10] sm:$0xff] %vm263_vm0, %v257_v51 }
  0x9f   : > { %270 = vst.msk [vmem:[%s598_s29 + $0x30] sm:$0xff] %vm263_vm0, %v261_v52 }
  0xa0   : > { %459 = shalt.err (!%p456_p3)
}
  0xa1   : > { %s497_s25 = smov 128   ;;  %s498_s26 = smov 8  }
  0xa2   : > { %387 = dma.vmem_to_hbm [thread:$0]  (%p557_p5), %s287_s16, 1024, %s289_s7, %s273_s8, %s497_s25, %s497_s25, %s498_s26  }
  0xa3 PF: > { %p393_p4 = scmp.ge.s32.totalorder %s494_s15, 2  ;;  %s303_s27 = sand.u32 1, %s482_s12  }
  0xa4   : > { %s304_s28 = scalar_lea.sflag [#allocation3], %s303_s27 }
  0xa5   : > { %p390_p7 = pnand %p393_p4, %p561_p6 }
  0xa7   : > { %p391_p8 = pneg %p390_p7 }
  0xa9   : > { %477 = dma.done.wait (%p391_p8), %s304_s28, 1024  }
  0xaa   : > { %479 = vsyncadd (%p391_p8), %s304_s28, 4294966272  ;;  %p13_p9 = scmp.ge.s32.totalorder %s544_s18, 4   ;;  %s656_s12 = smov %s486_s13 }
  0xab   : > { %s657_s13 = smov %s490_s14  ;;  %s658_s14 = smov %s555_s21 }
  0xac   : > { %s659_s15 = smov %s544_s18  ;;  %15 = sbr.rel (!%p13_p9) target bundleno = 3 (0x3), region = 67 }
  0xb1   :  { %310 = vsyncpa [#allocation3], 1 }
  0xb2   :  { %312 = vsyncpa [#allocation3 + $0x1], 1 }

// kernel: inception_block.2
= control target key start
LH: loop header
LB: loop body
LE: loop exit
PB: predicated region body
PF: predicated region fallthrough
CT: control target
= control target key end

     0   :  { %s6017_s21 = smov 0   ;;  %s7488_s0 = inlined_call_operand.vmem [shape: f32[4,8,64], index: 0, kind: input, shape index: {}]   ;;  %s7489_s1 = inlined_call_operand.vmem [shape: f32[32,8], index: 1, kind: input, shape index: {}]   ;;  %s7490_s2 = inlined_call_operand.vmem [shape: bf16[5,32,256], index: 2, kind: input, shape index: {}]   ;;  %s7491_s3 = inlined_call_operand.vmem [shape: bf16[32,32], index: 3, kind: input, shape index: {}]   ;;  %s7492_s4 = inlined_call_operand.vmem [shape: bf16[4,32,64], index: 4, kind: output, shape index: {0}]   ;;  %s7493_s5 = inlined_call_operand.vmem [shape: f32[2,32,1], index: 5, kind: output, shape index: {1}]   ;;  %s7494_s6 = inlined_call_operand.vmem [shape: f32[2,32,1], index: 6, kind: output, shape index: {2}]  }
   0x1 LB: > { %s6023_s22 = sadd.s32 4294967295, %s5937_s21   ;;  %p4728_p0 = scmp.ge.s32.totalorder %s5937_s21, 1  ;;  %s5937_s21 = sphi %s6017_s21, %s17_s21  }
   0x2   : > { %p218_p1 = scmp.lt.s32.totalorder %s5937_s21, 3 }
   0x4   : > { %p219_p2 = pnand %p4728_p0, %p218_p1 }
   0x6   : > { %222 = sbr.rel (%p219_p2) target bundleno = 1722 (0x6ba), region = 36 }
   0xb   : > { %s4729_s23 = sshll.u32 %s6023_s22, 1  ;;  %v302_v0 = vld [vmem:[%s7489_s1] sm:$0xff]  ;;  %vm307_vm0 = vcmask 64512   ;;  %v303_v3 = vld [vmem:[%s7489_s1 + $0x8] sm:$0xff]  ;;  %v304_v4 = vld [vmem:[%s7489_s1 + $0x10] sm:$0xff]  ;;  %vm284_vm1 = vcmask 150528  }
   0xc   : > { %p260_p3 = scmp.lt.s32.totalorder %s4729_s23, 3  ;;  %v305_v5 = vld [vmem:[%s7489_s1 + $0x18] sm:$0xff]  ;;  %vm293_vm2 = vcmask 847512   ;;  %v5939_v6 = vmov 0   ;;  %s5940_s12 = smov 19   ;;  %vm369_vm3 = vcmask 674968  }
   0xd   : > { %289 = vst.msk [vmem:[#allocation2 + $0x10] sm:$0xf] %vm284_vm1, %v5939_v6  ;;  %s5941_s13 = smov 127   ;;  %vm454_vm4 = vcmask 519168   ;;  %s5942_s14 = smov 125   ;;  %vm2335_vm5 = vcmask 150672  }
   0xe   : > { %s7603_s23 = smov (!%p260_p3, %s4729_s23), 3  ;;  %298 = vst.msk [vmem:[#allocation2 + $0x10] sm:$0xf] %vm293_vm2, %v5939_v6  ;;  %s5943_s15 = smov 126   ;;  %vm2344_vm6 = vcmask 683672   ;;  %vm3399_vm7 = vcmask 261120  }
   0xf   : > { %s4730_s24 = sshll.u32 %s7603_s23, 3  ;;  %285 = vst.msk [vmem:[#allocation2] sm:$0xf] %vm284_vm1, %v5939_v6  ;;  %s5944_s16 = smov 124   ;;  %vm3429_vm8 = vcmask 523264   ;;  %vm4591_vm9 = vcmask 7168  }
  0x10   : > { %s263_s27 = scalar_lea.vmem %s7488_s0, %s4730_s24  ;;  %286 = vst.msk [vmem:[#allocation2 + $0x4] sm:$0xf] %vm284_vm1, %v5939_v6  ;;  %s5945_s17 = smov 122  }
  0x11   : > { %v306_v1 = vld [vmem:[%s263_s27] sm:$0xff]  ;;  %v4742_v2 = vld [vmem:[%s263_s27 + $0x8] sm:$0xff]  ;;  %287 = vst.msk [vmem:[#allocation2 + $0x8] sm:$0xf] %vm284_vm1, %v5939_v6  ;;  %s5946_s18 = smov 123   ;;  %s5947_s19 = smov 121  }
  0x12   : > { %335 = vmatpush.msra.mxu0 %v306_v1  ;;  %407 = vmatpush.msra.mxu1 %v4742_v2  ;;  %288 = vst.msk [vmem:[#allocation2 + $0xc] sm:$0xf] %vm284_vm1, %v5939_v6  ;;  %s5948_s20 = smov 119   ;;  %s5949_s24 = smov 120  }
  0x13   : > { %4738 = vmatmul.msk.f32.vlgmr.msra.gmra.mxu0 %vm307_vm0, %v302_v0  ;;  %4743 = vmatmul.msk.f32.vlgmr.msra.gmra.mxu1 %vm307_vm0, %v302_v0  ;;  %290 = vst.msk [vmem:[#allocation2 + $0x14] sm:$0xf] %vm284_vm1, %v5939_v6  ;;  %s5950_s25 = smov 118   ;;  %s5951_s26 = smov 116  }
  0x14   : > { %291 = vst.msk [vmem:[#allocation2 + $0x18] sm:$0xf] %vm284_vm1, %v5939_v6  ;;  %s5952_s27 = smov 117   ;;  %s5953_s28 = smov 115  }
  0x15   : > { %292 = vst.msk [vmem:[#allocation2 + $0x1c] sm:$0xf] %vm284_vm1, %v5939_v6  ;;  %s5954_s29 = smov 114   ;;  %s5955_s30 = smov 113  }
  0x16   : > { %294 = vst.msk [vmem:[#allocation2] sm:$0xf] %vm293_vm2, %v5939_v6  ;;  %s5956_s7 = smov 112   ;;  %s5957_s8 = smov 111  }
  0x17   : > { %295 = vst.msk [vmem:[#allocation2 + $0x4] sm:$0xf] %vm293_vm2, %v5939_v6  ;;  %s5958_s9 = smov 110   ;;  %s5959_s10 = smov 109  }
  0x18   : > { %296 = vst.msk [vmem:[#allocation2 + $0x8] sm:$0xf] %vm293_vm2, %v5939_v6  ;;  %s5960_s11 = smov 108   ;;  %p272_p4 = scmp.lt.s32.totalorder %s6023_s22, 1 }
  0x19   : > { %297 = vst.msk [vmem:[#allocation2 + $0xc] sm:$0xf] %vm293_vm2, %v5939_v6 }
  0x1a   : > { %299 = vst.msk [vmem:[#allocation2 + $0x14] sm:$0xf] %vm293_vm2, %v5939_v6  ;;  %s7605_s22 = smov (!%p272_p4, %s6023_s22), 1 }
  0x1b   : > { %4739 = vmatmul.msk.f32.gmra.mxu0 %vm307_vm0, %v303_v3  ;;  %4744 = vmatmul.msk.f32.gmra.mxu1 %vm307_vm0, %v303_v3  ;;  %300 = vst.msk [vmem:[#allocation2 + $0x18] sm:$0xf] %vm293_vm2, %v5939_v6 }
  0x1c   : > { %301 = vst.msk [vmem:[#allocation2 + $0x1c] sm:$0xf] %vm293_vm2, %v5939_v6 }
  0x23   : > { %4740 = vmatmul.msk.f32.gmra.mxu0 %vm307_vm0, %v304_v4  ;;  %4745 = vmatmul.msk.f32.gmra.mxu1 %vm307_vm0, %v304_v4 }
  0x2b   : > { %4741 = vmatmul.msk.f32.gmra.mxu0 %vm307_vm0, %v305_v5  ;;  %4746 = vmatmul.msk.f32.gmra.mxu1 %vm307_vm0, %v305_v5 }
  0x90   : > { %v337_v7 = vpop.f32.mrf.mxu0  ;;  %v409_v8 = vpop.f32.mrf.mxu1 }
  0x91   : > { %v349_v9 = vpack.c.bf16 %v337_v7, %v337_v7  ;;  %v421_v10 = vpack.c.bf16 %v409_v8, %v409_v8 }
  0x93   : > { %357 = vrot.lane.b32.xlu0 %v349_v9, %s5940_s12  ;;  %429 = vrot.lane.b32.xlu2 %v421_v10, %s5940_s12 }
  0x98   : > { %v340_v11 = vpop.f32.mrf.mxu0  ;;  %v412_v12 = vpop.f32.mrf.mxu1 }
  0x99   : > { %v350_v13 = vpack.c.bf16 %v340_v11, %v340_v11  ;;  %v422_v14 = vpack.c.bf16 %v412_v12, %v412_v12 }
  0x9b   : > { %359 = vrot.lane.b32.xlu0 %v350_v13, %s5940_s12  ;;  %431 = vrot.lane.b32.xlu2 %v422_v14, %s5940_s12 }
  0xa0   : > { %v343_v15 = vpop.f32.mrf.mxu0  ;;  %v415_v16 = vpop.f32.mrf.mxu1 }
  0xa1   : > { %v351_v17 = vpack.c.bf16 %v343_v15, %v343_v15  ;;  %v423_v18 = vpack.c.bf16 %v415_v16, %v415_v16 }
  0xa3   : > { %361 = vrot.lane.b32.xlu1 %v351_v17, %s5940_s12  ;;  %433 = vrot.lane.b32.xlu0 %v423_v18, %s5940_s12 }
  0xa8   : > { %v346_v19 = vpop.f32.mrf.mxu0  ;;  %v418_v21 = vpop.f32.mrf.mxu1 }
  0xa9   : > { %v352_v20 = vpack.c.bf16 %v346_v19, %v346_v19  ;;  %v424_v22 = vpack.c.bf16 %v418_v21, %v418_v21 }
  0xab   : > { %363 = vrot.lane.b32.xlu1 %v352_v20, %s5940_s12 }
  0xb3   : > { %435 = vrot.lane.b32.xlu1 %v424_v22, %s5940_s12  ;;  %s5961_s12 = smov 107  }
  0xed   : > { %v430_v23 = vpop.permute.xlu2 %429 }
  0xee   : > { %442 = vst.msk [vmem:[#allocation2 + $0x10] sm:$0xf] %vm369_vm3, %v430_v23 }
  0xf5   : > { %v467_v24 = vld [vmem:[#allocation2 + $0x10] sm:$0xf]  ;;  %v432_v25 = vpop.permute.xlu2 %431 }
  0xf6   : > { %487 = vrot.lane.b32.xlu0 %v467_v24, %s5941_s13  ;;  %443 = vst.msk [vmem:[#allocation2 + $0x14] sm:$0xf] %vm369_vm3, %v432_v25  ;;  %v450_v28 = vld [vmem:[#allocation2 + $0x10] sm:$0xf] }
  0xf7   : > { %459 = vst.msk [vmem:[#allocation3 + $0x280] sm:$0xf] %vm454_vm4, %v450_v28  ;;  %v515_v33 = vld [vmem:[#allocation2 + $0x10] sm:$0xf] }
  0xf8   : > { %v611_v34 = vld [vmem:[#allocation2 + $0x10] sm:$0xf] }
  0xf9   : > { %v563_v36 = vld [vmem:[#allocation2 + $0x10] sm:$0xf] }
  0xfa   : > { %v659_v41 = vld [vmem:[#allocation2 + $0x10] sm:$0xf] }
  0xfb   : > { %v755_v42 = vld [vmem:[#allocation2 + $0x10] sm:$0xf] }
  0xfc   : > { %v707_v43 = vld [vmem:[#allocation2 + $0x10] sm:$0xf] }
  0xfd   : > { %v451_v26 = vld [vmem:[#allocation2 + $0x14] sm:$0xf]  ;;  %v803_v47 = vld [vmem:[#allocation2 + $0x10] sm:$0xf] }
  0xfe   : > { %460 = vst.msk [vmem:[#allocation3 + $0x284] sm:$0xf] %vm454_vm4, %v451_v26  ;;  %v899_v48 = vld [vmem:[#allocation2 + $0x10] sm:$0xf]  ;;  %v516_v57 = vld [vmem:[#allocation2 + $0x14] sm:$0xf] }
  0xff   : > { %v851_v49 = vld [vmem:[#allocation2 + $0x10] sm:$0xf]  ;;  %v468_v58 = vld [vmem:[#allocation2 + $0x14] sm:$0xf] }
 0x100   : > { %v947_v54 = vld [vmem:[#allocation2 + $0x10] sm:$0xf]  ;;  %v564_v2 = vld [vmem:[#allocation2 + $0x14] sm:$0xf] }
 0x101   : > { %v995_v55 = vld [vmem:[#allocation2 + $0x10] sm:$0xf]  ;;  %v660_v3 = vld [vmem:[#allocation2 + $0x14] sm:$0xf] }
 0x102   : > { %v612_v4 = vld [vmem:[#allocation2 + $0x14] sm:$0xf] }
 0x103   : > { %v708_v10 = vld [vmem:[#allocation2 + $0x14] sm:$0xf] }
 0x104   : > { %v804_v11 = vld [vmem:[#allocation2 + $0x14] sm:$0xf] }
 0x105   : > { %v358_v27 = vpop.permute.xlu0 %357  ;;  %v756_v12 = vld [vmem:[#allocation2 + $0x14] sm:$0xf] }
 0x106   : > { %370 = vst.msk [vmem:[#allocation2] sm:$0xf] %vm369_vm3, %v358_v27  ;;  %v852_v18 = vld [vmem:[#allocation2 + $0x14] sm:$0xf] }
 0x107   : > { %v948_v19 = vld [vmem:[#allocation2 + $0x14] sm:$0xf] }
 0x108   : > { %v900_v20 = vld [vmem:[#allocation2 + $0x14] sm:$0xf] }
 0x10d   : > { %v360_v29 = vpop.permute.xlu0 %359  ;;  %v463_v30 = vld [vmem:[#allocation2] sm:$0xf] }
 0x10e   : > { %v559_v31 = vld [vmem:[#allocation2] sm:$0xf]  ;;  %371 = vst.msk [vmem:[#allocation2 + $0x4] sm:$0xf] %vm369_vm3, %v360_v29  ;;  %479 = vrot.lane.b32.xlu2 %v463_v30, %s5941_s13 }
 0x10f   : > { %v511_v32 = vld [vmem:[#allocation2] sm:$0xf]  ;;  %575 = vrot.lane.b32.xlu0 %v559_v31, %s5942_s14 }
 0x110   : > { %527 = vrot.lane.b32.xlu1 %v511_v32, %s5943_s15  ;;  %v446_v35 = vld [vmem:[#allocation2] sm:$0xf] }
 0x111   : > { %455 = vst.msk [vmem:[#allocation3] sm:$0xf] %vm454_vm4, %v446_v35  ;;  %v607_v38 = vld [vmem:[#allocation2] sm:$0xf] }
 0x112   : > { %v703_v39 = vld [vmem:[#allocation2] sm:$0xf] }
 0x113   : > { %v655_v40 = vld [vmem:[#allocation2] sm:$0xf] }
 0x114   : > { %v751_v44 = vld [vmem:[#allocation2] sm:$0xf] }
 0x115   : > { %v447_v37 = vld [vmem:[#allocation2 + $0x4] sm:$0xf]  ;;  %v847_v45 = vld [vmem:[#allocation2] sm:$0xf]  ;;  %v362_v56 = vpop.permute.xlu1 %361  ;;  %v434_v60 = vpop.permute.xlu0 %433 }
 0x116   : > { %535 = vrot.lane.b32.xlu2 %v515_v33, %s5943_s15  ;;  %456 = vst.msk [vmem:[#allocation3 + $0x4] sm:$0xf] %vm454_vm4, %v447_v37  ;;  %v799_v46 = vld [vmem:[#allocation2] sm:$0xf]  ;;  %v464_v53 = vld [vmem:[#allocation2 + $0x4] sm:$0xf] }
 0x117   : > { %631 = vrot.lane.b32.xlu0 %v611_v34, %s5944_s16  ;;  %v895_v50 = vld [vmem:[#allocation2] sm:$0xf]  ;;  %372 = vst.msk [vmem:[#allocation2 + $0x8] sm:$0xf] %vm369_vm3, %v362_v56  ;;  %v512_v62 = vld [vmem:[#allocation2 + $0x4] sm:$0xf] }
 0x118   : > { %583 = vrot.lane.b32.xlu1 %v563_v36, %s5942_s14  ;;  %v991_v51 = vld [vmem:[#allocation2] sm:$0xf]  ;;  %444 = vst.msk [vmem:[#allocation2 + $0x18] sm:$0xf] %vm369_vm3, %v434_v60  ;;  %v608_v63 = vld [vmem:[#allocation2 + $0x4] sm:$0xf] }
 0x119   : > { %v943_v52 = vld [vmem:[#allocation2] sm:$0xf]  ;;  %v560_v0 = vld [vmem:[#allocation2 + $0x4] sm:$0xf]  ;;  %v996_v34 = vld [vmem:[#allocation2 + $0x14] sm:$0xf] }
 0x11a   : > { %v1039_v59 = vld [vmem:[#allocation2] sm:$0xf]  ;;  %v656_v5 = vld [vmem:[#allocation2 + $0x4] sm:$0xf] }
 0x11b   : > { %v752_v6 = vld [vmem:[#allocation2 + $0x4] sm:$0xf] }
 0x11c   : > { %v704_v7 = vld [vmem:[#allocation2 + $0x4] sm:$0xf] }
 0x11d   : > { %v364_v61 = vpop.permute.xlu1 %363  ;;  %v800_v14 = vld [vmem:[#allocation2 + $0x4] sm:$0xf] }
 0x11e   : > { %623 = vrot.lane.b32.xlu2 %v607_v38, %s5944_s16  ;;  %373 = vst.msk [vmem:[#allocation2 + $0xc] sm:$0xf] %vm369_vm3, %v364_v61  ;;  %v896_v15 = vld [vmem:[#allocation2 + $0x4] sm:$0xf]  ;;  %v448_v27 = vld [vmem:[#allocation2 + $0x8] sm:$0xf] }
 0x11f   : > { %719 = vrot.lane.b32.xlu0 %v703_v39, %s5945_s17  ;;  %v848_v16 = vld [vmem:[#allocation2 + $0x4] sm:$0xf]  ;;  %457 = vst.msk [vmem:[#allocation3 + $0x8] sm:$0xf] %vm454_vm4, %v448_v27  ;;  %v513_v32 = vld [vmem:[#allocation2 + $0x8] sm:$0xf] }
 0x120   : > { %671 = vrot.lane.b32.xlu1 %v655_v40, %s5946_s18  ;;  %v944_v24 = vld [vmem:[#allocation2 + $0x4] sm:$0xf]  ;;  %v465_v33 = vld [vmem:[#allocation2 + $0x8] sm:$0xf]  ;;  %v469_v39 = vld [vmem:[#allocation2 + $0x18] sm:$0xf] }
 0x121   : > { %v1040_v25 = vld [vmem:[#allocation2 + $0x4] sm:$0xf]  ;;  %v565_v40 = vld [vmem:[#allocation2 + $0x18] sm:$0xf]  ;;  %v753_v60 = vld [vmem:[#allocation2 + $0x8] sm:$0xf] }
 0x122   : > { %v992_v26 = vld [vmem:[#allocation2 + $0x4] sm:$0xf] }
 0x125   : > { %v436_v1 = vpop.permute.xlu1 %435  ;;  %v449_v28 = vld [vmem:[#allocation2 + $0xc] sm:$0xf] }
 0x126   : > { %679 = vrot.lane.b32.xlu2 %v659_v41, %s5946_s18  ;;  %445 = vst.msk [vmem:[#allocation2 + $0x1c] sm:$0xf] %vm369_vm3, %v436_v1  ;;  %v517_v41 = vld [vmem:[#allocation2 + $0x18] sm:$0xf] }
 0x127   : > { %775 = vrot.lane.b32.xlu0 %v755_v42, %s5947_s19  ;;  %458 = vst.msk [vmem:[#allocation3 + $0xc] sm:$0xf] %vm454_vm4, %v449_v28  ;;  %v452_v42 = vld [vmem:[#allocation2 + $0x18] sm:$0xf] }
 0x128   : > { %727 = vrot.lane.b32.xlu1 %v707_v43, %s5945_s17  ;;  %461 = vst.msk [vmem:[#allocation3 + $0x288] sm:$0xf] %vm454_vm4, %v452_v42  ;;  %v853_v1 = vld [vmem:[#allocation2 + $0x18] sm:$0xf] }
 0x12d   : > { %v453_v35 = vld [vmem:[#allocation2 + $0x1c] sm:$0xf] }
 0x12e   : > { %767 = vrot.lane.b32.xlu2 %v751_v44, %s5947_s19  ;;  %462 = vst.msk [vmem:[#allocation3 + $0x28c] sm:$0xf] %vm454_vm4, %v453_v35  ;;  %v662_v42 = vld [vmem:[#allocation2 + $0x1c] sm:$0xf] }
 0x12f   : > { %863 = vrot.lane.b32.xlu0 %v847_v45, %s5948_s20 }
 0x130   : > { %815 = vrot.lane.b32.xlu1 %v799_v46, %s5949_s24  ;;  %v561_v46 = vld [vmem:[#allocation2 + $0x8] sm:$0xf] }
 0x136   : > { %823 = vrot.lane.b32.xlu2 %v803_v47, %s5949_s24  ;;  %v657_v47 = vld [vmem:[#allocation2 + $0x8] sm:$0xf] }
 0x137   : > { %919 = vrot.lane.b32.xlu0 %v899_v48, %s5950_s25  ;;  %v609_v48 = vld [vmem:[#allocation2 + $0x8] sm:$0xf] }
 0x138   : > { %871 = vrot.lane.b32.xlu1 %v851_v49, %s5948_s20 }
 0x13e   : > { %911 = vrot.lane.b32.xlu2 %v895_v50, %s5950_s25 }
 0x13f   : > { %1007 = vrot.lane.b32.xlu0 %v991_v51, %s5951_s26 }
 0x140   : > { %959 = vrot.lane.b32.xlu1 %v943_v52, %s5952_s27  ;;  %v613_v52 = vld [vmem:[#allocation2 + $0x18] sm:$0xf] }
 0x146   : > { %967 = vrot.lane.b32.xlu2 %v947_v54, %s5952_s27  ;;  %v661_v54 = vld [vmem:[#allocation2 + $0x18] sm:$0xf] }
 0x147   : > { %481 = vrot.lane.b32.xlu0 %v464_v53, %s5941_s13  ;;  %v709_v53 = vld [vmem:[#allocation2 + $0x18] sm:$0xf] }
 0x148   : > { %1015 = vrot.lane.b32.xlu1 %v995_v55, %s5951_s26 }
 0x14e   : > { %1055 = vrot.lane.b32.xlu2 %v1039_v59, %s5953_s28  ;;  %v801_v59 = vld [vmem:[#allocation2 + $0x8] sm:$0xf] }
 0x14f   : > { %537 = vrot.lane.b32.xlu0 %v516_v57, %s5943_s15 }
 0x150   : > { %489 = vrot.lane.b32.xlu1 %v468_v58, %s5941_s13  ;;  %v705_v58 = vld [vmem:[#allocation2 + $0x8] sm:$0xf] }
 0x156   : > { %529 = vrot.lane.b32.xlu2 %v512_v62, %s5943_s15 }
 0x157   : > { %625 = vrot.lane.b32.xlu0 %v608_v63, %s5944_s16 }
 0x158   : > { %577 = vrot.lane.b32.xlu1 %v560_v0, %s5942_s14  ;;  %v757_v0 = vld [vmem:[#allocation2 + $0x18] sm:$0xf] }
 0x15e   : > { %585 = vrot.lane.b32.xlu2 %v564_v2, %s5942_s14  ;;  %v805_v2 = vld [vmem:[#allocation2 + $0x18] sm:$0xf] }
 0x15f   : > { %681 = vrot.lane.b32.xlu0 %v660_v3, %s5946_s18 }
 0x160   : > { %633 = vrot.lane.b32.xlu1 %v612_v4, %s5944_s16 }
 0x166   : > { %673 = vrot.lane.b32.xlu2 %v656_v5, %s5946_s18 }
 0x167   : > { %769 = vrot.lane.b32.xlu0 %v752_v6, %s5947_s19  ;;  %v849_v6 = vld [vmem:[#allocation2 + $0x8] sm:$0xf] }
 0x168   : > { %721 = vrot.lane.b32.xlu1 %v704_v7, %s5945_s17  ;;  %v480_v8 = vpop.permute.xlu2 %479  ;;  %v488_v9 = vpop.permute.xlu0 %487  ;;  %v945_v7 = vld [vmem:[#allocation2 + $0x8] sm:$0xf] }
 0x169   : > { %503 = vst.msk [vmem:[#allocation3 + $0x10] sm:$0xf] %vm454_vm4, %v480_v8  ;;  %v897_v8 = vld [vmem:[#allocation2 + $0x8] sm:$0xf] }
 0x16a   : > { %507 = vst.msk [vmem:[#allocation3 + $0x290] sm:$0xf] %vm454_vm4, %v488_v9 }
 0x16e   : > { %729 = vrot.lane.b32.xlu2 %v708_v10, %s5945_s17 }
 0x16f   : > { %825 = vrot.lane.b32.xlu0 %v804_v11, %s5949_s24 }
 0x170   : > { %777 = vrot.lane.b32.xlu1 %v756_v12, %s5947_s19  ;;  %v536_v13 = vpop.permute.xlu2 %535  ;;  %v901_v12 = vld [vmem:[#allocation2 + $0x18] sm:$0xf] }
 0x171   : > { %555 = vst.msk [vmem:[#allocation3 + $0x2a0] sm:$0xf] %vm454_vm4, %v536_v13  ;;  %v997_v13 = vld [vmem:[#allocation2 + $0x18] sm:$0xf] }
 0x176   : > { %817 = vrot.lane.b32.xlu2 %v800_v14, %s5949_s24  ;;  %v949_v14 = vld [vmem:[#allocation2 + $0x18] sm:$0xf] }
 0x177   : > { %913 = vrot.lane.b32.xlu0 %v896_v15, %s5950_s25 }
 0x178   : > { %865 = vrot.lane.b32.xlu1 %v848_v16, %s5948_s20  ;;  %v624_v17 = vpop.permute.xlu2 %623 }
 0x179   : > { %647 = vst.msk [vmem:[#allocation3 + $0x40] sm:$0xf] %vm454_vm4, %v624_v17 }
 0x17e   : > { %873 = vrot.lane.b32.xlu2 %v852_v18, %s5948_s20  ;;  %v470_v18 = vld [vmem:[#allocation2 + $0x1c] sm:$0xf] }
 0x17f   : > { %969 = vrot.lane.b32.xlu0 %v948_v19, %s5952_s27  ;;  %v993_v19 = vld [vmem:[#allocation2 + $0x8] sm:$0xf] }
 0x180   : > { %921 = vrot.lane.b32.xlu1 %v900_v20, %s5950_s25  ;;  %v680_v21 = vpop.permute.xlu2 %679  ;;  %v1041_v20 = vld [vmem:[#allocation2 + $0x8] sm:$0xf] }
 0x181   : > { %v576_v22 = vpop.permute.xlu0 %575  ;;  %699 = vst.msk [vmem:[#allocation3 + $0x2d0] sm:$0xf] %vm454_vm4, %v680_v21 }
 0x182   : > { %v528_v23 = vpop.permute.xlu1 %527  ;;  %599 = vst.msk [vmem:[#allocation3 + $0x30] sm:$0xf] %vm454_vm4, %v576_v22 }
 0x183   : > { %551 = vst.msk [vmem:[#allocation3 + $0x20] sm:$0xf] %vm454_vm4, %v528_v23 }
 0x186   : > { %961 = vrot.lane.b32.xlu2 %v944_v24, %s5952_s27  ;;  %v466_v24 = vld [vmem:[#allocation2 + $0xc] sm:$0xf] }
 0x187   : > { %1057 = vrot.lane.b32.xlu0 %v1040_v25, %s5953_s28  ;;  %v562_v25 = vld [vmem:[#allocation2 + $0xc] sm:$0xf] }
 0x188   : > { %1009 = vrot.lane.b32.xlu1 %v992_v26, %s5951_s26  ;;  %v768_v29 = vpop.permute.xlu2 %767  ;;  %v514_v26 = vld [vmem:[#allocation2 + $0xc] sm:$0xf] }
 0x189   : > { %v632_v30 = vpop.permute.xlu0 %631  ;;  %791 = vst.msk [vmem:[#allocation3 + $0x70] sm:$0xf] %vm454_vm4, %v768_v29 }
 0x18a   : > { %v584_v31 = vpop.permute.xlu1 %583  ;;  %651 = vst.msk [vmem:[#allocation3 + $0x2c0] sm:$0xf] %vm454_vm4, %v632_v30  ;;  %v518_v30 = vld [vmem:[#allocation2 + $0x1c] sm:$0xf] }
 0x18b   : > { %603 = vst.msk [vmem:[#allocation3 + $0x2b0] sm:$0xf] %vm454_vm4, %v584_v31  ;;  %v614_v31 = vld [vmem:[#allocation2 + $0x1c] sm:$0xf] }
 0x18e   : > { %1017 = vrot.lane.b32.xlu2 %v996_v34, %s5951_s26 }
 0x18f   : > { %531 = vrot.lane.b32.xlu0 %v513_v32, %s5943_s15  ;;  %v566_v32 = vld [vmem:[#allocation2 + $0x1c] sm:$0xf] }
 0x190   : > { %483 = vrot.lane.b32.xlu1 %v465_v33, %s5941_s13  ;;  %v824_v36 = vpop.permute.xlu2 %823 }
 0x191   : > { %v720_v37 = vpop.permute.xlu0 %719  ;;  %843 = vst.msk [vmem:[#allocation3 + $0x300] sm:$0xf] %vm454_vm4, %v824_v36  ;;  %v610_v36 = vld [vmem:[#allocation2 + $0xc] sm:$0xf] }
 0x192   : > { %v672_v38 = vpop.permute.xlu1 %671  ;;  %743 = vst.msk [vmem:[#allocation3 + $0x60] sm:$0xf] %vm454_vm4, %v720_v37  ;;  %v706_v37 = vld [vmem:[#allocation2 + $0xc] sm:$0xf] }
 0x193   : > { %695 = vst.msk [vmem:[#allocation3 + $0x50] sm:$0xf] %vm454_vm4, %v672_v38  ;;  %v658_v38 = vld [vmem:[#allocation2 + $0xc] sm:$0xf] }
 0x196   : > { %491 = vrot.lane.b32.xlu2 %v469_v39, %s5941_s13 }
 0x197   : > { %587 = vrot.lane.b32.xlu0 %v565_v40, %s5942_s14 }
 0x198   : > { %539 = vrot.lane.b32.xlu1 %v517_v41, %s5943_s15  ;;  %v912_v43 = vpop.permute.xlu2 %911 }
 0x199   : > { %v776_v44 = vpop.permute.xlu0 %775  ;;  %935 = vst.msk [vmem:[#allocation3 + $0xa0] sm:$0xf] %vm454_vm4, %v912_v43  ;;  %v758_v43 = vld [vmem:[#allocation2 + $0x1c] sm:$0xf] }
 0x19a   : > { %v728_v45 = vpop.permute.xlu1 %727  ;;  %795 = vst.msk [vmem:[#allocation3 + $0x2f0] sm:$0xf] %vm454_vm4, %v776_v44  ;;  %v710_v44 = vld [vmem:[#allocation2 + $0x1c] sm:$0xf] }
 0x19b   : > { %747 = vst.msk [vmem:[#allocation3 + $0x2e0] sm:$0xf] %vm454_vm4, %v728_v45 }
 0x19e   : > { %579 = vrot.lane.b32.xlu2 %v561_v46, %s5942_s14 }
 0x19f   : > { %675 = vrot.lane.b32.xlu0 %v657_v47, %s5946_s18 }
 0x1a0   : > { %627 = vrot.lane.b32.xlu1 %v609_v48, %s5944_s16  ;;  %v968_v49 = vpop.permute.xlu2 %967  ;;  %v754_v48 = vld [vmem:[#allocation2 + $0xc] sm:$0xf] }
 0x1a1   : > { %v864_v50 = vpop.permute.xlu0 %863  ;;  %987 = vst.msk [vmem:[#allocation3 + $0x330] sm:$0xf] %vm454_vm4, %v968_v49  ;;  %v850_v49 = vld [vmem:[#allocation2 + $0xc] sm:$0xf] }
 0x1a2   : > { %v816_v51 = vpop.permute.xlu1 %815  ;;  %887 = vst.msk [vmem:[#allocation3 + $0x90] sm:$0xf] %vm454_vm4, %v864_v50  ;;  %v802_v50 = vld [vmem:[#allocation2 + $0xc] sm:$0xf] }
 0x1a3   : > { %839 = vst.msk [vmem:[#allocation3 + $0x80] sm:$0xf] %vm454_vm4, %v816_v51 }
 0x1a6   : > { %635 = vrot.lane.b32.xlu2 %v613_v52, %s5944_s16 }
 0x1a7   : > { %731 = vrot.lane.b32.xlu0 %v709_v53, %s5945_s17 }
 0x1a8   : > { %683 = vrot.lane.b32.xlu1 %v661_v54, %s5946_s18  ;;  %v1056_v55 = vpop.permute.xlu2 %1055  ;;  %v806_v54 = vld [vmem:[#allocation2 + $0x1c] sm:$0xf] }
 0x1a9   : > { %v920_v56 = vpop.permute.xlu0 %919  ;;  %1079 = vst.msk [vmem:[#allocation3 + $0xd0] sm:$0xf] %vm454_vm4, %v1056_v55  ;;  %v902_v55 = vld [vmem:[#allocation2 + $0x1c] sm:$0xf] }
 0x1aa   : > { %v872_v57 = vpop.permute.xlu1 %871  ;;  %939 = vst.msk [vmem:[#allocation3 + $0x320] sm:$0xf] %vm454_vm4, %v920_v56  ;;  %v854_v56 = vld [vmem:[#allocation2 + $0x1c] sm:$0xf] }
 0x1ab   : > { %891 = vst.msk [vmem:[#allocation3 + $0x310] sm:$0xf] %vm454_vm4, %v872_v57 }
 0x1ae   : > { %723 = vrot.lane.b32.xlu2 %v705_v58, %s5945_s17 }
 0x1af   : > { %819 = vrot.lane.b32.xlu0 %v801_v59, %s5949_s24 }
 0x1b0   : > { %771 = vrot.lane.b32.xlu1 %v753_v60, %s5947_s19  ;;  %v530_v61 = vpop.permute.xlu2 %529  ;;  %v898_v60 = vld [vmem:[#allocation2 + $0xc] sm:$0xf] }
 0x1b1   : > { %v1008_v62 = vpop.permute.xlu0 %1007  ;;  %552 = vst.msk [vmem:[#allocation3 + $0x24] sm:$0xf] %vm454_vm4, %v530_v61  ;;  %v994_v61 = vld [vmem:[#allocation2 + $0xc] sm:$0xf] }
 0x1b2   : > { %v960_v63 = vpop.permute.xlu1 %959  ;;  %1031 = vst.msk [vmem:[#allocation3 + $0xc0] sm:$0xf] %vm454_vm4, %v1008_v62  ;;  %v946_v62 = vld [vmem:[#allocation2 + $0xc] sm:$0xf] }
 0x1b3   : > { %983 = vst.msk [vmem:[#allocation3 + $0xb0] sm:$0xf] %vm454_vm4, %v960_v63 }
 0x1b6   : > { %779 = vrot.lane.b32.xlu2 %v757_v0, %s5947_s19 }
 0x1b7   : > { %875 = vrot.lane.b32.xlu0 %v853_v1, %s5948_s20 }
 0x1b8   : > { %827 = vrot.lane.b32.xlu1 %v805_v2, %s5949_s24  ;;  %v586_v3 = vpop.permute.xlu2 %585  ;;  %v950_v2 = vld [vmem:[#allocation2 + $0x1c] sm:$0xf] }
 0x1b9   : > { %v482_v4 = vpop.permute.xlu0 %481  ;;  %604 = vst.msk [vmem:[#allocation3 + $0x2b4] sm:$0xf] %vm454_vm4, %v586_v3  ;;  %v1043_v3 = vld [vmem:[#allocation2 + $0x10] sm:$0xf] }
 0x1ba   : > { %v1016_v5 = vpop.permute.xlu1 %1015  ;;  %504 = vst.msk [vmem:[#allocation3 + $0x14] sm:$0xf] %vm454_vm4, %v482_v4  ;;  %v998_v4 = vld [vmem:[#allocation2 + $0x1c] sm:$0xf] }
 0x1bb   : > { %1035 = vst.msk [vmem:[#allocation3 + $0x340] sm:$0xf] %vm454_vm4, %v1016_v5 }
 0x1be   : > { %867 = vrot.lane.b32.xlu2 %v849_v6, %s5948_s20 }
 0x1bf   : > { %963 = vrot.lane.b32.xlu0 %v945_v7, %s5952_s27 }
 0x1c0   : > { %915 = vrot.lane.b32.xlu1 %v897_v8, %s5950_s25  ;;  %v674_v9 = vpop.permute.xlu2 %673  ;;  %v1042_v8 = vld [vmem:[#allocation2 + $0xc] sm:$0xf] }
 0x1c1   : > { %v538_v10 = vpop.permute.xlu0 %537  ;;  %696 = vst.msk [vmem:[#allocation3 + $0x54] sm:$0xf] %vm454_vm4, %v674_v9  ;;  %v1046_v9 = vld [vmem:[#allocation2 + $0x1c] sm:$0xf] }
 0x1c2   : > { %v490_v11 = vpop.permute.xlu1 %489  ;;  %556 = vst.msk [vmem:[#allocation3 + $0x2a4] sm:$0xf] %vm454_vm4, %v538_v10  ;;  %v1044_v10 = vld [vmem:[#allocation2 + $0x14] sm:$0xf] }
 0x1c3   : > { %508 = vst.msk [vmem:[#allocation3 + $0x294] sm:$0xf] %vm454_vm4, %v490_v11 }
 0x1c6   : > { %923 = vrot.lane.b32.xlu2 %v901_v12, %s5950_s25 }
 0x1c7   : > { %1019 = vrot.lane.b32.xlu0 %v997_v13, %s5951_s26 }
 0x1c8   : > { %971 = vrot.lane.b32.xlu1 %v949_v14, %s5952_s27  ;;  %v730_v15 = vpop.permute.xlu2 %729  ;;  %v1045_v14 = vld [vmem:[#allocation2 + $0x18] sm:$0xf] }
 0x1c9   : > { %v626_v16 = vpop.permute.xlu0 %625  ;;  %748 = vst.msk [vmem:[#allocation3 + $0x2e4] sm:$0xf] %vm454_vm4, %v730_v15  ;;  %v1089_v15 = vld [vmem:[#allocation2 + $0x8] sm:$0xf] }
 0x1ca   : > { %v578_v17 = vpop.permute.xlu1 %577  ;;  %648 = vst.msk [vmem:[#allocation3 + $0x44] sm:$0xf] %vm454_vm4, %v626_v16  ;;  %v1087_v16 = vld [vmem:[#allocation2] sm:$0xf] }
 0x1cb   : > { %600 = vst.msk [vmem:[#allocation3 + $0x34] sm:$0xf] %vm454_vm4, %v578_v17 }
 0x1ce   : > { %1011 = vrot.lane.b32.xlu2 %v993_v19, %s5951_s26 }
 0x1cf   : > { %493 = vrot.lane.b32.xlu0 %v470_v18, %s5941_s13 }
 0x1d0   : > { %1059 = vrot.lane.b32.xlu1 %v1041_v20, %s5953_s28  ;;  %v818_v21 = vpop.permute.xlu2 %817  ;;  %v1088_v20 = vld [vmem:[#allocation2 + $0x4] sm:$0xf] }
 0x1d1   : > { %v682_v22 = vpop.permute.xlu0 %681  ;;  %840 = vst.msk [vmem:[#allocation3 + $0x84] sm:$0xf] %vm454_vm4, %v818_v21  ;;  %v1092_v21 = vld [vmem:[#allocation2 + $0x14] sm:$0xf] }
 0x1d2   : > { %v634_v23 = vpop.permute.xlu1 %633  ;;  %700 = vst.msk [vmem:[#allocation3 + $0x2d4] sm:$0xf] %vm454_vm4, %v682_v22  ;;  %v1090_v22 = vld [vmem:[#allocation2 + $0xc] sm:$0xf] }
 0x1d3   : > { %652 = vst.msk [vmem:[#allocation3 + $0x2c4] sm:$0xf] %vm454_vm4, %v634_v23 }
 0x1d6   : > { %485 = vrot.lane.b32.xlu2 %v466_v24, %s5941_s13  ;;  %s5962_s13 = smov 106  }
 0x1d7   : > { %581 = vrot.lane.b32.xlu0 %v562_v25, %s5942_s14 }
 0x1d8   : > { %533 = vrot.lane.b32.xlu1 %v514_v26, %s5943_s15  ;;  %v874_v27 = vpop.permute.xlu2 %873  ;;  %v1091_v26 = vld [vmem:[#allocation2 + $0x10] sm:$0xf] }
 0x1d9   : > { %v770_v28 = vpop.permute.xlu0 %769  ;;  %892 = vst.msk [vmem:[#allocation3 + $0x314] sm:$0xf] %vm454_vm4, %v874_v27  ;;  %v1135_v27 = vld [vmem:[#allocation2] sm:$0xf] }
 0x1da   : > { %v722_v29 = vpop.permute.xlu1 %721  ;;  %792 = vst.msk [vmem:[#allocation3 + $0x74] sm:$0xf] %vm454_vm4, %v770_v28  ;;  %v1093_v28 = vld [vmem:[#allocation2 + $0x18] sm:$0xf] }
 0x1db   : > { %744 = vst.msk [vmem:[#allocation3 + $0x64] sm:$0xf] %vm454_vm4, %v722_v29 }
 0x1de   : > { %541 = vrot.lane.b32.xlu2 %v518_v30, %s5943_s15 }
 0x1df   : > { %637 = vrot.lane.b32.xlu0 %v614_v31, %s5944_s16 }
 0x1e0   : > { %589 = vrot.lane.b32.xlu1 %v566_v32, %s5942_s14  ;;  %v962_v33 = vpop.permute.xlu2 %961  ;;  %v1094_v32 = vld [vmem:[#allocation2 + $0x1c] sm:$0xf]  ;;  %s5963_s14 = smov 105  }
 0x1e1   : > { %v826_v34 = vpop.permute.xlu0 %825  ;;  %984 = vst.msk [vmem:[#allocation3 + $0xb4] sm:$0xf] %vm454_vm4, %v962_v33  ;;  %v1138_v33 = vld [vmem:[#allocation2 + $0xc] sm:$0xf] }
 0x1e2   : > { %v778_v35 = vpop.permute.xlu1 %777  ;;  %844 = vst.msk [vmem:[#allocation3 + $0x304] sm:$0xf] %vm454_vm4, %v826_v34  ;;  %v1136_v34 = vld [vmem:[#allocation2 + $0x4] sm:$0xf] }
 0x1e3   : > { %796 = vst.msk [vmem:[#allocation3 + $0x2f4] sm:$0xf] %vm454_vm4, %v778_v35 }
 0x1e6   : > { %629 = vrot.lane.b32.xlu2 %v610_v36, %s5944_s16  ;;  %s5964_s16 = smov 104  }
 0x1e7   : > { %725 = vrot.lane.b32.xlu0 %v706_v37, %s5945_s17 }
 0x1e8   : > { %677 = vrot.lane.b32.xlu1 %v658_v38, %s5946_s18  ;;  %v1018_v39 = vpop.permute.xlu2 %1017  ;;  %v1137_v38 = vld [vmem:[#allocation2 + $0x8] sm:$0xf] }
 0x1e9   : > { %v914_v40 = vpop.permute.xlu0 %913  ;;  %1036 = vst.msk [vmem:[#allocation3 + $0x344] sm:$0xf] %vm454_vm4, %v1018_v39  ;;  %v1141_v39 = vld [vmem:[#allocation2 + $0x18] sm:$0xf] }
 0x1ea   : > { %v866_v41 = vpop.permute.xlu1 %865  ;;  %936 = vst.msk [vmem:[#allocation3 + $0xa4] sm:$0xf] %vm454_vm4, %v914_v40  ;;  %v1139_v40 = vld [vmem:[#allocation2 + $0x10] sm:$0xf] }
 0x1eb   : > { %888 = vst.msk [vmem:[#allocation3 + $0x94] sm:$0xf] %vm454_vm4, %v866_v41 }
 0x1ee   : > { %685 = vrot.lane.b32.xlu2 %v662_v42, %s5946_s18  ;;  %s5967_s18 = smov 102  }
 0x1ef   : > { %781 = vrot.lane.b32.xlu0 %v758_v43, %s5947_s19 }
 0x1f0   : > { %733 = vrot.lane.b32.xlu1 %v710_v44, %s5945_s17  ;;  %v492_v45 = vpop.permute.xlu2 %491  ;;  %v1140_v44 = vld [vmem:[#allocation2 + $0x14] sm:$0xf]  ;;  %s5965_s17 = smov 103  }
 0x1f1   : > { %v970_v46 = vpop.permute.xlu0 %969  ;;  %509 = vst.msk [vmem:[#allocation3 + $0x298] sm:$0xf] %vm454_vm4, %v492_v45  ;;  %v1184_v45 = vld [vmem:[#allocation2 + $0x4] sm:$0xf] }
 0x1f2   : > { %v922_v47 = vpop.permute.xlu1 %921  ;;  %988 = vst.msk [vmem:[#allocation3 + $0x334] sm:$0xf] %vm454_vm4, %v970_v46  ;;  %v1142_v46 = vld [vmem:[#allocation2 + $0x1c] sm:$0xf] }
 0x1f3   : > { %940 = vst.msk [vmem:[#allocation3 + $0x324] sm:$0xf] %vm454_vm4, %v922_v47 }
 0x1f6   : > { %773 = vrot.lane.b32.xlu2 %v754_v48, %s5947_s19  ;;  %s5968_s19 = smov 101  }
 0x1f7   : > { %869 = vrot.lane.b32.xlu0 %v850_v49, %s5948_s20 }
 0x1f8   : > { %821 = vrot.lane.b32.xlu1 %v802_v50, %s5949_s24  ;;  %v580_v52 = vpop.permute.xlu2 %579  ;;  %v1183_v50 = vld [vmem:[#allocation2] sm:$0xf] }
 0x1f9   : > { %v1058_v51 = vpop.permute.xlu0 %1057  ;;  %601 = vst.msk [vmem:[#allocation3 + $0x38] sm:$0xf] %vm454_vm4, %v580_v52  ;;  %v1185_v52 = vld [vmem:[#allocation2 + $0x8] sm:$0xf] }
 0x1fa   : > { %1080 = vst.msk [vmem:[#allocation3 + $0xd4] sm:$0xf] %vm454_vm4, %v1058_v51  ;;  %v1010_v53 = vpop.permute.xlu1 %1009  ;;  %v1187_v51 = vld [vmem:[#allocation2 + $0x10] sm:$0xf] }
 0x1fb   : > { %1032 = vst.msk [vmem:[#allocation3 + $0xc4] sm:$0xf] %vm454_vm4, %v1010_v53 }
 0x1fe   : > { %829 = vrot.lane.b32.xlu2 %v806_v54, %s5949_s24  ;;  %s5970_s24 = smov 97  }
 0x1ff   : > { %925 = vrot.lane.b32.xlu0 %v902_v55, %s5950_s25 }
 0x200   : > { %877 = vrot.lane.b32.xlu1 %v854_v56, %s5948_s20  ;;  %v636_v57 = vpop.permute.xlu2 %635  ;;  %s5969_s20 = smov 100  }
 0x201   : > { %v532_v58 = vpop.permute.xlu0 %531  ;;  %653 = vst.msk [vmem:[#allocation3 + $0x2c8] sm:$0xf] %vm454_vm4, %v636_v57  ;;  %v1186_v57 = vld [vmem:[#allocation2 + $0xc] sm:$0xf] }
 0x202   : > { %v484_v59 = vpop.permute.xlu1 %483  ;;  %553 = vst.msk [vmem:[#allocation3 + $0x28] sm:$0xf] %vm454_vm4, %v532_v58  ;;  %v1190_v58 = vld [vmem:[#allocation2 + $0x1c] sm:$0xf] }
 0x203   : > { %505 = vst.msk [vmem:[#allocation3 + $0x18] sm:$0xf] %vm454_vm4, %v484_v59  ;;  %v5618_v59 = vld [vmem:[#allocation3 + $0x30] sm:$0xff] }
 0x206   : > { %917 = vrot.lane.b32.xlu2 %v898_v60, %s5950_s25  ;;  %v1188_v60 = vld [vmem:[#allocation2 + $0x14] sm:$0xf]  ;;  %s5971_s25 = smov 98  }
 0x207   : > { %1013 = vrot.lane.b32.xlu0 %v994_v61, %s5951_s26 }
 0x208   : > { %965 = vrot.lane.b32.xlu1 %v946_v62, %s5952_s27  ;;  %v724_v63 = vpop.permute.xlu2 %723 }
 0x209   : > { %v588_v0 = vpop.permute.xlu0 %587  ;;  %745 = vst.msk [vmem:[#allocation3 + $0x68] sm:$0xf] %vm454_vm4, %v724_v63 }
 0x20a   : > { %v540_v1 = vpop.permute.xlu1 %539  ;;  %605 = vst.msk [vmem:[#allocation3 + $0x2b8] sm:$0xf] %vm454_vm4, %v588_v0 }
 0x20b   : > { %557 = vst.msk [vmem:[#allocation3 + $0x2a8] sm:$0xf] %vm454_vm4, %v540_v1 }
 0x20e   : > { %973 = vrot.lane.b32.xlu2 %v950_v2, %s5952_s27  ;;  %v1189_v2 = vld [vmem:[#allocation2 + $0x18] sm:$0xf]  ;;  %s5973_s27 = smov 93  }
 0x20f   : > { %1063 = vrot.lane.b32.xlu0 %v1043_v3, %s5953_s28  ;;  %v1233_v3 = vld [vmem:[#allocation2 + $0x8] sm:$0xf] }
 0x210   : > { %1021 = vrot.lane.b32.xlu1 %v998_v4, %s5951_s26  ;;  %v780_v5 = vpop.permute.xlu2 %779  ;;  %v5616_v4 = vld [vmem:[#allocation3 + $0x20] sm:$0xff]  ;;  %s5972_s26 = smov 99  }
 0x211   : > { %v676_v6 = vpop.permute.xlu0 %675  ;;  %797 = vst.msk [vmem:[#allocation3 + $0x2f8] sm:$0xf] %vm454_vm4, %v780_v5  ;;  %v1231_v5 = vld [vmem:[#allocation2] sm:$0xf] }
 0x212   : > { %v628_v7 = vpop.permute.xlu1 %627  ;;  %697 = vst.msk [vmem:[#allocation3 + $0x58] sm:$0xf] %vm454_vm4, %v676_v6  ;;  %v5626_v6 = vld [vmem:[#allocation3 + $0x70] sm:$0xff] }
 0x213   : > { %649 = vst.msk [vmem:[#allocation3 + $0x48] sm:$0xf] %vm454_vm4, %v628_v7 }
 0x216   : > { %1061 = vrot.lane.b32.xlu2 %v1042_v8, %s5953_s28 }
 0x217   : > { %1069 = vrot.lane.b32.xlu0 %v1046_v9, %s5953_s28 }
 0x218   : > { %1065 = vrot.lane.b32.xlu1 %v1044_v10, %s5953_s28  ;;  %v868_v11 = vpop.permute.xlu2 %867 }
 0x219   : > { %v732_v12 = vpop.permute.xlu0 %731  ;;  %889 = vst.msk [vmem:[#allocation3 + $0x98] sm:$0xf] %vm454_vm4, %v868_v11 }
 0x21a   : > { %v684_v13 = vpop.permute.xlu1 %683  ;;  %749 = vst.msk [vmem:[#allocation3 + $0x2e8] sm:$0xf] %vm454_vm4, %v732_v12  ;;  %v1232_v12 = vld [vmem:[#allocation2 + $0x4] sm:$0xf] }
 0x21b   : > { %701 = vst.msk [vmem:[#allocation3 + $0x2d8] sm:$0xf] %vm454_vm4, %v684_v13  ;;  %v1236_v13 = vld [vmem:[#allocation2 + $0x14] sm:$0xf] }
 0x21e   : > { %1067 = vrot.lane.b32.xlu2 %v1045_v14, %s5953_s28  ;;  %v5614_v14 = vld [vmem:[#allocation3 + $0x10] sm:$0xff]  ;;  %s5974_s28 = smov 94  }
 0x21f   : > { %1107 = vrot.lane.b32.xlu0 %v1089_v15, %s5954_s29  ;;  %v1234_v15 = vld [vmem:[#allocation2 + $0xc] sm:$0xf] }
 0x220   : > { %1103 = vrot.lane.b32.xlu1 %v1087_v16, %s5954_s29  ;;  %v924_v17 = vpop.permute.xlu2 %923  ;;  %v5624_v16 = vld [vmem:[#allocation3 + $0x60] sm:$0xff] }
 0x221   : > { %v820_v18 = vpop.permute.xlu0 %819  ;;  %941 = vst.msk [vmem:[#allocation3 + $0x328] sm:$0xf] %vm454_vm4, %v924_v17 }
 0x222   : > { %v772_v19 = vpop.permute.xlu1 %771  ;;  %841 = vst.msk [vmem:[#allocation3 + $0x88] sm:$0xf] %vm454_vm4, %v820_v18 }
 0x223   : > { %793 = vst.msk [vmem:[#allocation3 + $0x78] sm:$0xf] %vm454_vm4, %v772_v19 }
 0x226   : > { %1105 = vrot.lane.b32.xlu2 %v1088_v20, %s5954_s29  ;;  %v5613_v20 = vld [vmem:[#allocation3 + $0x8] sm:$0xff] }
 0x227   : > { %1113 = vrot.lane.b32.xlu0 %v1092_v21, %s5954_s29 }
 0x228   : > { %1109 = vrot.lane.b32.xlu1 %v1090_v22, %s5954_s29  ;;  %v1012_v23 = vpop.permute.xlu2 %1011  ;;  %v1235_v22 = vld [vmem:[#allocation2 + $0x10] sm:$0xf] }
 0x229   : > { %v876_v24 = vpop.permute.xlu0 %875  ;;  %1033 = vst.msk [vmem:[#allocation3 + $0xc8] sm:$0xf] %vm454_vm4, %v1012_v23  ;;  %v1279_v23 = vld [vmem:[#allocation2] sm:$0xf] }
 0x22a   : > { %v828_v25 = vpop.permute.xlu1 %827  ;;  %893 = vst.msk [vmem:[#allocation3 + $0x318] sm:$0xf] %vm454_vm4, %v876_v24  ;;  %v5612_v24 = vld [vmem:[#allocation3] sm:$0xff] }
 0x22b   : > { %845 = vst.msk [vmem:[#allocation3 + $0x308] sm:$0xf] %vm454_vm4, %v828_v25  ;;  %v1237_v25 = vld [vmem:[#allocation2 + $0x18] sm:$0xf] }
 0x22e   : > { %1111 = vrot.lane.b32.xlu2 %v1091_v26, %s5954_s29  ;;  %v5622_v26 = vld [vmem:[#allocation3 + $0x50] sm:$0xff] }
 0x22f   : > { %1151 = vrot.lane.b32.xlu0 %v1135_v27, %s5955_s30 }
 0x230   : > { %1115 = vrot.lane.b32.xlu1 %v1093_v28, %s5954_s29  ;;  %v486_v30 = vpop.permute.xlu2 %485 }
 0x231   : > { %v964_v29 = vpop.permute.xlu0 %963  ;;  %506 = vst.msk [vmem:[#allocation3 + $0x1c] sm:$0xf] %vm454_vm4, %v486_v30 }
 0x232   : > { %985 = vst.msk [vmem:[#allocation3 + $0xb8] sm:$0xf] %vm454_vm4, %v964_v29  ;;  %v916_v31 = vpop.permute.xlu1 %915 }
 0x233   : > { %937 = vst.msk [vmem:[#allocation3 + $0xa8] sm:$0xf] %vm454_vm4, %v916_v31  ;;  %v1238_v31 = vld [vmem:[#allocation2 + $0x1c] sm:$0xf] }
 0x236   : > { %1117 = vrot.lane.b32.xlu2 %v1094_v32, %s5954_s29  ;;  %v1282_v32 = vld [vmem:[#allocation2 + $0xc] sm:$0xf]  ;;  %s5975_s29 = smov 89  }
 0x237   : > { %1157 = vrot.lane.b32.xlu0 %v1138_v33, %s5955_s30  ;;  %v1280_v33 = vld [vmem:[#allocation2 + $0x4] sm:$0xf] }
 0x238   : > { %1153 = vrot.lane.b32.xlu1 %v1136_v34, %s5955_s30  ;;  %v542_v36 = vpop.permute.xlu2 %541  ;;  %v5615_v10 = vld [vmem:[#allocation3 + $0x18] sm:$0xff]  ;;  %v5620_v34 = vld [vmem:[#allocation3 + $0x40] sm:$0xff] }
 0x239   : > { %v1020_v35 = vpop.permute.xlu0 %1019  ;;  %558 = vst.msk [vmem:[#allocation3 + $0x2ac] sm:$0xf] %vm454_vm4, %v542_v36 }
 0x23a   : > { %1037 = vst.msk [vmem:[#allocation3 + $0x348] sm:$0xf] %vm454_vm4, %v1020_v35  ;;  %v972_v37 = vpop.permute.xlu1 %971 }
 0x23b   : > { %989 = vst.msk [vmem:[#allocation3 + $0x338] sm:$0xf] %vm454_vm4, %v972_v37 }
 0x23e   : > { %1155 = vrot.lane.b32.xlu2 %v1137_v38, %s5955_s30  ;;  %v1281_v38 = vld [vmem:[#allocation2 + $0x8] sm:$0xf] }
 0x23f   : > { %1163 = vrot.lane.b32.xlu0 %v1141_v39, %s5955_s30  ;;  %v1285_v39 = vld [vmem:[#allocation2 + $0x18] sm:$0xf] }
 0x240   : > { %1159 = vrot.lane.b32.xlu1 %v1139_v40, %s5955_s30  ;;  %v630_v41 = vpop.permute.xlu2 %629  ;;  %v1283_v40 = vld [vmem:[#allocation2 + $0x10] sm:$0xf] }
 0x241   : > { %v494_v42 = vpop.permute.xlu0 %493  ;;  %650 = vst.msk [vmem:[#allocation3 + $0x4c] sm:$0xf] %vm454_vm4, %v630_v41 }
 0x242   : > { %v1060_v43 = vpop.permute.xlu1 %1059  ;;  %510 = vst.msk [vmem:[#allocation3 + $0x29c] sm:$0xf] %vm454_vm4, %v494_v42 }
 0x243   : > { %1081 = vst.msk [vmem:[#allocation3 + $0xd8] sm:$0xf] %vm454_vm4, %v1060_v43 }
 0x246   : > { %1161 = vrot.lane.b32.xlu2 %v1140_v44, %s5955_s30 }
 0x247   : > { %1201 = vrot.lane.b32.xlu0 %v1184_v45, %s5956_s7  ;;  %v1284_v45 = vld [vmem:[#allocation2 + $0x14] sm:$0xf] }
 0x248   : > { %1165 = vrot.lane.b32.xlu1 %v1142_v46, %s5955_s30  ;;  %v686_v47 = vpop.permute.xlu2 %685  ;;  %v5621_v30 = vld [vmem:[#allocation3 + $0x48] sm:$0xff]  ;;  %v1328_v46 = vld [vmem:[#allocation2 + $0x4] sm:$0xf]  ;;  %s5976_s30 = smov 90  }
 0x249   : > { %v582_v48 = vpop.permute.xlu0 %581  ;;  %702 = vst.msk [vmem:[#allocation3 + $0x2dc] sm:$0xf] %vm454_vm4, %v686_v47  ;;  %v1286_v47 = vld [vmem:[#allocation2 + $0x1c] sm:$0xf] }
 0x24a   : > { %v534_v49 = vpop.permute.xlu1 %533  ;;  %602 = vst.msk [vmem:[#allocation3 + $0x3c] sm:$0xf] %vm454_vm4, %v582_v48  ;;  %v5638_v48 = vld [vmem:[#allocation3 + $0xb0] sm:$0xff] }
 0x24b   : > { %554 = vst.msk [vmem:[#allocation3 + $0x2c] sm:$0xf] %vm454_vm4, %v534_v49 }
 0x24e   : > { %1199 = vrot.lane.b32.xlu2 %v1183_v50, %s5956_s7 }
 0x24f   : > { %1207 = vrot.lane.b32.xlu0 %v1187_v51, %s5956_s7 }
 0x250   : > { %1203 = vrot.lane.b32.xlu1 %v1185_v52, %s5956_s7  ;;  %v774_v53 = vpop.permute.xlu2 %773 }
 0x251   : > { %v638_v54 = vpop.permute.xlu0 %637  ;;  %794 = vst.msk [vmem:[#allocation3 + $0x7c] sm:$0xf] %vm454_vm4, %v774_v53  ;;  %v5619_v56 = vld [vmem:[#allocation3 + $0x38] sm:$0xff]  ;;  %v1327_v53 = vld [vmem:[#allocation2] sm:$0xf] }
 0x252   : > { %v590_v55 = vpop.permute.xlu1 %589  ;;  %654 = vst.msk [vmem:[#allocation3 + $0x2cc] sm:$0xf] %vm454_vm4, %v638_v54  ;;  %2696 = vmatpush.bf16.msrb.mxu0 %v5619_v56  ;;  %v5617_v1 = vld [vmem:[#allocation3 + $0x28] sm:$0xff]  ;;  %v1331_v54 = vld [vmem:[#allocation2 + $0x10] sm:$0xf]  ;;  %v5636_v56 = vld [vmem:[#allocation3 + $0xa0] sm:$0xff] }
 0x253   : > { %606 = vst.msk [vmem:[#allocation3 + $0x2bc] sm:$0xf] %vm454_vm4, %v590_v55  ;;  %v1329_v55 = vld [vmem:[#allocation2 + $0x8] sm:$0xf] }
 0x256   : > { %1205 = vrot.lane.b32.xlu2 %v1186_v57, %s5956_s7  ;;  %2697 = vmatpush.bf16.msrb.mxu0 %v5618_v59 }
 0x257   : > { %1213 = vrot.lane.b32.xlu0 %v1190_v58, %s5956_s7 }
 0x258   : > { %1209 = vrot.lane.b32.xlu1 %v1188_v60, %s5956_s7  ;;  %v830_v61 = vpop.permute.xlu2 %829  ;;  %v5627_v63 = vld [vmem:[#allocation3 + $0x78] sm:$0xff] }
 0x259   : > { %v726_v62 = vpop.permute.xlu0 %725  ;;  %846 = vst.msk [vmem:[#allocation3 + $0x30c] sm:$0xf] %vm454_vm4, %v830_v61  ;;  %2715 = vmatpush.bf16.msrb.mxu1 %v5627_v63  ;;  %v1330_v61 = vld [vmem:[#allocation2 + $0xc] sm:$0xf]  ;;  %v1332_v63 = vld [vmem:[#allocation2 + $0x14] sm:$0xf] }
 0x25a   : > { %v678_v0 = vpop.permute.xlu1 %677  ;;  %746 = vst.msk [vmem:[#allocation3 + $0x6c] sm:$0xf] %vm454_vm4, %v726_v62  ;;  %2698 = vmatpush.bf16.msrb.mxu0 %v5617_v1  ;;  %v1334_v62 = vld [vmem:[#allocation2 + $0x1c] sm:$0xf] }
 0x25b   : > { %698 = vst.msk [vmem:[#allocation3 + $0x5c] sm:$0xf] %vm454_vm4, %v678_v0  ;;  %v5634_v0 = vld [vmem:[#allocation3 + $0x90] sm:$0xff] }
 0x25d   : > { %2716 = vmatpush.bf16.msrb.mxu1 %v5626_v6  ;;  %v1377_v6 = vld [vmem:[#allocation2 + $0x8] sm:$0xf] }
 0x25e   : > { %1211 = vrot.lane.b32.xlu2 %v1189_v2, %s5956_s7  ;;  %2699 = vmatpush.bf16.msrb.mxu0 %v5616_v4  ;;  %s5977_s7 = smov 95  }
 0x25f   : > { %1251 = vrot.lane.b32.xlu0 %v1233_v3, %s5957_s8 }
 0x260   : > { %1247 = vrot.lane.b32.xlu1 %v1231_v5, %s5957_s8  ;;  %v918_v7 = vpop.permute.xlu2 %917  ;;  %v1333_v5 = vld [vmem:[#allocation2 + $0x18] sm:$0xf] }
 0x261   : > { %v782_v8 = vpop.permute.xlu0 %781  ;;  %938 = vst.msk [vmem:[#allocation3 + $0xac] sm:$0xf] %vm454_vm4, %v918_v7  ;;  %v5625_v11 = vld [vmem:[#allocation3 + $0x68] sm:$0xff]  ;;  %v1375_v7 = vld [vmem:[#allocation2] sm:$0xf] }
 0x262   : > { %v734_v9 = vpop.permute.xlu1 %733  ;;  %798 = vst.msk [vmem:[#allocation3 + $0x2fc] sm:$0xf] %vm454_vm4, %v782_v8  ;;  %2700 = vmatpush.bf16.msrb.mxu0 %v5615_v10  ;;  %2717 = vmatpush.bf16.msrb.mxu1 %v5625_v11  ;;  %v5623_v21 = vld [vmem:[#allocation3 + $0x58] sm:$0xff]  ;;  %v5632_v8 = vld [vmem:[#allocation3 + $0x80] sm:$0xff] }
 0x263   : > { %750 = vst.msk [vmem:[#allocation3 + $0x2ec] sm:$0xf] %vm454_vm4, %v734_v9 }
 0x266   : > { %1249 = vrot.lane.b32.xlu2 %v1232_v12, %s5957_s8  ;;  %2701 = vmatpush.bf16.msrb.mxu0 %v5614_v14  ;;  %v1376_v12 = vld [vmem:[#allocation2 + $0x4] sm:$0xf]  ;;  %v1378_v14 = vld [vmem:[#allocation2 + $0xc] sm:$0xf] }
 0x267   : > { %1257 = vrot.lane.b32.xlu0 %v1236_v13, %s5957_s8  ;;  %2718 = vmatpush.bf16.msrb.mxu1 %v5624_v16  ;;  %v1380_v13 = vld [vmem:[#allocation2 + $0x14] sm:$0xf] }
 0x268   : > { %1253 = vrot.lane.b32.xlu1 %v1234_v15, %s5957_s8  ;;  %v974_v17 = vpop.permute.xlu2 %973  ;;  %v5637_v52 = vld [vmem:[#allocation3 + $0xa8] sm:$0xff] }
 0x269   : > { %v870_v18 = vpop.permute.xlu0 %869  ;;  %990 = vst.msk [vmem:[#allocation3 + $0x33c] sm:$0xf] %vm454_vm4, %v974_v17 }
 0x26a   : > { %v822_v19 = vpop.permute.xlu1 %821  ;;  %890 = vst.msk [vmem:[#allocation3 + $0x9c] sm:$0xf] %vm454_vm4, %v870_v18  ;;  %2702 = vmatpush.bf16.msrb.mxu0 %v5613_v20  ;;  %v1379_v18 = vld [vmem:[#allocation2 + $0x10] sm:$0xf]  ;;  %v1381_v20 = vld [vmem:[#allocation2 + $0x18] sm:$0xf] }
 0x26b   : > { %842 = vst.msk [vmem:[#allocation3 + $0x8c] sm:$0xf] %vm454_vm4, %v822_v19  ;;  %2719 = vmatpush.bf16.msrb.mxu1 %v5623_v21  ;;  %v1423_v19 = vld [vmem:[#allocation2] sm:$0xf] }
 0x26e   : > { %1255 = vrot.lane.b32.xlu2 %v1235_v22, %s5957_s8  ;;  %2703 = vmatpush.bf16.msrb.mxu0 %v5612_v24 }
 0x26f   : > { %1295 = vrot.lane.b32.xlu0 %v1279_v23, %s5958_s9  ;;  %2720 = vmatpush.bf16.msrb.mxu1 %v5622_v26  ;;  %v1426_v26 = vld [vmem:[#allocation2 + $0xc] sm:$0xf] }
 0x270   : > { %1259 = vrot.lane.b32.xlu1 %v1237_v25, %s5957_s8  ;;  %v1062_v27 = vpop.permute.xlu2 %1061  ;;  %v1382_v25 = vld [vmem:[#allocation2 + $0x1c] sm:$0xf] }
 0x271   : > { %v926_v28 = vpop.permute.xlu0 %925  ;;  %1082 = vst.msk [vmem:[#allocation3 + $0xdc] sm:$0xf] %vm454_vm4, %v1062_v27  ;;  %v5635_v60 = vld [vmem:[#allocation3 + $0x98] sm:$0xff] }
 0x272   : > { %v878_v29 = vpop.permute.xlu1 %877  ;;  %942 = vst.msk [vmem:[#allocation3 + $0x32c] sm:$0xf] %vm454_vm4, %v926_v28  ;;  %v5633_v4 = vld [vmem:[#allocation3 + $0x88] sm:$0xff]  ;;  %v1424_v28 = vld [vmem:[#allocation2 + $0x4] sm:$0xf] }
 0x273   : > { %894 = vst.msk [vmem:[#allocation3 + $0x31c] sm:$0xf] %vm454_vm4, %v878_v29  ;;  %2721 = vmatpush.bf16.msrb.mxu1 %v5621_v30 }
 0x276   : > { %1261 = vrot.lane.b32.xlu2 %v1238_v31, %s5957_s8  ;;  %s5978_s8 = smov 1  }
 0x277   : > { %1301 = vrot.lane.b32.xlu0 %v1282_v32, %s5958_s9  ;;  %2722 = vmatpush.bf16.msrb.mxu1 %v5620_v34  ;;  %v1429_v34 = vld [vmem:[#allocation2 + $0x18] sm:$0xf] }
 0x278   : > { %1297 = vrot.lane.b32.xlu1 %v1280_v33, %s5958_s9  ;;  %v1068_v35 = vpop.permute.xlu2 %1067  ;;  %v1425_v33 = vld [vmem:[#allocation2 + $0x8] sm:$0xf] }
 0x279   : > { %v1014_v36 = vpop.permute.xlu0 %1013  ;;  %1085 = vst.msk [vmem:[#allocation3 + $0x358] sm:$0xf] %vm454_vm4, %v1068_v35 }
 0x27a   : > { %v966_v37 = vpop.permute.xlu1 %965  ;;  %1034 = vst.msk [vmem:[#allocation3 + $0xcc] sm:$0xf] %vm454_vm4, %v1014_v36  ;;  %v1427_v36 = vld [vmem:[#allocation2 + $0x10] sm:$0xf] }
 0x27b   : > { %986 = vst.msk [vmem:[#allocation3 + $0xbc] sm:$0xf] %vm454_vm4, %v966_v37 }
 0x27e   : > { %1299 = vrot.lane.b32.xlu2 %v1281_v38, %s5958_s9 }
 0x27f   : > { %1307 = vrot.lane.b32.xlu0 %v1285_v39, %s5958_s9 }
 0x280   : > { %1303 = vrot.lane.b32.xlu1 %v1283_v40, %s5958_s9  ;;  %v1106_v41 = vpop.permute.xlu2 %1105  ;;  %v5643_v40 = vld [vmem:[#allocation3 + $0xd8] sm:$0xff] }
 0x281   : > { %v1064_v42 = vpop.permute.xlu0 %1063  ;;  %1128 = vst.msk [vmem:[#allocation3 + $0xe4] sm:$0xf] %vm454_vm4, %v1106_v41  ;;  %v1428_v41 = vld [vmem:[#allocation2 + $0x14] sm:$0xf] }
 0x282   : > { %v1022_v43 = vpop.permute.xlu1 %1021  ;;  %1083 = vst.msk [vmem:[#allocation3 + $0x350] sm:$0xf] %vm454_vm4, %v1064_v42  ;;  %v5639_v44 = vld [vmem:[#allocation3 + $0xb8] sm:$0xff]  ;;  %v1472_v42 = vld [vmem:[#allocation2 + $0x4] sm:$0xf] }
 0x283   : > { %1038 = vst.msk [vmem:[#allocation3 + $0x34c] sm:$0xf] %vm454_vm4, %v1022_v43  ;;  %2542 = vmatpush.bf16.msra.mxu2 %v5639_v44  ;;  %v5642_v43 = vld [vmem:[#allocation3 + $0xd0] sm:$0xff]  ;;  %v1430_v44 = vld [vmem:[#allocation2 + $0x1c] sm:$0xf] }
 0x286   : > { %1305 = vrot.lane.b32.xlu2 %v1284_v45, %s5958_s9 }
 0x287   : > { %1345 = vrot.lane.b32.xlu0 %v1328_v46, %s5959_s10  ;;  %2543 = vmatpush.bf16.msra.mxu2 %v5638_v48  ;;  %v5641_v48 = vld [vmem:[#allocation3 + $0xc8] sm:$0xff] }
 0x288   : > { %1309 = vrot.lane.b32.xlu1 %v1286_v47, %s5958_s9  ;;  %v1112_v49 = vpop.permute.xlu2 %1111  ;;  %s5979_s9 = smov 91  }
 0x289   : > { %v1070_v50 = vpop.permute.xlu0 %1069  ;;  %1131 = vst.msk [vmem:[#allocation3 + $0x360] sm:$0xf] %vm454_vm4, %v1112_v49  ;;  %v1471_v49 = vld [vmem:[#allocation2] sm:$0xf] }
 0x28a   : > { %v1066_v51 = vpop.permute.xlu1 %1065  ;;  %1086 = vst.msk [vmem:[#allocation3 + $0x35c] sm:$0xf] %vm454_vm4, %v1070_v50  ;;  %v1475_v50 = vld [vmem:[#allocation2 + $0x10] sm:$0xf] }
 0x28b   : > { %1084 = vst.msk [vmem:[#allocation3 + $0x354] sm:$0xf] %vm454_vm4, %v1066_v51  ;;  %2544 = vmatpush.bf16.msra.mxu2 %v5637_v52  ;;  %v5640_v51 = vld [vmem:[#allocation3 + $0xc0] sm:$0xff]  ;;  %v1473_v52 = vld [vmem:[#allocation2 + $0x8] sm:$0xf] }
 0x28e   : > { %1343 = vrot.lane.b32.xlu2 %v1327_v53, %s5959_s10 }
 0x28f   : > { %1351 = vrot.lane.b32.xlu0 %v1331_v54, %s5959_s10  ;;  %2545 = vmatpush.bf16.msra.mxu2 %v5636_v56  ;;  %v1474_v56 = vld [vmem:[#allocation2 + $0xc] sm:$0xf] }
 0x290   : > { %1347 = vrot.lane.b32.xlu1 %v1329_v55, %s5959_s10  ;;  %v1118_v57 = vpop.permute.xlu2 %1117 }
 0x291   : > { %v1108_v58 = vpop.permute.xlu0 %1107  ;;  %1134 = vst.msk [vmem:[#allocation3 + $0x36c] sm:$0xf] %vm454_vm4, %v1118_v57  ;;  %v1478_v57 = vld [vmem:[#allocation2 + $0x1c] sm:$0xf] }
 0x292   : > { %v1104_v59 = vpop.permute.xlu1 %1103  ;;  %1129 = vst.msk [vmem:[#allocation3 + $0xe8] sm:$0xf] %vm454_vm4, %v1108_v58  ;;  %v1476_v58 = vld [vmem:[#allocation2 + $0x14] sm:$0xf] }
 0x293   : > { %1127 = vst.msk [vmem:[#allocation3 + $0xe0] sm:$0xf] %vm454_vm4, %v1104_v59  ;;  %2546 = vmatpush.bf16.msra.mxu2 %v5635_v60 }
 0x296   : > { %1349 = vrot.lane.b32.xlu2 %v1330_v61, %s5959_s10 }
 0x297   : > { %1357 = vrot.lane.b32.xlu0 %v1334_v62, %s5959_s10  ;;  %2547 = vmatpush.bf16.msra.mxu2 %v5634_v0  ;;  %v1477_v62 = vld [vmem:[#allocation2 + $0x18] sm:$0xf]  ;;  %v1519_v0 = vld [vmem:[#allocation2] sm:$0xf] }
 0x298   : > { %1353 = vrot.lane.b32.xlu1 %v1332_v63, %s5959_s10  ;;  %v1156_v1 = vpop.permute.xlu2 %1155  ;;  %v1521_v63 = vld [vmem:[#allocation2 + $0x8] sm:$0xf] }
 0x299   : > { %v1114_v2 = vpop.permute.xlu0 %1113  ;;  %1177 = vst.msk [vmem:[#allocation3 + $0xf8] sm:$0xf] %vm454_vm4, %v1156_v1 }
 0x29a   : > { %v1110_v3 = vpop.permute.xlu1 %1109  ;;  %1132 = vst.msk [vmem:[#allocation3 + $0x364] sm:$0xf] %vm454_vm4, %v1114_v2  ;;  %v5644_v35 = vld [vmem:[#allocation3 + $0xe0] sm:$0xff] }
 0x29b   : > { %1130 = vst.msk [vmem:[#allocation3 + $0xec] sm:$0xf] %vm454_vm4, %v1110_v3  ;;  %2548 = vmatpush.bf16.msra.mxu2 %v5633_v4  ;;  %v1520_v4 = vld [vmem:[#allocation2 + $0x4] sm:$0xf] }
 0x29e   : > { %1355 = vrot.lane.b32.xlu2 %v1333_v5, %s5959_s10  ;;  %v1524_v5 = vld [vmem:[#allocation2 + $0x14] sm:$0xf] }
 0x29f   : > { %1395 = vrot.lane.b32.xlu0 %v1377_v6, %s5960_s11  ;;  %2549 = vmatpush.bf16.msra.mxu2 %v5632_v8  ;;  %v1522_v6 = vld [vmem:[#allocation2 + $0xc] sm:$0xf] }
 0x2a0   : > { %1391 = vrot.lane.b32.xlu1 %v1375_v7, %s5960_s11  ;;  %v1162_v9 = vpop.permute.xlu2 %1161 }
 0x2a1   : > { %v1152_v10 = vpop.permute.xlu0 %1151  ;;  %1180 = vst.msk [vmem:[#allocation3 + $0x374] sm:$0xf] %vm454_vm4, %v1162_v9 }
 0x2a2   : > { %v1116_v11 = vpop.permute.xlu1 %1115  ;;  %1175 = vst.msk [vmem:[#allocation3 + $0xf0] sm:$0xf] %vm454_vm4, %v1152_v10  ;;  %v5645_v32 = vld [vmem:[#allocation3 + $0xe8] sm:$0xff]  ;;  %v1523_v10 = vld [vmem:[#allocation2 + $0x10] sm:$0xf] }
 0x2a3   : > { %1133 = vst.msk [vmem:[#allocation3 + $0x368] sm:$0xf] %vm454_vm4, %v1116_v11  ;;  %v1567_v11 = vld [vmem:[#allocation2] sm:$0xf] }
 0x2a6   : > { %1393 = vrot.lane.b32.xlu2 %v1376_v12, %s5960_s11  ;;  %v1525_v12 = vld [vmem:[#allocation2 + $0x18] sm:$0xf] }
 0x2a7   : > { %1401 = vrot.lane.b32.xlu0 %v1380_v13, %s5960_s11 }
 0x2a8   : > { %1397 = vrot.lane.b32.xlu1 %v1378_v14, %s5960_s11  ;;  %v1200_v15 = vpop.permute.xlu2 %1199 }
 0x2a9   : > { %v1158_v16 = vpop.permute.xlu0 %1157  ;;  %1223 = vst.msk [vmem:[#allocation3 + $0x100] sm:$0xf] %vm454_vm4, %v1200_v15 }
 0x2aa   : > { %v1154_v17 = vpop.permute.xlu1 %1153  ;;  %1178 = vst.msk [vmem:[#allocation3 + $0xfc] sm:$0xf] %vm454_vm4, %v1158_v16  ;;  %v1526_v16 = vld [vmem:[#allocation2 + $0x1c] sm:$0xf] }
 0x2ab   : > { %1176 = vst.msk [vmem:[#allocation3 + $0xf4] sm:$0xf] %vm454_vm4, %v1154_v17  ;;  %v1570_v17 = vld [vmem:[#allocation2 + $0xc] sm:$0xf] }
 0x2ae   : > { %1399 = vrot.lane.b32.xlu2 %v1379_v18, %s5960_s11  ;;  %v1568_v18 = vld [vmem:[#allocation2 + $0x4] sm:$0xf] }
 0x2af   : > { %1439 = vrot.lane.b32.xlu0 %v1423_v19, %s5961_s12 }
 0x2b0   : > { %1403 = vrot.lane.b32.xlu1 %v1381_v20, %s5960_s11  ;;  %v1206_v21 = vpop.permute.xlu2 %1205 }
 0x2b1   : > { %v1164_v22 = vpop.permute.xlu0 %1163  ;;  %1226 = vst.msk [vmem:[#allocation3 + $0x10c] sm:$0xf] %vm454_vm4, %v1206_v21  ;;  %v5647_v24 = vld [vmem:[#allocation3 + $0xf8] sm:$0xff] }
 0x2b2   : > { %v1160_v23 = vpop.permute.xlu1 %1159  ;;  %1181 = vst.msk [vmem:[#allocation3 + $0x378] sm:$0xf] %vm454_vm4, %v1164_v22  ;;  %2561 = vmatpush.bf16.msra.mxu3 %v5647_v24  ;;  %v5646_v27 = vld [vmem:[#allocation3 + $0xf0] sm:$0xff]  ;;  %v1569_v22 = vld [vmem:[#allocation2 + $0x8] sm:$0xf] }
 0x2b3   : > { %1179 = vst.msk [vmem:[#allocation3 + $0x370] sm:$0xf] %vm454_vm4, %v1160_v23  ;;  %v1573_v23 = vld [vmem:[#allocation2 + $0x18] sm:$0xf]  ;;  %v1571_v24 = vld [vmem:[#allocation2 + $0x10] sm:$0xf] }
 0x2b6   : > { %1405 = vrot.lane.b32.xlu2 %v1382_v25, %s5960_s11  ;;  %2562 = vmatpush.bf16.msra.mxu3 %v5646_v27  ;;  %s5980_s11 = smov 96  }
 0x2b7   : > { %1445 = vrot.lane.b32.xlu0 %v1426_v26, %s5961_s12 }
 0x2b8   : > { %1441 = vrot.lane.b32.xlu1 %v1424_v28, %s5961_s12  ;;  %v1212_v29 = vpop.permute.xlu2 %1211  ;;  %v1572_v28 = vld [vmem:[#allocation2 + $0x14] sm:$0xf] }
 0x2b9   : > { %v1202_v30 = vpop.permute.xlu0 %1201  ;;  %1229 = vst.msk [vmem:[#allocation3 + $0x388] sm:$0xf] %vm454_vm4, %v1212_v29  ;;  %v1616_v29 = vld [vmem:[#allocation2 + $0x4] sm:$0xf] }
 0x2ba   : > { %v1166_v31 = vpop.permute.xlu1 %1165  ;;  %1224 = vst.msk [vmem:[#allocation3 + $0x104] sm:$0xf] %vm454_vm4, %v1202_v30  ;;  %2563 = vmatpush.bf16.msra.mxu3 %v5645_v32  ;;  %v1574_v30 = vld [vmem:[#allocation2 + $0x1c] sm:$0xf] }
 0x2bb   : > { %1182 = vst.msk [vmem:[#allocation3 + $0x37c] sm:$0xf] %vm454_vm4, %v1166_v31 }
 0x2be   : > { %1443 = vrot.lane.b32.xlu2 %v1425_v33, %s5961_s12  ;;  %2564 = vmatpush.bf16.msra.mxu3 %v5644_v35  ;;  %v1615_v35 = vld [vmem:[#allocation2] sm:$0xf] }
 0x2bf   : > { %1451 = vrot.lane.b32.xlu0 %v1429_v34, %s5961_s12 }
 0x2c0   : > { %1447 = vrot.lane.b32.xlu1 %v1427_v36, %s5961_s12  ;;  %v1250_v37 = vpop.permute.xlu2 %1249  ;;  %v1619_v36 = vld [vmem:[#allocation2 + $0x10] sm:$0xf] }
 0x2c1   : > { %v1208_v38 = vpop.permute.xlu0 %1207  ;;  %1272 = vst.msk [vmem:[#allocation3 + $0x114] sm:$0xf] %vm454_vm4, %v1250_v37  ;;  %v1617_v37 = vld [vmem:[#allocation2 + $0x8] sm:$0xf] }
 0x2c2   : > { %v1204_v39 = vpop.permute.xlu1 %1203  ;;  %1227 = vst.msk [vmem:[#allocation3 + $0x380] sm:$0xf] %vm454_vm4, %v1208_v38  ;;  %2565 = vmatpush.bf16.msra.mxu3 %v5643_v40 }
 0x2c3   : > { %1225 = vst.msk [vmem:[#allocation3 + $0x108] sm:$0xf] %vm454_vm4, %v1204_v39 }
 0x2c6   : > { %1449 = vrot.lane.b32.xlu2 %v1428_v41, %s5961_s12  ;;  %2566 = vmatpush.bf16.msra.mxu3 %v5642_v43  ;;  %v1618_v43 = vld [vmem:[#allocation2 + $0xc] sm:$0xf] }
 0x2c7   : > { %1489 = vrot.lane.b32.xlu0 %v1472_v42, %s5962_s13 }
 0x2c8   : > { %1453 = vrot.lane.b32.xlu1 %v1430_v44, %s5961_s12  ;;  %v1256_v45 = vpop.permute.xlu2 %1255  ;;  %v1622_v44 = vld [vmem:[#allocation2 + $0x1c] sm:$0xf]  ;;  %s5981_s12 = smov 92  }
 0x2c9   : > { %v1214_v46 = vpop.permute.xlu0 %1213  ;;  %1275 = vst.msk [vmem:[#allocation3 + $0x390] sm:$0xf] %vm454_vm4, %v1256_v45  ;;  %v1620_v45 = vld [vmem:[#allocation2 + $0x14] sm:$0xf] }
 0x2ca   : > { %v1210_v47 = vpop.permute.xlu1 %1209  ;;  %1230 = vst.msk [vmem:[#allocation3 + $0x38c] sm:$0xf] %vm454_vm4, %v1214_v46  ;;  %2567 = vmatpush.bf16.msra.mxu3 %v5641_v48  ;;  %v6423_v46 = vld [vmem:[#allocation2 + $0xc] sm:$0xf] }
 0x2cb   : > { %1228 = vst.msk [vmem:[#allocation3 + $0x384] sm:$0xf] %vm454_vm4, %v1210_v47  ;;  %v6425_v47 = vld [vmem:[#allocation2 + $0xc] sm:$0xf] }
 0x2cc   : > { %v6427_v48 = vld [vmem:[#allocation2 + $0xc] sm:$0xf] }
 0x2ce   : > { %1487 = vrot.lane.b32.xlu2 %v1471_v49, %s5962_s13  ;;  %2568 = vmatpush.bf16.msra.mxu3 %v5640_v51  ;;  %v6429_v49 = vld [vmem:[#allocation2 + $0xc] sm:$0xf] }
 0x2cf   : > { %1495 = vrot.lane.b32.xlu0 %v1475_v50, %s5962_s13  ;;  %v6431_v50 = vld [vmem:[#allocation2 + $0xc] sm:$0xf] }
 0x2d0   : > { %1491 = vrot.lane.b32.xlu1 %v1473_v52, %s5962_s13  ;;  %v1262_v53 = vpop.permute.xlu2 %1261  ;;  %v6433_v51 = vld [vmem:[#allocation2 + $0xc] sm:$0xf] }
 0x2d1   : > { %v1252_v54 = vpop.permute.xlu0 %1251  ;;  %1278 = vst.msk [vmem:[#allocation3 + $0x39c] sm:$0xf] %vm454_vm4, %v1262_v53  ;;  %v6435_v52 = vld [vmem:[#allocation2 + $0xc] sm:$0xf] }
 0x2d2   : > { %v1248_v55 = vpop.permute.xlu1 %1247  ;;  %1273 = vst.msk [vmem:[#allocation3 + $0x118] sm:$0xf] %vm454_vm4, %v1252_v54  ;;  %v6437_v53 = vld [vmem:[#allocation2 + $0xc] sm:$0xf] }
 0x2d3   : > { %1271 = vst.msk [vmem:[#allocation3 + $0x110] sm:$0xf] %vm454_vm4, %v1248_v55  ;;  %v6439_v54 = vld [vmem:[#allocation2 + $0xc] sm:$0xf] }
 0x2d4   : > { %7497 = vst [vmem:[#allocation4_spill] sm:$0xff] %v6435_v52  ;;  %v6441_v55 = vld [vmem:[#allocation2 + $0xc] sm:$0xf]  ;;  %v6593_v52 = vld [vmem:[#allocation2 + $0x14] sm:$0xf] }
 0x2d5   : > { %7533 = vst [vmem:[#allocation39_spill] sm:$0xff] %v6593_v52  ;;  %v6613_v52 = vld [vmem:[#allocation2 + $0x10] sm:$0xf] }
 0x2d6   : > { %1493 = vrot.lane.b32.xlu2 %v1474_v56, %s5962_s13  ;;  %v6443_v56 = vld [vmem:[#allocation2 + $0x4] sm:$0xf]  ;;  %7538 = vst [vmem:[#allocation44_spill] sm:$0xff] %v6613_v52 }
 0x2d7   : > { %1501 = vrot.lane.b32.xlu0 %v1478_v57, %s5962_s13  ;;  %v6445_v57 = vld [vmem:[#allocation2 + $0xc] sm:$0xf] }
 0x2d8   : > { %1497 = vrot.lane.b32.xlu1 %v1476_v58, %s5962_s13  ;;  %v1300_v59 = vpop.permute.xlu2 %1299  ;;  %7498 = vst [vmem:[#allocation5_spill] sm:$0xff] %v6445_v57  ;;  %v6447_v58 = vld [vmem:[#allocation2 + $0xc] sm:$0xf]  ;;  %v6583_v57 = vld [vmem:[#allocation2 + $0x14] sm:$0xf] }
 0x2d9   : > { %v1258_v60 = vpop.permute.xlu0 %1257  ;;  %1321 = vst.msk [vmem:[#allocation3 + $0x128] sm:$0xf] %vm454_vm4, %v1300_v59  ;;  %v6449_v59 = vld [vmem:[#allocation2 + $0xc] sm:$0xf] }
 0x2da   : > { %v1254_v61 = vpop.permute.xlu1 %1253  ;;  %1276 = vst.msk [vmem:[#allocation3 + $0x394] sm:$0xf] %vm454_vm4, %v1258_v60  ;;  %v6451_v60 = vld [vmem:[#allocation2 + $0x4] sm:$0xf] }
 0x2db   : > { %1274 = vst.msk [vmem:[#allocation3 + $0x11c] sm:$0xf] %vm454_vm4, %v1254_v61  ;;  %v6453_v61 = vld [vmem:[#allocation2 + $0x4] sm:$0xf] }
 0x2dc   : > { %7499 = vst [vmem:[#allocation6_spill] sm:$0xff] %v6449_v59  ;;  %v6654_v59 = vld [vmem:[#allocation2 + $0x18] sm:$0xf] }
 0x2dd   : > { %7528 = vst [vmem:[#allocation34_spill] sm:$0xff] %v6583_v57  ;;  %v6603_v57 = vld [vmem:[#allocation2 + $0x10] sm:$0xf] }
 0x2de   : > { %1499 = vrot.lane.b32.xlu2 %v1477_v62, %s5962_s13  ;;  %v6455_v62 = vld [vmem:[#allocation2 + $0x4] sm:$0xf] }
 0x2df   : > { %1539 = vrot.lane.b32.xlu0 %v1521_v63, %s5963_s14  ;;  %v6457_v63 = vld [vmem:[#allocation2 + $0x4] sm:$0xf] }
 0x2e0   : > { %1535 = vrot.lane.b32.xlu1 %v1519_v0, %s5963_s14  ;;  %v1306_v1 = vpop.permute.xlu2 %1305  ;;  %v6459_v0 = vld [vmem:[#allocation2 + $0x4] sm:$0xf] }
 0x2e1   : > { %v1296_v2 = vpop.permute.xlu0 %1295  ;;  %1324 = vst.msk [vmem:[#allocation3 + $0x3a4] sm:$0xf] %vm454_vm4, %v1306_v1  ;;  %v6461_v1 = vld [vmem:[#allocation2 + $0x4] sm:$0xf] }
 0x2e2   : > { %v1260_v3 = vpop.permute.xlu1 %1259  ;;  %1319 = vst.msk [vmem:[#allocation3 + $0x120] sm:$0xf] %vm454_vm4, %v1296_v2  ;;  %v6463_v2 = vld [vmem:[#allocation2 + $0x4] sm:$0xf] }
 0x2e3   : > { %1277 = vst.msk [vmem:[#allocation3 + $0x398] sm:$0xf] %vm454_vm4, %v1260_v3  ;;  %v6465_v3 = vld [vmem:[#allocation2 + $0x4] sm:$0xf] }
 0x2e4   : > { %7500 = vst [vmem:[#allocation7_spill] sm:$0xff] %v6463_v2  ;;  %v1667_v2 = vld [vmem:[#allocation2 + $0x10] sm:$0xf] }
 0x2e6   : > { %1537 = vrot.lane.b32.xlu2 %v1520_v4, %s5963_s14  ;;  %v6467_v4 = vld [vmem:[#allocation2 + $0x4] sm:$0xf] }
 0x2e7   : > { %1545 = vrot.lane.b32.xlu0 %v1524_v5, %s5963_s14  ;;  %v6469_v5 = vld [vmem:[#allocation2 + $0x4] sm:$0xf] }
 0x2e8   : > { %1541 = vrot.lane.b32.xlu1 %v1522_v6, %s5963_s14  ;;  %v1344_v7 = vpop.permute.xlu2 %1343  ;;  %7501 = vst [vmem:[#allocation8_spill] sm:$0xff] %v6469_v5  ;;  %v6471_v6 = vld [vmem:[#allocation2 + $0x4] sm:$0xf]  ;;  %v6579_v5 = vld [vmem:[#allocation2 + $0x14] sm:$0xf] }
 0x2e9   : > { %v1302_v8 = vpop.permute.xlu0 %1301  ;;  %1367 = vst.msk [vmem:[#allocation3 + $0x130] sm:$0xf] %vm454_vm4, %v1344_v7 }
 0x2ea   : > { %v1298_v9 = vpop.permute.xlu1 %1297  ;;  %1322 = vst.msk [vmem:[#allocation3 + $0x12c] sm:$0xf] %vm454_vm4, %v1302_v8  ;;  %v6475_v8 = vld [vmem:[#allocation2 + $0xc] sm:$0xf] }
 0x2eb   : > { %1320 = vst.msk [vmem:[#allocation3 + $0x124] sm:$0xf] %vm454_vm4, %v1298_v9  ;;  %v7495_v9 = vmov 4286578559  }
 0x2ec   : > { %7502 = vst [vmem:[#allocation9_spill] sm:$0xff] %v6471_v6  ;;  %v6585_v6 = vld [vmem:[#allocation2 + $0x14] sm:$0xf] }
 0x2ed   : > { %2339 = vst.msk [vmem:[#allocation2 + $0xc] sm:$0xf] %vm2335_vm5, %v7495_v9 }
 0x2ee   : > { %1543 = vrot.lane.b32.xlu2 %v1523_v10, %s5963_s14  ;;  %v6480_v10 = vld [vmem:[#allocation2 + $0x4] sm:$0xf]  ;;  %7526 = vst [vmem:[#allocation32_spill] sm:$0xff] %v6579_v5  ;;  %v6615_v5 = vld [vmem:[#allocation2 + $0x10] sm:$0xf] }
 0x2ef   : > { %1583 = vrot.lane.b32.xlu0 %v1567_v11, %s5964_s16  ;;  %7503 = vst [vmem:[#allocation10_spill] sm:$0xff] %v6480_v10  ;;  %v6482_v11 = vld [vmem:[#allocation2 + $0x4] sm:$0xf]  ;;  %v6621_v10 = vld [vmem:[#allocation2 + $0x10] sm:$0xf] }
 0x2f0   : > { %1547 = vrot.lane.b32.xlu1 %v1525_v12, %s5963_s14  ;;  %v1350_v13 = vpop.permute.xlu2 %1349  ;;  %2337 = vst.msk [vmem:[#allocation2 + $0x4] sm:$0xf] %vm2335_vm5, %v7495_v9  ;;  %v6551_v9 = vld [vmem:[#allocation2 + $0x8] sm:$0xf] }
 0x2f1   : > { %v1308_v14 = vpop.permute.xlu0 %1307  ;;  %1370 = vst.msk [vmem:[#allocation3 + $0x13c] sm:$0xf] %vm454_vm4, %v1350_v13  ;;  %v5657_v42 = vld [vmem:[#allocation3 + $0x128] sm:$0xff] }
 0x2f2   : > { %v1304_v15 = vpop.permute.xlu1 %1303  ;;  %1325 = vst.msk [vmem:[#allocation3 + $0x3a8] sm:$0xf] %vm454_vm4, %v1308_v14  ;;  %v5656_v7 = vld [vmem:[#allocation3 + $0x120] sm:$0xff] }
 0x2f3   : > { %1323 = vst.msk [vmem:[#allocation3 + $0x3a0] sm:$0xf] %vm454_vm4, %v1304_v15  ;;  %v6487_v15 = vld [vmem:[#allocation2 + $0x1c] sm:$0xf] }
 0x2f4   : > { %7529 = vst [vmem:[#allocation35_spill] sm:$0xff] %v6585_v6  ;;  %v6605_v6 = vld [vmem:[#allocation2 + $0x10] sm:$0xf] }
 0x2f5   : > { %7534 = vst [vmem:[#allocation40_spill] sm:$0xff] %v6605_v6  ;;  %v5654_v6 = vld [vmem:[#allocation3 + $0x110] sm:$0xff] }
 0x2f6   : > { %1549 = vrot.lane.b32.xlu2 %v1526_v16, %s5963_s14  ;;  %v6489_v16 = vld [vmem:[#allocation2 + $0x1c] sm:$0xf]  ;;  %7539 = vst [vmem:[#allocation45_spill] sm:$0xff] %v6615_v5  ;;  %v6640_v5 = vld [vmem:[#allocation2 + $0x18] sm:$0xf] }
 0x2f7   : > { %1589 = vrot.lane.b32.xlu0 %v1570_v17, %s5964_s16  ;;  %v6491_v17 = vld [vmem:[#allocation2 + $0x1c] sm:$0xf]  ;;  %7542 = vst [vmem:[#allocation48_spill] sm:$0xff] %v6621_v10  ;;  %v6635_v10 = vld [vmem:[#allocation2 + $0x10] sm:$0xf] }
 0x2f8   : > { %1585 = vrot.lane.b32.xlu1 %v1568_v18, %s5964_s16  ;;  %v1356_v19 = vpop.permute.xlu2 %1355  ;;  %7504 = vst [vmem:[#allocation11_spill] sm:$0xff] %v6491_v17  ;;  %v6493_v18 = vld [vmem:[#allocation2 + $0x1c] sm:$0xf]  ;;  %v6563_v17 = vld [vmem:[#allocation2 + $0x14] sm:$0xf] }
 0x2f9   : > { %v1346_v20 = vpop.permute.xlu0 %1345  ;;  %1373 = vst.msk [vmem:[#allocation3 + $0x3b8] sm:$0xf] %vm454_vm4, %v1356_v19  ;;  %v6495_v19 = vld [vmem:[#allocation2 + $0x1c] sm:$0xf] }
 0x2fa   : > { %v1310_v21 = vpop.permute.xlu1 %1309  ;;  %1368 = vst.msk [vmem:[#allocation3 + $0x134] sm:$0xf] %vm454_vm4, %v1346_v20  ;;  %v6497_v20 = vld [vmem:[#allocation2 + $0x1c] sm:$0xf] }
 0x2fb   : > { %1326 = vst.msk [vmem:[#allocation3 + $0x3ac] sm:$0xf] %vm454_vm4, %v1310_v21  ;;  %v6499_v21 = vld [vmem:[#allocation2 + $0x1c] sm:$0xf] }
 0x2fc   : > { %7505 = vst [vmem:[#allocation12_spill] sm:$0xff] %v6493_v18  ;;  %v6569_v18 = vld [vmem:[#allocation2 + $0x8] sm:$0xf] }
 0x2fd   : > { %7506 = vst [vmem:[#allocation13_spill] sm:$0xff] %v6495_v19  ;;  %v6575_v19 = vld [vmem:[#allocation2 + $0x14] sm:$0xf] }
 0x2fe   : > { %1587 = vrot.lane.b32.xlu2 %v1569_v22, %s5964_s16  ;;  %7507 = vst [vmem:[#allocation14_spill] sm:$0xff] %v6497_v20  ;;  %v6501_v22 = vld [vmem:[#allocation2 + $0x1c] sm:$0xf]  ;;  %v6577_v20 = vld [vmem:[#allocation2 + $0x14] sm:$0xf] }
 0x2ff   : > { %1595 = vrot.lane.b32.xlu0 %v1573_v23, %s5964_s16  ;;  %7508 = vst [vmem:[#allocation15_spill] sm:$0xff] %v6499_v21  ;;  %v6503_v23 = vld [vmem:[#allocation2 + $0x1c] sm:$0xf]  ;;  %v6559_v21 = vld [vmem:[#allocation2 + $0x8] sm:$0xf] }
 0x300   : > { %1591 = vrot.lane.b32.xlu1 %v1571_v24, %s5964_s16  ;;  %v1394_v25 = vpop.permute.xlu2 %1393  ;;  %7509 = vst [vmem:[#allocation16_spill] sm:$0xff] %v6501_v22  ;;  %v6505_v24 = vld [vmem:[#allocation2 + $0x1c] sm:$0xf]  ;;  %v7521_v22 = vmov 4286578559  }
 0x301   : > { %v1352_v26 = vpop.permute.xlu0 %1351  ;;  %1416 = vst.msk [vmem:[#allocation3 + $0x144] sm:$0xf] %vm454_vm4, %v1394_v25  ;;  %v5658_v38 = vld [vmem:[#allocation3 + $0x130] sm:$0xff]  ;;  %v6507_v25 = vld [vmem:[#allocation2 + $0x1c] sm:$0xf] }
 0x302   : > { %v1348_v27 = vpop.permute.xlu1 %1347  ;;  %1371 = vst.msk [vmem:[#allocation3 + $0x3b0] sm:$0xf] %vm454_vm4, %v1352_v26  ;;  %v6509_v26 = vld [vmem:[#allocation2 + $0x1c] sm:$0xf] }
 0x303   : > { %1369 = vst.msk [vmem:[#allocation3 + $0x138] sm:$0xf] %vm454_vm4, %v1348_v27  ;;  %v5655_v27 = vld [vmem:[#allocation3 + $0x118] sm:$0xff] }
 0x304   : > { %7510 = vst [vmem:[#allocation17_spill] sm:$0xff] %v6503_v23  ;;  %v6573_v23 = vld [vmem:[#allocation2 + $0x14] sm:$0xf] }
 0x305   : > { %7511 = vst [vmem:[#allocation18_spill] sm:$0xff] %v6505_v24  ;;  %v6571_v24 = vld [vmem:[#allocation2 + $0x8] sm:$0xf] }
 0x306   : > { %1593 = vrot.lane.b32.xlu2 %v1572_v28, %s5964_s16  ;;  %7512 = vst [vmem:[#allocation19_spill] sm:$0xff] %v6507_v25  ;;  %v6512_v28 = vld [vmem:[#allocation2] sm:$0xf]  ;;  %v6553_v25 = vld [vmem:[#allocation2 + $0x8] sm:$0xf] }
 0x307   : > { %1633 = vrot.lane.b32.xlu0 %v1616_v29, %s5965_s17  ;;  %7513 = vst [vmem:[#allocation20_spill] sm:$0xff] %v6509_v26  ;;  %v6514_v29 = vld [vmem:[#allocation2] sm:$0xf]  ;;  %v6555_v26 = vld [vmem:[#allocation2 + $0x8] sm:$0xf] }
 0x308   : > { %1597 = vrot.lane.b32.xlu1 %v1574_v30, %s5964_s16  ;;  %v1400_v31 = vpop.permute.xlu2 %1399  ;;  %v6516_v30 = vld [vmem:[#allocation2 + $0x1c] sm:$0xf]  ;;  %7519 = vst [vmem:[#allocation26_spill] sm:$0xff] %v6555_v26  ;;  %v6589_v26 = vld [vmem:[#allocation2 + $0x14] sm:$0xf]  ;;  %s5606_s16 = sshll.u32 %s7605_s22, 5 }
 0x309   : > { %v1358_v32 = vpop.permute.xlu0 %1357  ;;  %1419 = vst.msk [vmem:[#allocation3 + $0x3c0] sm:$0xf] %vm454_vm4, %v1400_v31  ;;  %v6518_v31 = vld [vmem:[#allocation2] sm:$0xf] }
 0x30a   : > { %v1354_v33 = vpop.permute.xlu1 %1353  ;;  %1374 = vst.msk [vmem:[#allocation3 + $0x3bc] sm:$0xf] %vm454_vm4, %v1358_v32  ;;  %v5659_v34 = vld [vmem:[#allocation3 + $0x138] sm:$0xff]  ;;  %v6520_v32 = vld [vmem:[#allocation2] sm:$0xf] }
 0x30b   : > { %1372 = vst.msk [vmem:[#allocation3 + $0x3b4] sm:$0xf] %vm454_vm4, %v1354_v33  ;;  %2887 = vmatpush.bf16.msrb.mxu2 %v5659_v34  ;;  %v6522_v33 = vld [vmem:[#allocation2] sm:$0xf] }
 0x30c   : > { %7514 = vst [vmem:[#allocation21_spill] sm:$0xff] %v6516_v30  ;;  %v6524_v34 = vld [vmem:[#allocation2] sm:$0xf]  ;;  %v6557_v30 = vld [vmem:[#allocation2 + $0x8] sm:$0xf] }
 0x30d   : > { %7520 = vst [vmem:[#allocation27_spill] sm:$0xff] %v6557_v30  ;;  %v5653_v30 = vld [vmem:[#allocation3 + $0x108] sm:$0xff] }
 0x30e   : > { %1631 = vrot.lane.b32.xlu2 %v1615_v35, %s5965_s17  ;;  %v6526_v35 = vld [vmem:[#allocation2] sm:$0xf]  ;;  %7522 = vst [vmem:[#allocation28_spill] sm:$0xff] %v6569_v18  ;;  %v6591_v18 = vld [vmem:[#allocation2 + $0x14] sm:$0xf] }
 0x30f   : > { %1639 = vrot.lane.b32.xlu0 %v1619_v36, %s5965_s17  ;;  %2888 = vmatpush.bf16.msrb.mxu2 %v5658_v38  ;;  %7515 = vst [vmem:[#allocation22_spill] sm:$0xff] %v6526_v35  ;;  %v6528_v36 = vld [vmem:[#allocation2] sm:$0xf]  ;;  %v6587_v35 = vld [vmem:[#allocation2 + $0x14] sm:$0xf] }
 0x310   : > { %1635 = vrot.lane.b32.xlu1 %v1617_v37, %s5965_s17  ;;  %v1406_v39 = vpop.permute.xlu2 %1405  ;;  %v6530_v37 = vld [vmem:[#allocation2] sm:$0xf]  ;;  %7523 = vst [vmem:[#allocation29_spill] sm:$0xff] %v6571_v24  ;;  %v6617_v24 = vld [vmem:[#allocation2 + $0x10] sm:$0xf] }
 0x311   : > { %v1396_v40 = vpop.permute.xlu0 %1395  ;;  %1422 = vst.msk [vmem:[#allocation3 + $0x3cc] sm:$0xf] %vm454_vm4, %v1406_v39  ;;  %v6532_v38 = vld [vmem:[#allocation2] sm:$0xf] }
 0x312   : > { %v1392_v41 = vpop.permute.xlu1 %1391  ;;  %1417 = vst.msk [vmem:[#allocation3 + $0x148] sm:$0xf] %vm454_vm4, %v1396_v40  ;;  %v6534_v39 = vld [vmem:[#allocation2] sm:$0xf] }
 0x313   : > { %1415 = vst.msk [vmem:[#allocation3 + $0x140] sm:$0xf] %vm454_vm4, %v1392_v41  ;;  %2889 = vmatpush.bf16.msrb.mxu2 %v5657_v42  ;;  %v6536_v40 = vld [vmem:[#allocation2] sm:$0xf] }
 0x314   : > { %7516 = vst [vmem:[#allocation23_spill] sm:$0xff] %v6530_v37  ;;  %v6538_v41 = vld [vmem:[#allocation2] sm:$0xf]  ;;  %v6659_v37 = vld [vmem:[#allocation2 + $0x18] sm:$0xf] }
 0x315   : > { %7517 = vst [vmem:[#allocation24_spill] sm:$0xff] %v6538_v41  ;;  %v6540_v42 = vld [vmem:[#allocation2] sm:$0xf]  ;;  %v6619_v41 = vld [vmem:[#allocation2 + $0x10] sm:$0xf] }
 0x316   : > { %1637 = vrot.lane.b32.xlu2 %v1618_v43, %s5965_s17  ;;  %v1621_v43 = vld [vmem:[#allocation2 + $0x18] sm:$0xf]  ;;  %7524 = vst [vmem:[#allocation30_spill] sm:$0xff] %v6575_v19  ;;  %v6595_v19 = vld [vmem:[#allocation2 + $0x10] sm:$0xf] }
 0x317   : > { %1645 = vrot.lane.b32.xlu0 %v1622_v44, %s5965_s17  ;;  %2890 = vmatpush.bf16.msrb.mxu2 %v5656_v7  ;;  %v1665_v44 = vld [vmem:[#allocation2 + $0x8] sm:$0xf]  ;;  %v6545_v7 = vld [vmem:[#allocation2 + $0x1c] sm:$0xf]  ;;  %7525 = vst [vmem:[#allocation31_spill] sm:$0xff] %v6577_v20 }
 0x318   : > { %1641 = vrot.lane.b32.xlu1 %v1620_v45, %s5965_s17  ;;  %v1444_v12 = vpop.permute.xlu2 %1443  ;;  %v6543_v45 = vld [vmem:[#allocation2 + $0x8] sm:$0xf]  ;;  %7518 = vst [vmem:[#allocation25_spill] sm:$0xff] %v6545_v7  ;;  %v6565_v7 = vld [vmem:[#allocation2 + $0x14] sm:$0xf] }
 0x319   : > { %v1402_v13 = vpop.permute.xlu0 %1401  ;;  %1465 = vst.msk [vmem:[#allocation3 + $0x158] sm:$0xf] %vm454_vm4, %v1444_v12  ;;  %v6547_v12 = vld [vmem:[#allocation2 + $0x8] sm:$0xf] }
 0x31a   : > { %v1398_v14 = vpop.permute.xlu1 %1397  ;;  %1420 = vst.msk [vmem:[#allocation3 + $0x3c4] sm:$0xf] %vm454_vm4, %v1402_v13  ;;  %v6549_v13 = vld [vmem:[#allocation2 + $0x8] sm:$0xf] }
 0x31b   : > { %1418 = vst.msk [vmem:[#allocation3 + $0x14c] sm:$0xf] %vm454_vm4, %v1398_v14  ;;  %v6561_v14 = vld [vmem:[#allocation2 + $0x8] sm:$0xf]  ;;  %2891 = vmatpush.bf16.msrb.mxu2 %v5655_v27  ;;  %v6581_v27 = vld [vmem:[#allocation2 + $0x14] sm:$0xf] }
 0x31c   : > { %2343 = vst.msk [vmem:[#allocation2 + $0x1c] sm:$0xf] %vm2335_vm5, %v7521_v22  ;;  %v6599_v20 = vld [vmem:[#allocation2 + $0x8] sm:$0xf] }
 0x31d   : > { %7527 = vst [vmem:[#allocation33_spill] sm:$0xff] %v6581_v27  ;;  %v6601_v27 = vld [vmem:[#allocation2 + $0x8] sm:$0xf] }
 0x31e   : > { %7530 = vst [vmem:[#allocation36_spill] sm:$0xff] %v6587_v35  ;;  %v6607_v35 = vld [vmem:[#allocation2 + $0x10] sm:$0xf]  ;;  %1643 = vrot.lane.b32.xlu2 %v1621_v43, %s5965_s17 }
 0x31f   : > { %7531 = vst [vmem:[#allocation37_spill] sm:$0xff] %v6589_v26  ;;  %v6609_v26 = vld [vmem:[#allocation2 + $0x10] sm:$0xf]  ;;  %1683 = vrot.lane.b32.xlu0 %v1665_v44, %s5967_s18  ;;  %2892 = vmatpush.bf16.msrb.mxu2 %v5654_v6  ;;  %v6650_v6 = vld [vmem:[#allocation2 + $0x18] sm:$0xf] }
 0x320   : > { %7532 = vst [vmem:[#allocation38_spill] sm:$0xff] %v6591_v18  ;;  %v6611_v18 = vld [vmem:[#allocation2 + $0x10] sm:$0xf]  ;;  %1679 = vrot.lane.b32.xlu1 %v6512_v28, %s5967_s18  ;;  %v1450_v43 = vpop.permute.xlu2 %1449  ;;  %v6642_v28 = vld [vmem:[#allocation2 + $0x18] sm:$0xf] }
 0x321   : > { %2336 = vst.msk [vmem:[#allocation2] sm:$0xf] %vm2335_vm5, %v7521_v22  ;;  %v1440_v52 = vpop.permute.xlu0 %1439 }
 0x322   : > { %7535 = vst [vmem:[#allocation41_spill] sm:$0xff] %v6607_v35  ;;  %v1404_v44 = vpop.permute.xlu1 %1403  ;;  %v6652_v35 = vld [vmem:[#allocation2 + $0x18] sm:$0xf] }
 0x323   : > { %7536 = vst [vmem:[#allocation42_spill] sm:$0xff] %v6609_v26  ;;  %v6644_v26 = vld [vmem:[#allocation2 + $0x18] sm:$0xf]  ;;  %2893 = vmatpush.bf16.msrb.mxu2 %v5653_v30 }
 0x324   : > { %7537 = vst [vmem:[#allocation43_spill] sm:$0xff] %v6611_v18  ;;  %v6627_v18 = vld [vmem:[#allocation2 + $0x14] sm:$0xf] }
 0x325   : > { %7540 = vst [vmem:[#allocation46_spill] sm:$0xff] %v6617_v24  ;;  %v1717_v24 = vld [vmem:[#allocation2 + $0x18] sm:$0xf] }
 0x326   : > { %7541 = vst [vmem:[#allocation47_spill] sm:$0xff] %v6619_v41  ;;  %v6633_v41 = vld [vmem:[#allocation2 + $0x10] sm:$0xf]  ;;  %1681 = vrot.lane.b32.xlu2 %v6443_v56, %s5967_s18 }
 0x327   : > { %2338 = vst.msk [vmem:[#allocation2 + $0x8] sm:$0xf] %vm2335_vm5, %v7521_v22  ;;  %1689 = vrot.lane.b32.xlu0 %v6563_v17, %s5967_s18 }
 0x328   : > { %7543 = vst [vmem:[#allocation49_spill] sm:$0xff] %v6627_v18  ;;  %v1669_v18 = vld [vmem:[#allocation2 + $0x18] sm:$0xf]  ;;  %1685 = vrot.lane.b32.xlu1 %v6423_v46, %s5967_s18 }
 0x329   : > { %2341 = vst.msk [vmem:[#allocation2 + $0x14] sm:$0xf] %vm2335_vm5, %v7521_v22 }
 0x32a   : > { %7544 = vst [vmem:[#allocation50_spill] sm:$0xff] %v6633_v41  ;;  %v6646_v41 = vld [vmem:[#allocation2 + $0x18] sm:$0xf] }
 0x32b   : > { %7545 = vst [vmem:[#allocation51_spill] sm:$0xff] %v6635_v10  ;;  %v6648_v10 = vld [vmem:[#allocation2 + $0x18] sm:$0xf] }
 0x32c   : > { %2340 = vst.msk [vmem:[#allocation2 + $0x10] sm:$0xf] %vm2335_vm5, %v7521_v22 }
 0x32d   : > { %1468 = vst.msk [vmem:[#allocation3 + $0x3d4] sm:$0xf] %vm454_vm4, %v1450_v43  ;;  %v6656_v43 = vld [vmem:[#allocation2 + $0x18] sm:$0xf] }
 0x32e   : > { %7546 = vst [vmem:[#allocation52_spill] sm:$0xff] %v6642_v28  ;;  %v6662_v28 = vld [vmem:[#allocation2 + $0x18] sm:$0xf]  ;;  %1687 = vrot.lane.b32.xlu2 %v1667_v2, %s5967_s18 }
 0x32f   : > { %7547 = vst [vmem:[#allocation53_spill] sm:$0xff] %v6644_v26  ;;  %v6664_v26 = vld [vmem:[#allocation2 + $0x18] sm:$0xf]  ;;  %1727 = vrot.lane.b32.xlu0 %v6514_v29, %s5968_s19 }
 0x330   : > { %7548 = vst [vmem:[#allocation54_spill] sm:$0xff] %v6648_v10  ;;  %v1446_v10 = vpop.permute.xlu0 %1445  ;;  %1691 = vrot.lane.b32.xlu1 %v1669_v18, %s5967_s18 }
 0x331   : > { %1463 = vst.msk [vmem:[#allocation3 + $0x150] sm:$0xf] %vm454_vm4, %v1440_v52  ;;  %v5652_v52 = vld [vmem:[#allocation3 + $0x100] sm:$0xff] }
 0x332   : > { %1421 = vst.msk [vmem:[#allocation3 + $0x3c8] sm:$0xf] %vm454_vm4, %v1404_v44  ;;  %2894 = vmatpush.bf16.msrb.mxu2 %v5652_v52  ;;  %v1488_v44 = vpop.permute.xlu2 %1487 }
 0x333   : > { %7549 = vst [vmem:[#allocation55_spill] sm:$0xff] %v6662_v28  ;;  %v1442_v28 = vpop.permute.xlu1 %1441 }
 0x334   : > { %2342 = vst.msk [vmem:[#allocation2 + $0x18] sm:$0xf] %vm2335_vm5, %v7521_v22 }
 0x335   : > { %1511 = vst.msk [vmem:[#allocation3 + $0x160] sm:$0xf] %vm454_vm4, %v1488_v44 }
 0x336   : > { %1466 = vst.msk [vmem:[#allocation3 + $0x15c] sm:$0xf] %vm454_vm4, %v1446_v10  ;;  %1693 = vrot.lane.b32.xlu2 %v6487_v15, %s5967_s18  ;;  %s5605_s18 = sshll.u32 %s7603_s23, 4 }
 0x337   : > { %1464 = vst.msk [vmem:[#allocation3 + $0x154] sm:$0xf] %vm454_vm4, %v1442_v28  ;;  %1733 = vrot.lane.b32.xlu0 %v6425_v47, %s5968_s19 }
 0x338   : > { %2345 = vst.msk [vmem:[#allocation2] sm:$0xf] %vm2344_vm6, %v7521_v22  ;;  %v1452_v56 = vpop.permute.xlu0 %1451  ;;  %1729 = vrot.lane.b32.xlu1 %v6451_v60, %s5968_s19 }
 0x339   : > { %2346 = vst.msk [vmem:[#allocation2 + $0x4] sm:$0xf] %vm2344_vm6, %v7521_v22 }
 0x33a   : > { %v1494_v46 = vpop.permute.xlu2 %1493  ;;  %1469 = vst.msk [vmem:[#allocation3 + $0x3d8] sm:$0xf] %vm454_vm4, %v1452_v56 }
 0x33b   : > { %1514 = vst.msk [vmem:[#allocation3 + $0x16c] sm:$0xf] %vm454_vm4, %v1494_v46  ;;  %v1448_v10 = vpop.permute.xlu1 %1447 }
 0x33c   : > { %1467 = vst.msk [vmem:[#allocation3 + $0x3d0] sm:$0xf] %vm454_vm4, %v1448_v10 }
 0x33d   : > { %2348 = vst.msk [vmem:[#allocation2 + $0xc] sm:$0xf] %vm2344_vm6, %v7521_v22 }
 0x33e   : > { %2352 = vst.msk [vmem:[#allocation2 + $0x1c] sm:$0xf] %vm2344_vm6, %v7521_v22  ;;  %1731 = vrot.lane.b32.xlu2 %v6543_v45, %s5968_s19 }
 0x33f   : > { %2347 = vst.msk [vmem:[#allocation2 + $0x8] sm:$0xf] %vm2344_vm6, %v7521_v22  ;;  %1739 = vrot.lane.b32.xlu0 %v1717_v24, %s5968_s19 }
 0x340   : > { %2350 = vst.msk [vmem:[#allocation2 + $0x14] sm:$0xf] %vm2344_vm6, %v7521_v22  ;;  %v1490_v17 = vpop.permute.xlu0 %1489  ;;  %1735 = vrot.lane.b32.xlu1 %v6595_v19, %s5968_s19  ;;  %v5813_v29 = vld [vmem:[#allocation2] sm:$0xff]  }
 0x341   : > { %2349 = vst.msk [vmem:[#allocation2 + $0x10] sm:$0xf] %vm2344_vm6, %v7521_v22  ;;  %v6723_v19 = vunpack.c.h.bf16 %v5813_v29 }
 0x342   : > { %v1500_v2 = vpop.permute.xlu2 %1499  ;;  %1512 = vst.msk [vmem:[#allocation3 + $0x164] sm:$0xf] %vm454_vm4, %v1490_v17 }
 0x343   : > { %1517 = vst.msk [vmem:[#allocation3 + $0x3e8] sm:$0xf] %vm454_vm4, %v1500_v2  ;;  %v1454_v15 = vpop.permute.xlu1 %1453 }
 0x344   : > { %1470 = vst.msk [vmem:[#allocation3 + $0x3dc] sm:$0xf] %vm454_vm4, %v1454_v15 }
 0x345   : > { %2351 = vst.msk [vmem:[#allocation2 + $0x18] sm:$0xf] %vm2344_vm6, %v7521_v22  ;;  %v6721_v22 = vunpack.c.l.bf16 %v5813_v29 }
 0x346   : > { %1737 = vrot.lane.b32.xlu2 %v6565_v7, %s5968_s19 }
 0x347   : > { %1777 = vrot.lane.b32.xlu0 %v6453_v61, %s5969_s20  ;;  %v5896_v7 = vpack.i.bf16 %v6723_v19, %v6721_v22  ;;  %v5828_v61 = vld [vmem:[#allocation2 + $0x8] sm:$0xff]  }
 0x348   : > { %v1496_v60 = vpop.permute.xlu0 %1495  ;;  %1741 = vrot.lane.b32.xlu1 %v6489_v16, %s5968_s19  ;;  %v6735_v28 = vunpack.c.l.bf16 %v5828_v61  ;;  %v6737_v16 = vunpack.c.h.bf16 %v5828_v61 }
 0x349   : > { %1515 = vst.msk [vmem:[#allocation3 + $0x3e0] sm:$0xf] %vm454_vm4, %v1496_v60 }
 0x34a   : > { %v1538_v47 = vpop.permute.xlu2 %1537  ;;  %v5891_v56 = vpack.i.bf16 %v6737_v16, %v6735_v28 }
 0x34b   : > { %1560 = vst.msk [vmem:[#allocation3 + $0x174] sm:$0xf] %vm454_vm4, %v1538_v47  ;;  %v1492_v18 = vpop.permute.xlu1 %1491 }
 0x34c   : > { %1513 = vst.msk [vmem:[#allocation3 + $0x168] sm:$0xf] %vm454_vm4, %v1492_v18  ;;  %v5663_v18 = vld [vmem:[#allocation3 + $0x158] sm:$0xff] }
 0x34e   : > { %1775 = vrot.lane.b32.xlu2 %v6518_v31, %s5969_s20 }
 0x34f   : > { %5897 = vrot.lane.b32.xlu0 %v5896_v7, %s5943_s15 }
 0x350   : > { %v1502_v30 = vpop.permute.xlu0 %1501  ;;  %1779 = vrot.lane.b32.xlu1 %v6547_v12, %s5969_s20 }
 0x351   : > { %1518 = vst.msk [vmem:[#allocation3 + $0x3ec] sm:$0xf] %vm454_vm4, %v1502_v30 }
 0x352   : > { %v1544_v24 = vpop.permute.xlu2 %1543 }
 0x353   : > { %1563 = vst.msk [vmem:[#allocation3 + $0x3f0] sm:$0xf] %vm454_vm4, %v1544_v24  ;;  %v1498_v45 = vpop.permute.xlu1 %1497  ;;  %v5665_v47 = vld [vmem:[#allocation3 + $0x168] sm:$0xff] }
 0x354   : > { %1516 = vst.msk [vmem:[#allocation3 + $0x3e4] sm:$0xf] %vm454_vm4, %v1498_v45  ;;  %v5661_v24 = vld [vmem:[#allocation3 + $0x148] sm:$0xff] }
 0x356   : > { %5892 = vrot.lane.b32.xlu2 %v5891_v56, %s5943_s15 }
 0x357   : > { %1785 = vrot.lane.b32.xlu0 %v6573_v23, %s5969_s20 }
 0x358   : > { %v1540_v44 = vpop.permute.xlu0 %1539  ;;  %1781 = vrot.lane.b32.xlu1 %v6427_v48, %s5969_s20 }
 0x359   : > { %1561 = vst.msk [vmem:[#allocation3 + $0x178] sm:$0xf] %vm454_vm4, %v1540_v44 }
 0x35a   : > { %v1550_v52 = vpop.permute.xlu2 %1549 }
 0x35b   : > { %1566 = vst.msk [vmem:[#allocation3 + $0x3fc] sm:$0xf] %vm454_vm4, %v1550_v52  ;;  %v1536_v46 = vpop.permute.xlu1 %1535 }
 0x35c   : > { %1559 = vst.msk [vmem:[#allocation3 + $0x170] sm:$0xf] %vm454_vm4, %v1536_v46 }
 0x35e   : > { %1783 = vrot.lane.b32.xlu2 %v6603_v57, %s5969_s20 }
 0x35f   : > { %1925 = vrot.lane.b32.xlu0 %v6433_v51, %s5970_s24 }
 0x360   : > { %v1546_v12 = vpop.permute.xlu0 %1545  ;;  %1787 = vrot.lane.b32.xlu1 %v6640_v5, %s5969_s20 }
 0x361   : > { %1564 = vst.msk [vmem:[#allocation3 + $0x3f4] sm:$0xf] %vm454_vm4, %v1546_v12 }
 0x362   : > { %v1588_v31 = vpop.permute.xlu2 %1587 }
 0x363   : > { %1609 = vst.msk [vmem:[#allocation3 + $0x188] sm:$0xf] %vm454_vm4, %v1588_v31  ;;  %v1542_v10 = vpop.permute.xlu1 %1541  ;;  %v5666_v51 = vld [vmem:[#allocation3 + $0x170] sm:$0xff] }
 0x364   : > { %1562 = vst.msk [vmem:[#allocation3 + $0x17c] sm:$0xf] %vm454_vm4, %v1542_v10 }
 0x366   : > { %1923 = vrot.lane.b32.xlu2 %v6553_v25, %s5970_s24 }
 0x367   : > { %1875 = vrot.lane.b32.xlu0 %v6551_v9, %s5971_s25  ;;  %v5664_v9 = vld [vmem:[#allocation3 + $0x160] sm:$0xff] }
 0x368   : > { %v1584_v23 = vpop.permute.xlu0 %1583  ;;  %1919 = vrot.lane.b32.xlu1 %v6524_v34, %s5970_s24 }
 0x369   : > { %1607 = vst.msk [vmem:[#allocation3 + $0x180] sm:$0xf] %vm454_vm4, %v1584_v23 }
 0x36a   : > { %v1594_v48 = vpop.permute.xlu2 %1593 }
 0x36b   : > { %1612 = vst.msk [vmem:[#allocation3 + $0x404] sm:$0xf] %vm454_vm4, %v1594_v48  ;;  %v1548_v2 = vpop.permute.xlu1 %1547  ;;  %v5667_v17 = vld [vmem:[#allocation3 + $0x178] sm:$0xff] }
 0x36c   : > { %1565 = vst.msk [vmem:[#allocation3 + $0x3f8] sm:$0xf] %vm454_vm4, %v1548_v2  ;;  %2906 = vmatpush.bf16.msrb.mxu3 %v5667_v17 }
 0x36e   : > { %1921 = vrot.lane.b32.xlu2 %v6459_v0, %s5970_s24 }
 0x36f   : > { %1873 = vrot.lane.b32.xlu0 %v6457_v63, %s5971_s25  ;;  %v5662_v63 = vld [vmem:[#allocation3 + $0x150] sm:$0xff] }
 0x370   : > { %2907 = vmatpush.bf16.msrb.mxu3 %v5666_v51  ;;  %v1590_v5 = vpop.permute.xlu0 %1589  ;;  %1877 = vrot.lane.b32.xlu1 %v6431_v50, %s5971_s25 }
 0x371   : > { %1610 = vst.msk [vmem:[#allocation3 + $0x18c] sm:$0xf] %vm454_vm4, %v1590_v5 }
 0x372   : > { %v1632_v57 = vpop.permute.xlu2 %1631 }
 0x373   : > { %1655 = vst.msk [vmem:[#allocation3 + $0x190] sm:$0xf] %vm454_vm4, %v1632_v57  ;;  %v1586_v15 = vpop.permute.xlu1 %1585 }
 0x374   : > { %1608 = vst.msk [vmem:[#allocation3 + $0x184] sm:$0xf] %vm454_vm4, %v1586_v15  ;;  %2908 = vmatpush.bf16.msrb.mxu3 %v5665_v47 }
 0x376   : > { %1871 = vrot.lane.b32.xlu2 %v6522_v33, %s5971_s25  ;;  %v5660_v33 = vld [vmem:[#allocation3 + $0x140] sm:$0xff] }
 0x378   : > { %2909 = vmatpush.bf16.msrb.mxu3 %v5664_v9  ;;  %v1596_v34 = vpop.permute.xlu0 %1595  ;;  %1827 = vrot.lane.b32.xlu1 %v6549_v13, %s5972_s26 }
 0x379   : > { %1613 = vst.msk [vmem:[#allocation3 + $0x408] sm:$0xf] %vm454_vm4, %v1596_v34 }
 0x37a   : > { %v1638_v25 = vpop.permute.xlu2 %1637 }
 0x37b   : > { %1658 = vst.msk [vmem:[#allocation3 + $0x19c] sm:$0xf] %vm454_vm4, %v1638_v25  ;;  %v1592_v60 = vpop.permute.xlu1 %1591 }
 0x37c   : > { %1611 = vst.msk [vmem:[#allocation3 + $0x400] sm:$0xf] %vm454_vm4, %v1592_v60  ;;  %2910 = vmatpush.bf16.msrb.mxu3 %v5663_v18 }
 0x37e   : > { %1829 = vrot.lane.b32.xlu2 %v6429_v49, %s5972_s26 }
 0x380   : > { %2911 = vmatpush.bf16.msrb.mxu3 %v5662_v63  ;;  %v1634_v0 = vpop.permute.xlu0 %1633  ;;  %1823 = vrot.lane.b32.xlu1 %v6520_v32, %s5972_s26 }
 0x381   : > { %1656 = vst.msk [vmem:[#allocation3 + $0x194] sm:$0xf] %vm454_vm4, %v1634_v0 }
 0x382   : > { %v1644_v50 = vpop.permute.xlu2 %1643 }
 0x383   : > { %1661 = vst.msk [vmem:[#allocation3 + $0x418] sm:$0xf] %vm454_vm4, %v1644_v50  ;;  %v1598_v29 = vpop.permute.xlu1 %1597 }
 0x384   : > { %1614 = vst.msk [vmem:[#allocation3 + $0x40c] sm:$0xf] %vm454_vm4, %v1598_v29  ;;  %2912 = vmatpush.bf16.msrb.mxu3 %v5661_v24 }
 0x386   : > { %1825 = vrot.lane.b32.xlu2 %v6455_v62, %s5972_s26 }
 0x388   : > { %2913 = vmatpush.bf16.msrb.mxu3 %v5660_v33  ;;  %v1640_v30 = vpop.permute.xlu0 %1639  ;;  %2117 = vrot.lane.b32.xlu1 %v6441_v55, %s5973_s27 }
 0x389   : > { %1659 = vst.msk [vmem:[#allocation3 + $0x410] sm:$0xf] %vm454_vm4, %v1640_v30 }
 0x38a   : > { %v1682_v13 = vpop.permute.xlu2 %1681 }
 0x38b   : > { %1704 = vst.msk [vmem:[#allocation3 + $0x1a4] sm:$0xf] %vm454_vm4, %v1682_v13  ;;  %v1636_v45 = vpop.permute.xlu1 %1635 }
 0x38c   : > { %1657 = vst.msk [vmem:[#allocation3 + $0x198] sm:$0xf] %vm454_vm4, %v1636_v45 }
 0x390   : > { %v1646_v7 = vpop.permute.xlu0 %1645  ;;  %2113 = vrot.lane.b32.xlu1 %v6467_v4, %s5973_s27 }
 0x391   : > { %1662 = vst.msk [vmem:[#allocation3 + $0x41c] sm:$0xf] %vm454_vm4, %v1646_v7 }
 0x392   : > { %v1688_v49 = vpop.permute.xlu2 %1687 }
 0x393   : > { %1707 = vst.msk [vmem:[#allocation3 + $0x420] sm:$0xf] %vm454_vm4, %v1688_v49  ;;  %v1642_v32 = vpop.permute.xlu1 %1641  ;;  %v5675_v0 = vld [vmem:[#allocation3 + $0x198] sm:$0xff]  ;;  %v5673_v49 = vld [vmem:[#allocation3 + $0x188] sm:$0xff] }
 0x394   : > { %1660 = vst.msk [vmem:[#allocation3 + $0x414] sm:$0xf] %vm454_vm4, %v1642_v32 }
 0x398   : > { %v1684_v52 = vpop.permute.xlu0 %1683  ;;  %2067 = vrot.lane.b32.xlu1 %v6559_v21, %s5974_s28 }
 0x399   : > { %1705 = vst.msk [vmem:[#allocation3 + $0x1a8] sm:$0xf] %vm454_vm4, %v1684_v52 }
 0x39a   : > { %v1694_v61 = vpop.permute.xlu2 %1693 }
 0x39b   : > { %1710 = vst.msk [vmem:[#allocation3 + $0x42c] sm:$0xf] %vm454_vm4, %v1694_v61  ;;  %v1680_v62 = vpop.permute.xlu1 %1679 }
 0x39c   : > { %1703 = vst.msk [vmem:[#allocation3 + $0x1a0] sm:$0xf] %vm454_vm4, %v1680_v62 }
 0x3a0   : > { %v1690_v44 = vpop.permute.xlu0 %1689  ;;  %2305 = vrot.lane.b32.xlu1 %v6482_v11, %s5975_s29 }
 0x3a1   : > { %1708 = vst.msk [vmem:[#allocation3 + $0x424] sm:$0xf] %vm454_vm4, %v1690_v44 }
 0x3a2   : > { %v1732_v55 = vpop.permute.xlu2 %1731 }
 0x3a3   : > { %1753 = vst.msk [vmem:[#allocation3 + $0x1b8] sm:$0xf] %vm454_vm4, %v1732_v55  ;;  %v1686_v46 = vpop.permute.xlu1 %1685  ;;  %v5676_v34 = vld [vmem:[#allocation3 + $0x1a0] sm:$0xff] }
 0x3a4   : > { %1706 = vst.msk [vmem:[#allocation3 + $0x1ac] sm:$0xf] %vm454_vm4, %v1686_v46  ;;  %v5608_v55 = vld [vmem:[%s7490_s2 + $0x4] sm:$0xf] }
 0x3a8   : > { %v1728_v56 = vpop.permute.xlu0 %1727  ;;  %2259 = vrot.lane.b32.xlu1 %v6599_v20, %s5976_s30 }
 0x3a9   : > { %1751 = vst.msk [vmem:[#allocation3 + $0x1b0] sm:$0xf] %vm454_vm4, %v1728_v56  ;;  %v7551_v56 = vld [vmem:[#allocation27_spill] sm:$0xff] }
 0x3aa   : > { %v1738_v4 = vpop.permute.xlu2 %1737 }
 0x3ab   : > { %1756 = vst.msk [vmem:[#allocation3 + $0x434] sm:$0xf] %vm454_vm4, %v1738_v4  ;;  %v1692_v31 = vpop.permute.xlu1 %1691  ;;  %v5677_v25 = vld [vmem:[#allocation3 + $0x1a8] sm:$0xff] }
 0x3ac   : > { %1709 = vst.msk [vmem:[#allocation3 + $0x428] sm:$0xf] %vm454_vm4, %v1692_v31  ;;  %v7552_v31 = vld [vmem:[#allocation6_spill] sm:$0xff] }
 0x3b0   : > { %v1734_v12 = vpop.permute.xlu0 %1733  ;;  %2021 = vrot.lane.b32.xlu1 %v6437_v53, %s5977_s7 }
 0x3b1   : > { %1754 = vst.msk [vmem:[#allocation3 + $0x1bc] sm:$0xf] %vm454_vm4, %v1734_v12 }
 0x3b2   : > { %v1776_v21 = vpop.permute.xlu2 %1775 }
 0x3b3   : > { %1799 = vst.msk [vmem:[#allocation3 + $0x1c0] sm:$0xf] %vm454_vm4, %v1776_v21  ;;  %v1730_v10 = vpop.permute.xlu1 %1729 }
 0x3b4   : > { %1752 = vst.msk [vmem:[#allocation3 + $0x1b4] sm:$0xf] %vm454_vm4, %v1730_v10  ;;  %v5610_v10 = vld [vmem:[%s7490_s2 + $0x14] sm:$0xf] }
 0x3b8   : > { %v1740_v48 = vpop.permute.xlu0 %1739  ;;  %v5679_v17 = vld [vmem:[#allocation3 + $0x1b8] sm:$0xff]  ;;  %2015 = vrot.lane.b32.xlu1 %v6528_v36, %s5977_s7 }
 0x3b9   : > { %1757 = vst.msk [vmem:[#allocation3 + $0x438] sm:$0xf] %vm454_vm4, %v1740_v48  ;;  %3082 = vmatpush.bf16.msra.mxu0 %v5679_v17  ;;  %v7553_v48 = vld [vmem:[#allocation10_spill] sm:$0xff] }
 0x3ba   : > { %v5893_v11 = vpop.permute.xlu2 %5892 }
 0x3bb   : > { %v5895_v23 = vunpack.i.h.bf16 %v5893_v11  ;;  %v5894_v2 = vunpack.i.l.bf16 %v5893_v11  ;;  %v1736_v20 = vpop.permute.xlu1 %1735  ;;  %v5678_v5 = vld [vmem:[#allocation3 + $0x1b0] sm:$0xff]  ;;  %v4843_v11 = vld [vmem:[%s7490_s2 + $0x18] sm:$0xf0] }
 0x3bc   : > { %1755 = vst.msk [vmem:[#allocation3 + $0x430] sm:$0xf] %vm454_vm4, %v1736_v20 }
 0x3bd   : > { %v3346_v51 = vmax.f32 %v6737_v16, %v5895_v23  ;;  %v3345_v57 = vmax.f32 %v6735_v28, %v5894_v2  ;;  %3083 = vmatpush.bf16.msra.mxu0 %v5678_v5  ;;  %v7554_v23 = vld [vmem:[#allocation24_spill] sm:$0xff]  ;;  %v4846_v2 = vor.u32 %v5610_v10, %v4843_v11 }
 0x3bf   : > { %v5901_v47 = vpack.i.bf16 %v3346_v51, %v3345_v57  ;;  %v7555_v51 = vld [vmem:[#allocation29_spill] sm:$0xff]  ;;  %v7556_v57 = vld [vmem:[#allocation7_spill] sm:$0xff] }
 0x3c0   : > { %v1778_v15 = vpop.permute.xlu0 %1777  ;;  %2213 = vrot.lane.b32.xlu1 %v6447_v58, %s5979_s9  ;;  %v5674_v58 = vld [vmem:[#allocation3 + $0x190] sm:$0xff] }
 0x3c1   : > { %1800 = vst.msk [vmem:[#allocation3 + $0x1c4] sm:$0xf] %vm454_vm4, %v1778_v15  ;;  %5902 = vrot.lane.b32.xlu0 %v5901_v47, %s5978_s8  ;;  %3084 = vmatpush.bf16.msra.mxu0 %v5677_v25  ;;  %v5668_v47 = vld [vmem:[%s7490_s2 + $0x64] sm:$0xf] }
 0x3c2   : > { %v1784_v53 = vpop.permute.xlu2 %1783  ;;  %v7557_v25 = vld [vmem:[#allocation4_spill] sm:$0xff] }
 0x3c3   : > { %1803 = vst.msk [vmem:[#allocation3 + $0x440] sm:$0xf] %vm454_vm4, %v1784_v53  ;;  %v1742_v9 = vpop.permute.xlu1 %1741 }
 0x3c4   : > { %1758 = vst.msk [vmem:[#allocation3 + $0x43c] sm:$0xf] %vm454_vm4, %v1742_v9  ;;  %v5003_v9 = vld [vmem:[%s7490_s2 + $0x68] sm:$0xf0] }
 0x3c5   : > { %3085 = vmatpush.bf16.msra.mxu0 %v5676_v34  ;;  %v7558_v34 = vld [vmem:[#allocation26_spill] sm:$0xff] }
 0x3c8   : > { %v5898_v60 = vpop.permute.xlu0 %5897  ;;  %2207 = vrot.lane.b32.xlu1 %v6536_v40, %s5979_s9  ;;  %v5680_v15 = vld [vmem:[#allocation3 + $0x1c0] sm:$0xff] }
 0x3c9   : > { %v5900_v18 = vunpack.i.h.bf16 %v5898_v60  ;;  %v5899_v63 = vunpack.i.l.bf16 %v5898_v60  ;;  %2115 = vrot.lane.b32.xlu0 %v6561_v14, %s5973_s27  ;;  %3086 = vmatpush.bf16.msra.mxu0 %v5675_v0  ;;  %v5672_v14 = vld [vmem:[#allocation3 + $0x180] sm:$0xff]  ;;  %v5006_v60 = vor.u32 %v5668_v47, %v5003_v9  ;;  %v7560_v0 = vld [vmem:[#allocation9_spill] sm:$0xff] }
 0x3ca   : > { %v1924_v36 = vpop.permute.xlu2 %1923 }
 0x3cb   : > { %1945 = vst.msk [vmem:[#allocation3 + $0x1f8] sm:$0xf] %vm454_vm4, %v1924_v36  ;;  %v1780_v50 = vpop.permute.xlu1 %1779  ;;  %v3344_v29 = vmax.f32 %v6723_v19, %v5900_v18  ;;  %v3343_v24 = vmax.f32 %v6721_v22, %v5899_v63  ;;  %v5741_v36 = vld [vmem:[#allocation3 + $0x338] sm:$0xff]  ;;  %v5740_v18 = vld [vmem:[#allocation3 + $0x330] sm:$0xff] }
 0x3cc   : > { %1801 = vst.msk [vmem:[#allocation3 + $0x1c8] sm:$0xf] %vm454_vm4, %v1780_v50  ;;  %v7559_v50 = vld [vmem:[#allocation22_spill] sm:$0xff] }
 0x3cd   : > { %3087 = vmatpush.bf16.msra.mxu0 %v5674_v58  ;;  %v5906_v30 = vpack.i.bf16 %v3344_v29, %v3343_v24  ;;  %v5739_v29 = vld [vmem:[#allocation3 + $0x328] sm:$0xff]  ;;  %v5738_v24 = vld [vmem:[#allocation3 + $0x320] sm:$0xff] }
 0x3cf   : > { %5907 = vrot.lane.b32.xlu2 %v5906_v30, %s5978_s8  ;;  %v5737_v30 = vld [vmem:[#allocation3 + $0x318] sm:$0xff] }
 0x3d0   : > { %v1786_v13 = vpop.permute.xlu0 %1785  ;;  %1969 = vrot.lane.b32.xlu1 %v6461_v1, %s5980_s11 }
 0x3d1   : > { %1804 = vst.msk [vmem:[#allocation3 + $0x444] sm:$0xf] %vm454_vm4, %v1786_v13  ;;  %2111 = vrot.lane.b32.xlu0 %v6532_v38, %s5973_s27  ;;  %3088 = vmatpush.bf16.msra.mxu0 %v5673_v49  ;;  %v7562_v13 = vld [vmem:[#allocation28_spill] sm:$0xff]  ;;  %v5829_v49 = vld [vmem:[#allocation2 + $0x18] sm:$0xff]  }
 0x3d2   : > { %v1922_v33 = vpop.permute.xlu2 %1921 }
 0x3d3   : > { %1944 = vst.msk [vmem:[#allocation3 + $0x1f4] sm:$0xf] %vm454_vm4, %v1922_v33  ;;  %v1782_v45 = vpop.permute.xlu1 %1781  ;;  %v7561_v33 = vld [vmem:[#allocation5_spill] sm:$0xff] }
 0x3d4   : > { %1802 = vst.msk [vmem:[#allocation3 + $0x1cc] sm:$0xf] %vm454_vm4, %v1782_v45  ;;  %v5736_v45 = vld [vmem:[#allocation3 + $0x310] sm:$0xff] }
 0x3d5   : > { %3089 = vmatpush.bf16.msra.mxu0 %v5672_v14 }
 0x3d7   : > { %2307 = vrot.lane.b32.xlu2 %v6601_v27, %s5975_s29 }
 0x3d8   : > { %v1926_v7 = vpop.permute.xlu0 %1925  ;;  %2159 = vrot.lane.b32.xlu1 %v6534_v39, %s5981_s12 }
 0x3d9   : > { %1946 = vst.msk [vmem:[#allocation3 + $0x1fc] sm:$0xf] %vm454_vm4, %v1926_v7  ;;  %2309 = vrot.lane.b32.xlu0 %v6475_v8, %s5975_s29  ;;  %v5735_v7 = vld [vmem:[#allocation3 + $0x308] sm:$0xff] }
 0x3da   : > { %v1872_v40 = vpop.permute.xlu2 %1871 }
 0x3db   : > { %1895 = vst.msk [vmem:[#allocation3 + $0x1e0] sm:$0xf] %vm454_vm4, %v1872_v40  ;;  %v1788_v32 = vpop.permute.xlu1 %1787  ;;  %v5681_v5 = vld [vmem:[#allocation3 + $0x1c8] sm:$0xff]  ;;  %v7563_v40 = vld [vmem:[#allocation8_spill] sm:$0xff] }
 0x3dc   : > { %1805 = vst.msk [vmem:[#allocation3 + $0x448] sm:$0xf] %vm454_vm4, %v1788_v32  ;;  %v6926_v32 = vunpack.c.l.bf16 %v5829_v49 }
 0x3df   : > { %2069 = vrot.lane.b32.xlu2 %v6439_v54, %s5974_s28  ;;  %v7550_v54 = vld [vmem:[#allocation23_spill] sm:$0xff] }
 0x3e0   : > { %v1876_v38 = vpop.permute.xlu0 %1875  ;;  %v5687_v52 = vld [vmem:[#allocation3 + $0x1f8] sm:$0xff] }
 0x3e1   : > { %1897 = vst.msk [vmem:[#allocation3 + $0x1e8] sm:$0xf] %vm454_vm4, %v1876_v38  ;;  %2303 = vrot.lane.b32.xlu0 %v6540_v42, %s5975_s29  ;;  %3101 = vmatpush.bf16.msra.mxu1 %v5687_v52  ;;  %v4835_v42 = vld [vmem:[%s7490_s2 + $0x8] sm:$0xf0]  ;;  %v5734_v38 = vld [vmem:[#allocation3 + $0x300] sm:$0xff] }
 0x3e2   : > { %v1830_v1 = vpop.permute.xlu2 %1829  ;;  %v4838_v44 = vor.u32 %v5608_v55, %v4835_v42  ;;  %v4753_v52 = vld [vmem:[%s7490_s2 + $0x20] sm:$0xf]  ;;  %v5760_v55 = vld [vmem:[#allocation3 + $0x3b0] sm:$0xff] }
 0x3e3   : > { %1850 = vst.msk [vmem:[#allocation3 + $0x1dc] sm:$0xf] %vm454_vm4, %v1830_v1  ;;  %v1920_v61 = vpop.permute.xlu1 %1919  ;;  %v6928_v1 = vunpack.c.h.bf16 %v5829_v49 }
 0x3e4   : > { %1943 = vst.msk [vmem:[#allocation3 + $0x1f0] sm:$0xf] %vm454_vm4, %v1920_v61  ;;  %2723 = vmatmul.bf16.vlgmr.msrb.gmra.mxu1 %v4838_v44 }
 0x3e5   : > { %v5911_v61 = vpack.i.bf16 %v6928_v1, %v6926_v32 }
 0x3e7   : > { %2063 = vrot.lane.b32.xlu2 %v7550_v54, %s5974_s28 }
 0x3e8   : > { %v1874_v27 = vpop.permute.xlu0 %1873 }
 0x3e9   : > { %1896 = vst.msk [vmem:[#allocation3 + $0x1e4] sm:$0xf] %vm454_vm4, %v1874_v27  ;;  %2065 = vrot.lane.b32.xlu0 %v6465_v3, %s5974_s28  ;;  %v5761_v27 = vld [vmem:[#allocation3 + $0x3b8] sm:$0xff] }
 0x3ea   : > { %v1826_v8 = vpop.permute.xlu2 %1825 }
 0x3eb   : > { %1848 = vst.msk [vmem:[#allocation3 + $0x1d4] sm:$0xf] %vm454_vm4, %v1826_v8  ;;  %v1878_v39 = vpop.permute.xlu1 %1877  ;;  %v5686_v62 = vld [vmem:[#allocation3 + $0x1f0] sm:$0xff]  ;;  %v5629_v8 = vld [vmem:[%s7490_s2 + $0x24] sm:$0xf0] }
 0x3ec   : > { %1898 = vst.msk [vmem:[#allocation3 + $0x1ec] sm:$0xf] %vm454_vm4, %v1878_v39  ;;  %3102 = vmatpush.bf16.msra.mxu1 %v5686_v62  ;;  %v4754_v39 = vor.u32 %v5629_v8, %v4753_v52  ;;  %v7573_v8 = vld [vmem:[#allocation45_spill] sm:$0xff] }
 0x3ee   : > { %2550 = vmatmul.bf16.vlgmr.msra.gmra.mxu2 %v4754_v39 }
 0x3ef   : > { %2261 = vrot.lane.b32.xlu2 %v7552_v31, %s5976_s30 }
 0x3f0   : > { %v5684_v3 = vld [vmem:[#allocation3 + $0x1e0] sm:$0xff] }
 0x3f1   : > { %2019 = vrot.lane.b32.xlu0 %v7551_v56, %s5977_s7  ;;  %v5759_v56 = vld [vmem:[#allocation3 + $0x3a8] sm:$0xff] }
 0x3f3   : > { %v1828_v46 = vpop.permute.xlu1 %1827  ;;  %v5685_v4 = vld [vmem:[#allocation3 + $0x1e8] sm:$0xff] }
 0x3f4   : > { %1849 = vst.msk [vmem:[#allocation3 + $0x1d8] sm:$0xf] %vm454_vm4, %v1828_v46  ;;  %3103 = vmatpush.bf16.msra.mxu1 %v5685_v4 }
 0x3f5   : > { %2728 = vmatmul.bf16.gmra.mxu1 %v4846_v2 }
 0x3f7   : > { %2255 = vrot.lane.b32.xlu2 %v7554_v23, %s5976_s30 }
 0x3f8   : > { %3104 = vmatpush.bf16.msra.mxu1 %v5684_v3 }
 0x3f9   : > { %2257 = vrot.lane.b32.xlu0 %v7553_v48, %s5976_s30 }
 0x3fb   : > { %v1824_v21 = vpop.permute.xlu1 %1823  ;;  %v5683_v12 = vld [vmem:[#allocation3 + $0x1d8] sm:$0xff] }
 0x3fc   : > { %1847 = vst.msk [vmem:[#allocation3 + $0x1d0] sm:$0xf] %vm454_vm4, %v1824_v21  ;;  %3105 = vmatpush.bf16.msra.mxu1 %v5683_v12  ;;  %v7564_v21 = vld [vmem:[#allocation14_spill] sm:$0xff]  ;;  %v5758_v12 = vld [vmem:[#allocation3 + $0x3a0] sm:$0xff] }
 0x3ff   : > { %2017 = vrot.lane.b32.xlu2 %v7556_v57, %s5977_s7 }
 0x401   : > { %2211 = vrot.lane.b32.xlu0 %v7555_v51, %s5979_s9 }
 0x403   : > { %v2118_v20 = vpop.permute.xlu1 %2117  ;;  %v5682_v17 = vld [vmem:[#allocation3 + $0x1d0] sm:$0xff] }
 0x404   : > { %2138 = vst.msk [vmem:[#allocation3 + $0x23c] sm:$0xf] %vm454_vm4, %v2118_v20  ;;  %3106 = vmatpush.bf16.msra.mxu1 %v5682_v17  ;;  %v5757_v17 = vld [vmem:[#allocation3 + $0x398] sm:$0xff] }
 0x407   : > { %1971 = vrot.lane.b32.xlu2 %v7558_v34, %s5980_s11 }
 0x408   : > { %3107 = vmatpush.bf16.msra.mxu1 %v5681_v5  ;;  %v5821_v5 = vld [vmem:[#allocation2 + $0x10] sm:$0xff]  }
 0x409   : > { %1973 = vrot.lane.b32.xlu0 %v7557_v25, %s5980_s11  ;;  %v5755_v25 = vld [vmem:[#allocation3 + $0x388] sm:$0xff] }
 0x40b   : > { %v2114_v53 = vpop.permute.xlu1 %2113 }
 0x40c   : > { %2136 = vst.msk [vmem:[#allocation3 + $0x234] sm:$0xf] %vm454_vm4, %v2114_v53  ;;  %3108 = vmatpush.bf16.msra.mxu1 %v5680_v15  ;;  %v6961_v15 = vunpack.c.l.bf16 %v5821_v5 }
 0x40f   : > { %3109 = vmatmul.bf16.vlgmr.msra.gmra.mxu1 %v5006_v60  ;;  %2209 = vrot.lane.b32.xlu2 %v7560_v0, %s5979_s9  ;;  %v5754_v60 = vld [vmem:[#allocation3 + $0x380] sm:$0xff] }
 0x410   : > { %3663 = vmatpush.bf16.msrb.mxu1 %v5741_v36  ;;  %v7566_v36 = vld [vmem:[#allocation32_spill] sm:$0xff] }
 0x411   : > { %1967 = vrot.lane.b32.xlu0 %v7559_v50, %s5980_s11 }
 0x413   : > { %v2068_v63 = vpop.permute.xlu1 %2067 }
 0x414   : > { %3664 = vmatpush.bf16.msrb.mxu1 %v5740_v18  ;;  %2089 = vst.msk [vmem:[#allocation3 + $0x228] sm:$0xf] %vm454_vm4, %v2068_v63 }
 0x417   : > { %2163 = vrot.lane.b32.xlu2 %v7562_v13, %s5981_s12 }
 0x418   : > { %3665 = vmatpush.bf16.msrb.mxu1 %v5739_v29  ;;  %v7567_v29 = vld [vmem:[#allocation41_spill] sm:$0xff] }
 0x419   : > { %2165 = vrot.lane.b32.xlu0 %v7561_v33, %s5981_s12 }
 0x41b   : > { %v2306_v58 = vpop.permute.xlu1 %2305 }
 0x41c   : > { %3666 = vmatpush.bf16.msrb.mxu1 %v5738_v24  ;;  %2328 = vst.msk [vmem:[#allocation3 + $0x274] sm:$0xf] %vm454_vm4, %v2306_v58  ;;  %v7568_v24 = vld [vmem:[#allocation42_spill] sm:$0xff]  ;;  %v7569_v58 = vld [vmem:[#allocation53_spill] sm:$0xff] }
 0x41f   : > { %2161 = vrot.lane.b32.xlu2 %v7563_v40, %s5981_s12  ;;  %v7571_v40 = vld [vmem:[#allocation18_spill] sm:$0xff] }
 0x420   : > { %3667 = vmatpush.bf16.msrb.mxu1 %v5737_v30 }
 0x423   : > { %v2260_v14 = vpop.permute.xlu1 %2259 }
 0x424   : > { %3668 = vmatpush.bf16.msrb.mxu1 %v5736_v45  ;;  %2281 = vst.msk [vmem:[#allocation3 + $0x268] sm:$0xf] %vm454_vm4, %v2260_v14  ;;  %v7570_v14 = vld [vmem:[#allocation17_spill] sm:$0xff] }
 0x427   : > { %5912 = vrot.lane.b32.xlu2 %v5911_v61, %s5943_s15 }
 0x428   : > { %3669 = vmatpush.bf16.msrb.mxu1 %v5735_v7  ;;  %v7572_v7 = vld [vmem:[#allocation36_spill] sm:$0xff] }
 0x429   : > { %v5908_v54 = vpop.permute.xlu2 %5907 }
 0x42a   : > { %v5910_v42 = vunpack.i.h.bf16 %v5908_v54  ;;  %v5909_v44 = vunpack.i.l.bf16 %v5908_v54  ;;  %v4761_v54 = vld [vmem:[%s7490_s2 + $0x30] sm:$0xf] }
 0x42b   : > { %v2022_v62 = vpop.permute.xlu1 %2021 }
 0x42c   : > { %3670 = vmatpush.bf16.msrb.mxu1 %v5734_v38  ;;  %2042 = vst.msk [vmem:[#allocation3 + $0x21c] sm:$0xf] %vm454_vm4, %v2022_v62  ;;  %v3372_v46 = vmax.f32 %v6723_v19, %v5910_v42  ;;  %v3371_v4 = vmax.f32 %v6721_v22, %v5909_v44  ;;  %v5628_v22 = vld [vmem:[%s7490_s2 + $0x24] sm:$0xf]  ;;  %v4755_v19 = vld [vmem:[%s7490_s2 + $0x28] sm:$0xf0] }
 0x42d   : > { %v4758_v51 = vor.u32 %v5628_v22, %v4755_v19  ;;  %v5631_v42 = vld [vmem:[%s7490_s2 + $0x34] sm:$0xf0]  ;;  %v5630_v22 = vld [vmem:[%s7490_s2 + $0x34] sm:$0xf]  ;;  %v4763_v19 = vld [vmem:[%s7490_s2 + $0x38] sm:$0xf0] }
 0x42e   : > { %v3375_v3 = vpack.c.bf16 %v3372_v46, %v3371_v4  ;;  %v4762_v44 = vor.u32 %v5631_v42, %v4761_v54  ;;  %v7576_v4 = vld [vmem:[#allocation31_spill] sm:$0xff] }
 0x42f   : > { %1933 = vrot.lane.b32.xlu2 %v7564_v21, %s5970_s24  ;;  %2569 = vmatmul.bf16.vlgmr.msra.gmra.mxu3 %v4758_v51  ;;  %v5749_v54 = vld [vmem:[#allocation3 + $0x378] sm:$0xff] }
 0x430   : > { %4007 = vmatpush.bf16.msra.mxu1 %v5761_v27  ;;  %3393 = vrot.lane.b32.xlu1 %v3375_v3, %s5959_s10  ;;  %v7574_v27 = vld [vmem:[#allocation46_spill] sm:$0xff] }
 0x431   : > { %v2308_v11 = vpop.permute.xlu2 %2307  ;;  %2555 = vmatmul.bf16.gmra.mxu2 %v4762_v44 }
 0x432   : > { %2329 = vst.msk [vmem:[#allocation3 + $0x278] sm:$0xf] %vm454_vm4, %v2308_v11 }
 0x433   : > { %v2016_v31 = vpop.permute.xlu1 %2015  ;;  %v5903_v10 = vpop.permute.xlu0 %5902 }
 0x434   : > { %4008 = vmatpush.bf16.msra.mxu1 %v5760_v55  ;;  %2039 = vst.msk [vmem:[#allocation3 + $0x210] sm:$0xf] %vm454_vm4, %v2016_v31  ;;  %v5905_v48 = vunpack.i.h.bf16 %v5903_v10  ;;  %v5904_v23 = vunpack.i.l.bf16 %v5903_v10  ;;  %v7579_v10 = vld [vmem:[#allocation40_spill] sm:$0xff] }
 0x436   : > { %v3374_v2 = vmax.f32 %v6737_v16, %v5905_v48  ;;  %v3373_v20 = vmax.f32 %v6735_v28, %v5904_v23  ;;  %v5756_v16 = vld [vmem:[#allocation3 + $0x390] sm:$0xff]  ;;  %v6963_v28 = vunpack.c.h.bf16 %v5821_v5  ;;  %v5609_v5 = vld [vmem:[%s7490_s2 + $0x4] sm:$0xf0] }
 0x437   : > { %2123 = vrot.lane.b32.xlu2 %v6654_v59, %s5973_s27 }
 0x438   : > { %4009 = vmatpush.bf16.msra.mxu1 %v5759_v56  ;;  %v3376_v53 = vpack.c.bf16 %v3374_v2, %v3373_v20  ;;  %1931 = vrot.lane.b32.xlu1 %v6646_v41, %s5970_s24  ;;  %v5916_v59 = vpack.i.bf16 %v6963_v28, %v6961_v15  ;;  %v7565_v41 = vld [vmem:[#allocation13_spill] sm:$0xff]  ;;  %v7577_v56 = vld [vmem:[#allocation12_spill] sm:$0xff]  ;;  %v4766_v2 = vor.u32 %v5630_v22, %v4763_v19 }
 0x439   : > { %v2070_v9 = vpop.permute.xlu2 %2069  ;;  %v4917_v20 = vld [vmem:[%s7490_s2 + $0x40] sm:$0xf] }
 0x43a   : > { %3395 = vrot.lane.b32.xlu0 %v3376_v53, %s5959_s10  ;;  %2090 = vst.msk [vmem:[#allocation3 + $0x22c] sm:$0xf] %vm454_vm4, %v2070_v9  ;;  %v7581_v9 = vld [vmem:[#allocation16_spill] sm:$0xff] }
 0x43b   : > { %v2214_v57 = vpop.permute.xlu1 %2213  ;;  %v2116_v47 = vpop.permute.xlu0 %2115  ;;  %v5746_v19 = vld [vmem:[#allocation3 + $0x360] sm:$0xff] }
 0x43c   : > { %4010 = vmatpush.bf16.msra.mxu1 %v5758_v12  ;;  %2234 = vst.msk [vmem:[#allocation3 + $0x25c] sm:$0xf] %vm454_vm4, %v2214_v57  ;;  %v7578_v12 = vld [vmem:[#allocation52_spill] sm:$0xff] }
 0x43d   : > { %2137 = vst.msk [vmem:[#allocation3 + $0x238] sm:$0xf] %vm454_vm4, %v2116_v47  ;;  %v4833_v57 = vld [vmem:[%s7490_s2] sm:$0xf]  ;;  %v7580_v47 = vld [vmem:[#allocation35_spill] sm:$0xff] }
 0x43f   : > { %1885 = vrot.lane.b32.xlu2 %v7565_v41, %s5971_s25  ;;  %2574 = vmatmul.bf16.gmra.mxu3 %v4766_v2  ;;  %v5648_v41 = vld [vmem:[%s7490_s2 + $0x44] sm:$0xf]  ;;  %v5721_v2 = vld [vmem:[#allocation3 + $0x2b8] sm:$0xff] }
 0x440   : > { %4011 = vmatpush.bf16.msra.mxu1 %v5757_v17  ;;  %1929 = vrot.lane.b32.xlu1 %v7566_v36, %s5970_s24  ;;  %v5649_v17 = vld [vmem:[%s7490_s2 + $0x44] sm:$0xf0]  ;;  %v4919_v36 = vld [vmem:[%s7490_s2 + $0x48] sm:$0xf0] }
 0x441   : > { %v2064_v63 = vpop.permute.xlu2 %2063  ;;  %v5697_v49 = vld [vmem:[#allocation3 + $0x228] sm:$0xff]  ;;  %v4918_v51 = vor.u32 %v5649_v17, %v4917_v20 }
 0x442   : > { %5917 = vrot.lane.b32.xlu0 %v5916_v59, %s5943_s15  ;;  %2087 = vst.msk [vmem:[#allocation3 + $0x220] sm:$0xf] %vm454_vm4, %v2064_v63  ;;  %v7587_v20 = vld [vmem:[#allocation21_spill] sm:$0xff] }
 0x443   : > { %v2208_v34 = vpop.permute.xlu1 %2207  ;;  %v2112_v18 = vpop.permute.xlu0 %2111  ;;  %2895 = vmatmul.bf16.vlgmr.msrb.gmra.mxu2 %v4918_v51  ;;  %v5745_v51 = vld [vmem:[#allocation3 + $0x358] sm:$0xff] }
 0x444   : > { %4012 = vmatpush.bf16.msra.mxu1 %v5756_v16  ;;  %2231 = vst.msk [vmem:[#allocation3 + $0x250] sm:$0xf] %vm454_vm4, %v2208_v34  ;;  %v5699_v50 = vld [vmem:[#allocation3 + $0x238] sm:$0xff]  ;;  %v4834_v16 = vor.u32 %v5609_v5, %v4833_v57  ;;  %v5720_v57 = vld [vmem:[#allocation3 + $0x2b0] sm:$0xff]  ;;  %v5688_v5 = vld [vmem:[%s7490_s2 + $0x84] sm:$0xf] }
 0x445   : > { %2135 = vst.msk [vmem:[#allocation3 + $0x230] sm:$0xf] %vm454_vm4, %v2112_v18  ;;  %3277 = vmatpush.bf16.msra.mxu2 %v5699_v50 }
 0x446   : > { %2704 = vmatmul.bf16.vlgmr.msrb.gmra.mxu0 %v4834_v16  ;;  %v7588_v16 = vld [vmem:[#allocation25_spill] sm:$0xff] }
 0x447   : > { %1879 = vrot.lane.b32.xlu2 %v7567_v29, %s5971_s25  ;;  %v4925_v29 = vld [vmem:[%s7490_s2 + $0x50] sm:$0xf] }
 0x448   : > { %4013 = vmatpush.bf16.msra.mxu1 %v5755_v25  ;;  %1883 = vrot.lane.b32.xlu1 %v7569_v58, %s5971_s25  ;;  %v4841_v58 = vld [vmem:[%s7490_s2 + $0x10] sm:$0xf] }
 0x449   : > { %v2262_v13 = vpop.permute.xlu2 %2261 }
 0x44a   : > { %1927 = vrot.lane.b32.xlu0 %v7568_v24, %s5970_s24  ;;  %2282 = vst.msk [vmem:[#allocation3 + $0x26c] sm:$0xf] %vm454_vm4, %v2262_v13  ;;  %v5651_v24 = vld [vmem:[%s7490_s2 + $0x54] sm:$0xf0] }
 0x44b   : > { %v1970_v0 = vpop.permute.xlu1 %1969  ;;  %v2310_v33 = vpop.permute.xlu0 %2309 }
 0x44c   : > { %4014 = vmatpush.bf16.msra.mxu1 %v5754_v60  ;;  %1992 = vst.msk [vmem:[#allocation3 + $0x204] sm:$0xf] %vm454_vm4, %v1970_v0  ;;  %v5698_v30 = vld [vmem:[#allocation3 + $0x230] sm:$0xff]  ;;  %v7582_v60 = vld [vmem:[#allocation44_spill] sm:$0xff]  ;;  %v4922_v0 = vor.u32 %v5648_v41, %v4919_v36  ;;  %v5011_v36 = vld [vmem:[%s7490_s2 + $0x78] sm:$0xf0] }
 0x44d   : > { %2330 = vst.msk [vmem:[#allocation3 + $0x27c] sm:$0xf] %vm454_vm4, %v2310_v33  ;;  %3278 = vmatpush.bf16.msra.mxu2 %v5698_v30  ;;  %v5611_v33 = vld [vmem:[%s7490_s2 + $0x14] sm:$0xf0] }
 0x44e   : > { %v4842_v30 = vor.u32 %v5611_v33, %v4841_v58  ;;  %v5717_v58 = vld [vmem:[#allocation3 + $0x298] sm:$0xff] }
 0x44f   : > { %2077 = vrot.lane.b32.xlu2 %v7570_v14, %s5974_s28  ;;  %2914 = vmatmul.bf16.vlgmr.msrb.gmra.mxu3 %v4922_v0  ;;  %v5743_v0 = vld [vmem:[#allocation3 + $0x348] sm:$0xff]  ;;  %v5769_v33 = vld [vmem:[#allocation3 + $0x3f8] sm:$0xff] }
 0x450   : > { %2121 = vrot.lane.b32.xlu1 %v7572_v7, %s5973_s27 }
 0x451   : > { %3279 = vmatpush.bf16.msra.mxu2 %v5697_v49  ;;  %v2256_v61 = vpop.permute.xlu2 %2255  ;;  %v5705_v46 = vld [vmem:[#allocation3 + $0x268] sm:$0xff] }
 0x452   : > { %2125 = vrot.lane.b32.xlu0 %v7571_v40, %s5973_s27  ;;  %2279 = vst.msk [vmem:[#allocation3 + $0x260] sm:$0xf] %vm454_vm4, %v2256_v61 }
 0x453   : > { %v2160_v45 = vpop.permute.xlu1 %2159  ;;  %v2304_v38 = vpop.permute.xlu0 %2303 }
 0x454   : > { %2183 = vst.msk [vmem:[#allocation3 + $0x240] sm:$0xf] %vm454_vm4, %v2160_v45  ;;  %v5707_v52 = vld [vmem:[#allocation3 + $0x278] sm:$0xff] }
 0x455   : > { %2327 = vst.msk [vmem:[#allocation3 + $0x270] sm:$0xf] %vm454_vm4, %v2304_v38  ;;  %3296 = vmatpush.bf16.msra.mxu3 %v5707_v52  ;;  %v7583_v45 = vld [vmem:[#allocation11_spill] sm:$0xff] }
 0x456   : > { %2709 = vmatmul.bf16.gmra.mxu0 %v4842_v30 }
 0x457   : > { %2071 = vrot.lane.b32.xlu2 %v7573_v8, %s5974_s28  ;;  %v5650_v8 = vld [vmem:[%s7490_s2 + $0x54] sm:$0xf] }
 0x458   : > { %2075 = vrot.lane.b32.xlu1 %v6652_v35, %s5974_s28  ;;  %v7575_v35 = vld [vmem:[#allocation30_spill] sm:$0xff] }
 0x459   : > { %v2018_v62 = vpop.permute.xlu2 %2017 }
 0x45a   : > { %2119 = vrot.lane.b32.xlu0 %v7574_v27, %s5973_s27  ;;  %2040 = vst.msk [vmem:[#allocation3 + $0x214] sm:$0xf] %vm454_vm4, %v2018_v62  ;;  %v7584_v27 = vld [vmem:[#allocation15_spill] sm:$0xff] }
 0x45b   : > { %v2066_v39 = vpop.permute.xlu0 %2065 }
 0x45c   : > { %v5706_v55 = vld [vmem:[#allocation3 + $0x270] sm:$0xff]  ;;  %2088 = vst.msk [vmem:[#allocation3 + $0x224] sm:$0xf] %vm454_vm4, %v2066_v39 }
 0x45d   : > { %3297 = vmatpush.bf16.msra.mxu3 %v5706_v55 }
 0x45f   : > { %1833 = vrot.lane.b32.xlu2 %v7575_v35, %s5972_s26  ;;  %v5689_v35 = vld [vmem:[%s7490_s2 + $0x84] sm:$0xf0] }
 0x460   : > { %1837 = vrot.lane.b32.xlu1 %v7577_v56, %s5972_s26  ;;  %v5001_v56 = vld [vmem:[%s7490_s2 + $0x60] sm:$0xf] }
 0x461   : > { %3298 = vmatpush.bf16.msra.mxu3 %v5705_v46  ;;  %v1972_v3 = vpop.permute.xlu2 %1971  ;;  %v5694_v53 = vld [vmem:[#allocation3 + $0x210] sm:$0xff]  ;;  %v5085_v46 = vld [vmem:[%s7490_s2 + $0x80] sm:$0xf] }
 0x462   : > { %1881 = vrot.lane.b32.xlu0 %v7576_v4, %s5971_s25  ;;  %1993 = vst.msk [vmem:[#allocation3 + $0x208] sm:$0xf] %vm454_vm4, %v1972_v3  ;;  %v5086_v4 = vor.u32 %v5689_v35, %v5085_v46  ;;  %v5714_v35 = vld [vmem:[#allocation3 + $0x280] sm:$0xff] }
 0x463   : > { %v2020_v31 = vpop.permute.xlu0 %2019  ;;  %v5696_v21 = vld [vmem:[#allocation3 + $0x220] sm:$0xff] }
 0x464   : > { %2041 = vst.msk [vmem:[#allocation3 + $0x218] sm:$0xf] %vm454_vm4, %v2020_v31  ;;  %3280 = vmatpush.bf16.msra.mxu2 %v5696_v21  ;;  %v5669_v31 = vld [vmem:[%s7490_s2 + $0x64] sm:$0xf0]  ;;  %v5748_v21 = vld [vmem:[#allocation3 + $0x370] sm:$0xff] }
 0x465   : > { %v5002_v3 = vor.u32 %v5669_v31, %v5001_v56  ;;  %v7593_v56 = vld [vmem:[#allocation50_spill] sm:$0xff]  ;;  %v5781_v31 = vld [vmem:[#allocation3 + $0x438] sm:$0xff] }
 0x467   : > { %3090 = vmatmul.bf16.vlgmr.msra.gmra.mxu0 %v5002_v3 }
 0x468   : > { %1831 = vrot.lane.b32.xlu1 %v7579_v10, %s5972_s26 }
 0x469   : > { %v2210_v48 = vpop.permute.xlu2 %2209 }
 0x46a   : > { %1835 = vrot.lane.b32.xlu0 %v7578_v12, %s5972_s26  ;;  %2232 = vst.msk [vmem:[#allocation3 + $0x254] sm:$0xf] %vm454_vm4, %v2210_v48  ;;  %v7585_v12 = vld [vmem:[#allocation43_spill] sm:$0xff]  ;;  %v5747_v48 = vld [vmem:[#allocation3 + $0x368] sm:$0xff] }
 0x46b   : > { %v2258_v11 = vpop.permute.xlu0 %2257  ;;  %v5695_v23 = vld [vmem:[#allocation3 + $0x218] sm:$0xff] }
 0x46c   : > { %2280 = vst.msk [vmem:[#allocation3 + $0x264] sm:$0xf] %vm454_vm4, %v2258_v11  ;;  %3281 = vmatpush.bf16.msra.mxu2 %v5695_v23  ;;  %v7586_v23 = vld [vmem:[#allocation34_spill] sm:$0xff] }
 0x470   : > { %3282 = vmatpush.bf16.msra.mxu2 %v5694_v53  ;;  %2029 = vrot.lane.b32.xlu1 %v7581_v9, %s5977_s7  ;;  %v5087_v53 = vld [vmem:[%s7490_s2 + $0x88] sm:$0xf0]  ;;  %v5009_v9 = vld [vmem:[%s7490_s2 + $0x70] sm:$0xf] }
 0x471   : > { %v2164_v59 = vpop.permute.xlu2 %2163  ;;  %v5702_v13 = vld [vmem:[#allocation3 + $0x250] sm:$0xff] }
 0x472   : > { %2073 = vrot.lane.b32.xlu0 %v7580_v47, %s5974_s28  ;;  %2185 = vst.msk [vmem:[#allocation3 + $0x248] sm:$0xf] %vm454_vm4, %v2164_v59  ;;  %v5090_v47 = vor.u32 %v5688_v5, %v5087_v53  ;;  %v5670_v59 = vld [vmem:[%s7490_s2 + $0x74] sm:$0xf]  ;;  %v5763_v5 = vld [vmem:[#allocation3 + $0x3c8] sm:$0xff]  ;;  %v5778_v53 = vld [vmem:[#allocation3 + $0x420] sm:$0xff] }
 0x473   : > { %v2212_v25 = vpop.permute.xlu0 %2211  ;;  %v5704_v34 = vld [vmem:[#allocation3 + $0x260] sm:$0xff] }
 0x474   : > { %2233 = vst.msk [vmem:[#allocation3 + $0x258] sm:$0xf] %vm454_vm4, %v2212_v25  ;;  %3299 = vmatpush.bf16.msra.mxu3 %v5704_v34  ;;  %v5671_v25 = vld [vmem:[%s7490_s2 + $0x74] sm:$0xf0]  ;;  %v5744_v34 = vld [vmem:[#allocation3 + $0x350] sm:$0xff] }
 0x475   : > { %v5010_v41 = vor.u32 %v5671_v25, %v5009_v9  ;;  %v5724_v9 = vld [vmem:[#allocation3 + $0x2d0] sm:$0xff]  ;;  %v5762_v25 = vld [vmem:[#allocation3 + $0x3c0] sm:$0xff] }
 0x477   : > { %3095 = vmatmul.bf16.gmra.mxu0 %v5010_v41  ;;  %v5723_v41 = vld [vmem:[#allocation3 + $0x2c8] sm:$0xff] }
 0x478   : > { %2023 = vrot.lane.b32.xlu1 %v7582_v60, %s5977_s7  ;;  %v5719_v60 = vld [vmem:[#allocation3 + $0x2a8] sm:$0xff] }
 0x479   : > { %v2162_v63 = vpop.permute.xlu2 %2161 }
 0x47a   : > { %2027 = vrot.lane.b32.xlu0 %v6650_v6, %s5977_s7  ;;  %2184 = vst.msk [vmem:[#allocation3 + $0x244] sm:$0xf] %vm454_vm4, %v2162_v63  ;;  %v4926_v6 = vor.u32 %v5651_v24, %v4925_v29  ;;  %v5718_v29 = vld [vmem:[#allocation3 + $0x2a0] sm:$0xff]  ;;  %v7589_v24 = vld [vmem:[#allocation51_spill] sm:$0xff] }
 0x47b   : > { %v1974_v18 = vpop.permute.xlu0 %1973  ;;  %v5703_v50 = vld [vmem:[#allocation3 + $0x258] sm:$0xff] }
 0x47c   : > { %1994 = vst.msk [vmem:[#allocation3 + $0x20c] sm:$0xf] %vm454_vm4, %v1974_v18  ;;  %3300 = vmatpush.bf16.msra.mxu3 %v5703_v50  ;;  %2900 = vmatmul.bf16.gmra.mxu2 %v4926_v6  ;;  %v5014_v18 = vor.u32 %v5670_v59, %v5011_v36  ;;  %v5742_v6 = vld [vmem:[#allocation3 + $0x340] sm:$0xff]  ;;  %v5777_v59 = vld [vmem:[#allocation3 + $0x418] sm:$0xff]  ;;  %v5776_v36 = vld [vmem:[#allocation3 + $0x410] sm:$0xff] }
 0x47e   : > { %3114 = vmatmul.bf16.gmra.mxu1 %v5014_v18 }
 0x480   : > { %3301 = vmatpush.bf16.msra.mxu3 %v5702_v13  ;;  %2315 = vrot.lane.b32.xlu1 %v6664_v26, %s5975_s29  ;;  %v4927_v26 = vld [vmem:[%s7490_s2 + $0x58] sm:$0xf0] }
 0x481   : > { %v5913_v14 = vpop.permute.xlu2 %5912  ;;  %v4930_v42 = vor.u32 %v5650_v8, %v4927_v26  ;;  %v5700_v22 = vld [vmem:[#allocation3 + $0x240] sm:$0xff]  ;;  %v5715_v26 = vld [vmem:[#allocation3 + $0x288] sm:$0xff] }
 0x482   : > { %1789 = vrot.lane.b32.xlu0 %v7583_v45, %s5969_s20  ;;  %v5915_v7 = vunpack.i.h.bf16 %v5913_v14  ;;  %v5914_v38 = vunpack.i.l.bf16 %v5913_v14  ;;  %v5768_v14 = vld [vmem:[#allocation3 + $0x3f0] sm:$0xff] }
 0x483   : > { %v1968_v49 = vpop.permute.xlu0 %1967  ;;  %v5693_v40 = vld [vmem:[#allocation3 + $0x208] sm:$0xff]  ;;  %2919 = vmatmul.bf16.gmra.mxu3 %v4930_v42  ;;  %v5728_v42 = vld [vmem:[#allocation3 + $0x2f0] sm:$0xff] }
 0x484   : > { %1991 = vst.msk [vmem:[#allocation3 + $0x200] sm:$0xf] %vm454_vm4, %v1968_v49  ;;  %3283 = vmatpush.bf16.msra.mxu2 %v5693_v40  ;;  %v4464_v61 = vmax.f32 %v6928_v1, %v5915_v7  ;;  %v4463_v52 = vmax.f32 %v6926_v32, %v5914_v38  ;;  %v5716_v49 = vld [vmem:[#allocation3 + $0x290] sm:$0xff]  ;;  %v7591_v40 = vld [vmem:[#allocation33_spill] sm:$0xff]  ;;  %v5179_v7 = vld [vmem:[%s7490_s2 + $0x20] sm:$0xf] }
 0x485   : > { %v5731_v38 = vld [vmem:[%s7490_s2 + $0x24] sm:$0xf0] }
 0x486   : > { %v5921_v44 = vpack.i.bf16 %v4464_v61, %v4463_v52  ;;  %v5729_v61 = vld [vmem:[#allocation3 + $0x2f8] sm:$0xff]  ;;  %v5708_v52 = vld [vmem:[%s7491_s3] sm:$0xff]  ;;  %v5180_v8 = vor.u32 %v5731_v38, %v5179_v7 }
 0x487   : > { %v7598_v7 = vld [vmem:[#allocation55_spill] sm:$0xff] }
 0x488   : > { %1981 = vrot.lane.b32.xlu1 %v7584_v27, %s5980_s11  ;;  %5922 = vrot.lane.b32.xlu2 %v5921_v44, %s5978_s8  ;;  %v5767_v27 = vld [vmem:[#allocation3 + $0x3e8] sm:$0xff] }
 0x489   : > { %v1934_v62 = vpop.permute.xlu2 %1933 }
 0x48a   : > { %1950 = vst.msk [vmem:[#allocation3 + $0x47c] sm:$0xf] %vm454_vm4, %v1934_v62 }
 0x48b   : > { %v2166_v39 = vpop.permute.xlu0 %2165  ;;  %v5692_v55 = vld [vmem:[#allocation3 + $0x200] sm:$0xff] }
 0x48c   : > { %2186 = vst.msk [vmem:[#allocation3 + $0x24c] sm:$0xf] %vm454_vm4, %v2166_v39  ;;  %3284 = vmatpush.bf16.msra.mxu2 %v5692_v55  ;;  %v7592_v39 = vld [vmem:[#allocation47_spill] sm:$0xff] }
 0x48e   : > { %3671 = vmatmul.bf16.vlgmr.msrb.gmra.mxu1 %v5180_v8 }
 0x48f   : > { %3285 = vmatmul.bf16.vlgmr.msra.gmra.mxu2 %v5086_v4  ;;  %v5766_v4 = vld [vmem:[#allocation3 + $0x3e0] sm:$0xff] }
 0x490   : > { %3682 = vmatpush.bf16.msrb.mxu2 %v5749_v54  ;;  %1975 = vrot.lane.b32.xlu1 %v7585_v12, %s5980_s11  ;;  %v5727_v12 = vld [vmem:[#allocation3 + $0x2e8] sm:$0xff] }
 0x491   : > { %v2124_v10 = vpop.permute.xlu2 %2123  ;;  %2025 = vrot.lane.b32.xlu2 %v7586_v23, %s5977_s7  ;;  %s281_s7 = scalar_lea.vmem %s7494_s6, %s5606_s16 }
 0x492   : > { %2141 = vst.msk [vmem:[#allocation3 + $0x4b8] sm:$0xf] %vm454_vm4, %v2124_v10  ;;  %v5765_v10 = vld [vmem:[#allocation3 + $0x3d8] sm:$0xff] }
 0x493   : > { %v5701_v11 = vld [vmem:[#allocation3 + $0x248] sm:$0xff] }
 0x494   : > { %3683 = vmatpush.bf16.msrb.mxu2 %v5748_v21  ;;  %3302 = vmatpush.bf16.msra.mxu3 %v5701_v11  ;;  %v5780_v11 = vld [vmem:[#allocation3 + $0x430] sm:$0xff] }
 0x498   : > { %3684 = vmatpush.bf16.msrb.mxu2 %v5747_v48  ;;  %3303 = vmatpush.bf16.msra.mxu3 %v5700_v22 }
 0x499   : > { %2269 = vrot.lane.b32.xlu1 %v7587_v20, %s5976_s30  ;;  %v1886_v17 = vpop.permute.xlu2 %1885  ;;  %2317 = vrot.lane.b32.xlu2 %v7588_v16, %s5975_s29  ;;  %v5764_v20 = vld [vmem:[#allocation3 + $0x3d0] sm:$0xff] }
 0x49a   : > { %1902 = vst.msk [vmem:[#allocation3 + $0x46c] sm:$0xf] %vm454_vm4, %v1886_v17  ;;  %v7594_v17 = vld [vmem:[#allocation20_spill] sm:$0xff] }
 0x49b   : > { %3304 = vmatmul.bf16.vlgmr.msra.gmra.mxu3 %v5090_v47 }
 0x49c   : > { %3685 = vmatpush.bf16.msrb.mxu2 %v5746_v19  ;;  %3817 = vmatpush.bf16.msrb.mxu3 %v5721_v2  ;;  %v5726_v19 = vld [vmem:[#allocation3 + $0x2e0] sm:$0xff] }
 0x4a0   : > { %3686 = vmatpush.bf16.msrb.mxu2 %v5745_v51  ;;  %3818 = vmatpush.bf16.msrb.mxu3 %v5720_v57  ;;  %v5779_v51 = vld [vmem:[#allocation3 + $0x428] sm:$0xff]  ;;  %v5725_v57 = vld [vmem:[#allocation3 + $0x2d8] sm:$0xff] }
 0x4a1   : > { %2219 = vrot.lane.b32.xlu1 %v6659_v37, %s5979_s9  ;;  %v1880_v63 = vpop.permute.xlu2 %1879  ;;  %2311 = vrot.lane.b32.xlu2 %v7589_v24, %s5975_s29  ;;  %v7590_v37 = vld [vmem:[#allocation38_spill] sm:$0xff]  ;;  %v7597_v24 = vld [vmem:[#allocation49_spill] sm:$0xff] }
 0x4a2   : > { %1899 = vst.msk [vmem:[#allocation3 + $0x460] sm:$0xf] %vm454_vm4, %v1880_v63  ;;  %v3394_v50 = vpop.permute.xlu1 %3393  ;;  %v5722_v63 = vld [vmem:[#allocation3 + $0x2c0] sm:$0xff] }
 0x4a4   : > { %3687 = vmatpush.bf16.msrb.mxu2 %v5744_v34  ;;  %3819 = vmatpush.bf16.msrb.mxu3 %v5719_v60  ;;  %v7595_v34 = vld [vmem:[#allocation54_spill] sm:$0xff] }
 0x4a8   : > { %3688 = vmatpush.bf16.msrb.mxu2 %v5743_v0  ;;  %3820 = vmatpush.bf16.msrb.mxu3 %v5718_v29  ;;  %v5775_v29 = vld [vmem:[#allocation3 + $0x408] sm:$0xff] }
 0x4a9   : > { %2217 = vrot.lane.b32.xlu1 %v7590_v37, %s5979_s9  ;;  %v2078_v13 = vpop.permute.xlu2 %2077  ;;  %1977 = vrot.lane.b32.xlu2 %v7591_v40, %s5980_s11  ;;  %v5774_v37 = vld [vmem:[#allocation3 + $0x400] sm:$0xff]  ;;  %v5709_v40 = vld [vmem:[%s7491_s3 + $0x8] sm:$0xff] }
 0x4aa   : > { %2094 = vst.msk [vmem:[#allocation3 + $0x4ac] sm:$0xf] %vm454_vm4, %v2078_v13  ;;  %v1932_v45 = vpop.permute.xlu1 %1931 }
 0x4ab   : > { %1949 = vst.msk [vmem:[#allocation3 + $0x478] sm:$0xf] %vm454_vm4, %v1932_v45 }
 0x4ac   : > { %3689 = vmatpush.bf16.msrb.mxu2 %v5742_v6  ;;  %3821 = vmatpush.bf16.msrb.mxu3 %v5717_v58  ;;  %v3396_v30 = vpop.permute.xlu0 %3395  ;;  %v5093_v58 = vld [vmem:[%s7490_s2 + $0x90] sm:$0xf] }
 0x4ad   : > { %3412 = vmatpush.bf16.msrb.mxu0 %v3396_v30 }
 0x4b0   : > { %4026 = vmatpush.bf16.msra.mxu2 %v5769_v33  ;;  %3822 = vmatpush.bf16.msrb.mxu3 %v5716_v49  ;;  %v5691_v33 = vld [vmem:[%s7490_s2 + $0x94] sm:$0xf0] }
 0x4b1   : > { %3413 = vmatpush.bf16.msrb.mxu0 %v3394_v50  ;;  %2167 = vrot.lane.b32.xlu1 %v7592_v39, %s5981_s12  ;;  %v2072_v62 = vpop.permute.xlu2 %2071  ;;  %v5094_v13 = vor.u32 %v5691_v33, %v5093_v58  ;;  %v5181_v39 = vld [vmem:[%s7490_s2 + $0x28] sm:$0xf0] }
 0x4b2   : > { %2091 = vst.msk [vmem:[#allocation3 + $0x4a0] sm:$0xf] %vm454_vm4, %v2072_v62  ;;  %v1930_v54 = vpop.permute.xlu1 %1929  ;;  %2263 = vrot.lane.b32.xlu2 %v7593_v56, %s5976_s30  ;;  %v5789_v0 = vld [vmem:[#allocation3 + $0x478] sm:$0xff]  ;;  %v5690_v56 = vld [vmem:[%s7490_s2 + $0x94] sm:$0xf]  ;;  %v7249_v58 = vpop.f32.mrf.mxu3 }
 0x4b3   : > { %1948 = vst.msk [vmem:[#allocation3 + $0x474] sm:$0xf] %vm454_vm4, %v1930_v54  ;;  %3290 = vmatmul.bf16.gmra.mxu2 %v5094_v13  ;;  %v5261_v54 = vld [vmem:[%s7490_s2 + $0x8] sm:$0xf0] }
 0x4b4   : > { %4027 = vmatpush.bf16.msra.mxu2 %v5768_v14  ;;  %3823 = vmatpush.bf16.msrb.mxu3 %v5715_v26  ;;  %v5918_v55 = vpop.permute.xlu0 %5917  ;;  %v7599_v26 = vld [vmem:[#allocation39_spill] sm:$0xff] }
 0x4b5   : > { %3836 = vmatpush.bf16.msra.mxu0 %v5729_v61  ;;  %v5920_v44 = vunpack.i.h.bf16 %v5918_v55  ;;  %v5919_v46 = vunpack.i.l.bf16 %v5918_v55  ;;  %v5710_v55 = vld [vmem:[%s7490_s2 + $0x4] sm:$0xf] }
 0x4b6   : > { %5171 = vmatmul.msk.bf16.vlgmr.msrb.gmra.mxu0 %vm3399_vm7, %v5708_v52 }
 0x4b7   : > { %v4462_v3 = vmax.f32 %v6963_v28, %v5920_v44  ;;  %v4461_v21 = vmax.f32 %v6961_v15, %v5919_v46 }
 0x4b8   : > { %4028 = vmatpush.bf16.msra.mxu2 %v5767_v27  ;;  %3824 = vmatpush.bf16.msrb.mxu3 %v5714_v35  ;;  %v5730_v27 = vld [vmem:[%s7490_s2 + $0x24] sm:$0xf]  ;;  %v5264_v35 = vor.u32 %v5710_v55, %v5261_v54  ;;  %v5343_v54 = vld [vmem:[%s7490_s2 + $0x40] sm:$0xf] }
 0x4b9   : > { %3837 = vmatpush.bf16.msra.mxu0 %v5728_v42  ;;  %v1834_v48 = vpop.permute.xlu2 %1833  ;;  %v5926_v2 = vpack.i.bf16 %v4462_v3, %v4461_v21  ;;  %v5184_v62 = vor.u32 %v5730_v27, %v5181_v39 }
 0x4ba   : > { %1852 = vst.msk [vmem:[#allocation3 + $0x454] sm:$0xf] %vm454_vm4, %v1834_v48  ;;  %v1884_v22 = vpop.permute.xlu1 %1883  ;;  %2221 = vrot.lane.b32.xlu2 %v7594_v17, %s5979_s9 }
 0x4bb   : > { %1901 = vst.msk [vmem:[#allocation3 + $0x468] sm:$0xf] %vm454_vm4, %v1884_v22  ;;  %5927 = vrot.lane.b32.xlu0 %v5926_v2, %s5978_s8 }
 0x4bc   : > { %4029 = vmatpush.bf16.msra.mxu2 %v5766_v4  ;;  %4201 = vmatpush.bf16.msra.mxu3 %v5781_v31  ;;  %v1928_v23 = vpop.permute.xlu0 %1927  ;;  %v7600_v4 = vld [vmem:[#allocation48_spill] sm:$0xff]  ;;  %v5095_v31 = vld [vmem:[%s7490_s2 + $0x98] sm:$0xf0] }
 0x4bd   : > { %3838 = vmatpush.bf16.msra.mxu0 %v5727_v12  ;;  %1947 = vst.msk [vmem:[#allocation3 + $0x470] sm:$0xf] %vm454_vm4, %v1928_v23  ;;  %v5098_v12 = vor.u32 %v5690_v56, %v5095_v31  ;;  %v5750_v56 = vld [vmem:[%s7490_s2 + $0x44] sm:$0xf]  ;;  %v5345_v31 = vld [vmem:[%s7490_s2 + $0x48] sm:$0xf0] }
 0x4bf   : > { %3309 = vmatmul.bf16.gmra.mxu3 %v5098_v12  ;;  %v5427_v12 = vld [vmem:[%s7490_s2 + $0x60] sm:$0xf] }
 0x4c0   : > { %4030 = vmatpush.bf16.msra.mxu2 %v5765_v10  ;;  %4202 = vmatpush.bf16.msra.mxu3 %v5780_v11 }
 0x4c1   : > { %3839 = vmatpush.bf16.msra.mxu0 %v5726_v19 }
 0x4c2   : > { %v2122_v47 = vpop.permute.xlu1 %2121  ;;  %2171 = vrot.lane.b32.xlu2 %v6656_v43, %s5981_s12  ;;  %v7596_v43 = vld [vmem:[#allocation37_spill] sm:$0xff] }
 0x4c3   : > { %2140 = vst.msk [vmem:[#allocation3 + $0x4b4] sm:$0xf] %vm454_vm4, %v2122_v47  ;;  %1979 = vrot.lane.b32.xlu0 %v7595_v34, %s5980_s11  ;;  %v5787_v14 = vld [vmem:[#allocation3 + $0x468] sm:$0xff]  ;;  %3690 = vmatmul.bf16.vlgmr.msrb.gmra.mxu2 %v5184_v62 }
 0x4c4   : > { %4031 = vmatpush.bf16.msra.mxu2 %v5764_v20  ;;  %4203 = vmatpush.bf16.msra.mxu3 %v5779_v51  ;;  %v2126_v16 = vpop.permute.xlu0 %2125  ;;  %v5788_v6 = vld [vmem:[#allocation3 + $0x470] sm:$0xff]  ;;  %v7601_v20 = vld [vmem:[#allocation19_spill] sm:$0xff] }
 0x4c5   : > { %3840 = vmatpush.bf16.msra.mxu0 %v5725_v57  ;;  %2142 = vst.msk [vmem:[#allocation3 + $0x4bc] sm:$0xf] %vm454_vm4, %v2126_v16 }
 0x4c6   : > { %5172 = vmatmul.msk.bf16.gmra.mxu0 %vm3399_vm7, %v5709_v40  ;;  %v5267_v40 = vld [vmem:[%s7490_s2 + $0x10] sm:$0xf] }
 0x4c8   : > { %4032 = vmatpush.bf16.msra.mxu2 %v5763_v5  ;;  %4204 = vmatpush.bf16.msra.mxu3 %v5778_v53 }
 0x4c9   : > { %3841 = vmatpush.bf16.msra.mxu0 %v5724_v9 }
 0x4ca   : > { %v2076_v18 = vpop.permute.xlu1 %2075  ;;  %2169 = vrot.lane.b32.xlu2 %v7596_v43, %s5981_s12 }
 0x4cb   : > { %2093 = vst.msk [vmem:[#allocation3 + $0x4a8] sm:$0xf] %vm454_vm4, %v2076_v18  ;;  %2313 = vrot.lane.b32.xlu0 %v7597_v24, %s5975_s29  ;;  %v5259_v18 = vld [vmem:[%s7490_s2] sm:$0xf]  ;;  %v5733_v24 = vld [vmem:[%s7490_s2 + $0x34] sm:$0xf0] }
 0x4cc   : > { %4033 = vmatpush.bf16.msra.mxu2 %v5762_v25  ;;  %4205 = vmatpush.bf16.msra.mxu3 %v5777_v59  ;;  %v2120_v60 = vpop.permute.xlu0 %2119  ;;  %v5801_v50 = vld [vmem:[#allocation3 + $0x4b8] sm:$0xff]  ;;  %v5782_v25 = vld [vmem:[#allocation3 + $0x440] sm:$0xff] }
 0x4cd   : > { %3842 = vmatpush.bf16.msra.mxu0 %v5723_v41  ;;  %2139 = vst.msk [vmem:[#allocation3 + $0x4b0] sm:$0xf] %vm454_vm4, %v2120_v60  ;;  %4395 = vmatpush.bf16.msrb.mxu1 %v5801_v50 }
 0x4d0   : > { %4206 = vmatpush.bf16.msra.mxu3 %v5776_v36 }
 0x4d1   : > { %3843 = vmatpush.bf16.msra.mxu0 %v5722_v63  ;;  %v5711_v63 = vld [vmem:[%s7490_s2 + $0x4] sm:$0xf0] }
 0x4d2   : > { %v1838_v45 = vpop.permute.xlu1 %1837  ;;  %v5799_v38 = vld [vmem:[#allocation3 + $0x4a8] sm:$0xff]  ;;  %v5260_v50 = vor.u32 %v5711_v63, %v5259_v18  ;;  %v5435_v18 = vld [vmem:[%s7490_s2 + $0x70] sm:$0xf]  ;;  %v5773_v63 = vld [vmem:[%s7490_s2 + $0x74] sm:$0xf0] }
 0x4d3   : > { %1854 = vst.msk [vmem:[#allocation3 + $0x45c] sm:$0xf] %vm454_vm4, %v1838_v45  ;;  %2267 = vrot.lane.b32.xlu0 %v7598_v7, %s5976_s30  ;;  %v5189_v45 = vld [vmem:[%s7490_s2 + $0x38] sm:$0xf0]  ;;  %v5713_v7 = vld [vmem:[%s7490_s2 + $0x14] sm:$0xf0] }
 0x4d4   : > { %4207 = vmatpush.bf16.msra.mxu3 %v5775_v29  ;;  %v1882_v30 = vpop.permute.xlu0 %1881  ;;  %v5800_v49 = vld [vmem:[#allocation3 + $0x4b0] sm:$0xff] }
 0x4d5   : > { %4220 = vmatpush.bf16.msrb.mxu0 %v5789_v0  ;;  %1900 = vst.msk [vmem:[#allocation3 + $0x464] sm:$0xf] %vm454_vm4, %v1882_v30  ;;  %4396 = vmatpush.bf16.msrb.mxu1 %v5800_v49  ;;  %v5187_v29 = vld [vmem:[%s7490_s2 + $0x30] sm:$0xf]  ;;  %v5732_v30 = vld [vmem:[%s7490_s2 + $0x34] sm:$0xf] }
 0x4d6   : > { %3844 = vmatmul.bf16.vlgmr.msra.gmra.mxu0 %v5264_v35  ;;  %3825 = vmatmul.bf16.vlgmr.msrb.gmra.mxu3 %v5260_v50  ;;  %v5188_v33 = vor.u32 %v5733_v24, %v5187_v29  ;;  %v5437_v29 = vld [vmem:[%s7490_s2 + $0x78] sm:$0xf0] }
 0x4d8   : > { %4208 = vmatpush.bf16.msra.mxu3 %v5774_v37  ;;  %v7251_v37 = vpop.f32.mrf.mxu0  ;;  %3676 = vmatmul.bf16.gmra.mxu1 %v5188_v33 }
 0x4d9   : > { %4221 = vmatpush.bf16.msrb.mxu0 %v5788_v6  ;;  %4397 = vmatpush.bf16.msrb.mxu1 %v5799_v38  ;;  %v7247_v6 = vpop.f32.mrf.mxu2  ;;  %v5268_v38 = vor.u32 %v5713_v7, %v5267_v40 }
 0x4da   : > { %v1832_v52 = vpop.permute.xlu1 %1831 }
 0x4db   : > { %1851 = vst.msk [vmem:[#allocation3 + $0x450] sm:$0xf] %vm454_vm4, %v1832_v52  ;;  %2265 = vrot.lane.b32.xlu0 %v7599_v26, %s5976_s30  ;;  %v5269_v52 = vld [vmem:[%s7490_s2 + $0x18] sm:$0xf0]  ;;  %v7275_v26 = vpop.f32.mrf.mxu3  ;;  %s276_s30 = scalar_lea.vmem %s7493_s5, %s5606_s16 }
 0x4dc   : > { %v1836_v61 = vpop.permute.xlu0 %1835  ;;  %v5786_v8 = vld [vmem:[#allocation3 + $0x460] sm:$0xff] }
 0x4dd   : > { %4222 = vmatpush.bf16.msrb.mxu0 %v5787_v14  ;;  %1853 = vst.msk [vmem:[#allocation3 + $0x458] sm:$0xf] %vm454_vm4, %v1836_v61  ;;  %v5192_v14 = vor.u32 %v5732_v30, %v5189_v45  ;;  %v5712_v61 = vld [vmem:[%s7490_s2 + $0x14] sm:$0xf] }
 0x4de   : > { %v5272_v27 = vor.u32 %v5712_v61, %v5269_v52 }
 0x4df   : > { %3695 = vmatmul.bf16.gmra.mxu2 %v5192_v14  ;;  %v5791_v14 = vld [vmem:[%s7490_s2 + $0x84] sm:$0xf0] }
 0x4e0   : > { %v7277_v39 = vpop.f32.mrf.mxu0 }
 0x4e1   : > { %4223 = vmatpush.bf16.msrb.mxu0 %v5786_v8  ;;  %v7273_v8 = vpop.f32.mrf.mxu2 }
 0x4e2   : > { %v2030_v44 = vpop.permute.xlu1 %2029  ;;  %v5923_v3 = vpop.permute.xlu2 %5922  ;;  %v5784_v21 = vld [vmem:[#allocation3 + $0x450] sm:$0xff] }
 0x4e3   : > { %2046 = vst.msk [vmem:[#allocation3 + $0x49c] sm:$0xf] %vm454_vm4, %v2030_v44  ;;  %2215 = vrot.lane.b32.xlu0 %v7600_v4, %s5979_s9  ;;  %v5925_v10 = vunpack.i.h.bf16 %v5923_v3  ;;  %v5924_v11 = vunpack.i.l.bf16 %v5923_v3  ;;  %v5348_v3 = vor.u32 %v5750_v56, %v5345_v31 }
 0x4e4   : > { %v2074_v42 = vpop.permute.xlu0 %2073  ;;  %v5785_v46 = vld [vmem:[#allocation3 + $0x458] sm:$0xff] }
 0x4e5   : > { %2092 = vst.msk [vmem:[#allocation3 + $0x4a4] sm:$0xf] %vm454_vm4, %v2074_v42  ;;  %4224 = vmatpush.bf16.msrb.mxu0 %v5785_v46  ;;  %v4492_v19 = vmax.f32 %v6928_v1, %v5925_v10  ;;  %v4491_v2 = vmax.f32 %v6926_v32, %v5924_v11  ;;  %v5751_v42 = vld [vmem:[%s7490_s2 + $0x44] sm:$0xf0]  ;;  %v7289_v46 = vpop.f32.mrf.mxu3 }
 0x4e6   : > { %3830 = vmatmul.bf16.gmra.mxu3 %v5268_v38  ;;  %3849 = vmatmul.bf16.gmra.mxu0 %v5272_v27  ;;  %v5344_v35 = vor.u32 %v5751_v42, %v5343_v54  ;;  %v5771_v10 = vld [vmem:[%s7490_s2 + $0x64] sm:$0xf0] }
 0x4e7   : > { %v4494_v51 = vpack.c.bf16 %v4492_v19, %v4491_v2  ;;  %v5429_v19 = vld [vmem:[%s7490_s2 + $0x68] sm:$0xf0] }
 0x4e8   : > { %v7291_v4 = vpop.f32.mrf.mxu0  ;;  %4015 = vmatmul.bf16.vlgmr.msra.gmra.mxu1 %v5344_v35 }
 0x4e9   : > { %4225 = vmatpush.bf16.msrb.mxu0 %v5784_v21  ;;  %v7287_v44 = vpop.f32.mrf.mxu2 }
 0x4ea   : > { %v2024_v23 = vpop.permute.xlu1 %2023 }
 0x4eb   : > { %2043 = vst.msk [vmem:[#allocation3 + $0x490] sm:$0xf] %vm454_vm4, %v2024_v23  ;;  %2173 = vrot.lane.b32.xlu0 %v7601_v20, %s5981_s12  ;;  %v2026_v17 = vpop.permute.xlu2 %2025  ;;  %v5428_v23 = vor.u32 %v5771_v10, %v5427_v12  ;;  %v5793_v10 = vld [vmem:[%s7490_s2 + $0x94] sm:$0xf0]  ;;  %s7397_s12 = scalar_lea.vmem %s7492_s4, %s5605_s18 }
 0x4ec   : > { %v2028_v48 = vpop.permute.xlu0 %2027  ;;  %v5798_v22 = vld [vmem:[#allocation3 + $0x4a0] sm:$0xff]  ;;  %2044 = vst.msk [vmem:[#allocation3 + $0x494] sm:$0xf] %vm454_vm4, %v2026_v17 }
 0x4ed   : > { %2045 = vst.msk [vmem:[#allocation3 + $0x498] sm:$0xf] %vm454_vm4, %v2028_v48  ;;  %4398 = vmatpush.bf16.msrb.mxu1 %v5798_v22  ;;  %v5770_v22 = vld [vmem:[%s7490_s2 + $0x64] sm:$0xf]  ;;  %v7313_v20 = vpop.f32.mrf.mxu3 }
 0x4ee   : > { %v5432_v17 = vor.u32 %v5770_v22, %v5429_v19 }
 0x4ef   : > { %4034 = vmatmul.bf16.vlgmr.msra.gmra.mxu2 %v5348_v3 }
 0x4f1   : > { %v7311_v2 = vpop.f32.mrf.mxu2 }
 0x4f2   : > { %v2316_v5 = vpop.permute.xlu1 %2315 }
 0x4f3   : > { %2333 = vst.msk [vmem:[#allocation3 + $0x4f8] sm:$0xf] %vm454_vm4, %v2316_v5  ;;  %4513 = vrot.lane.b32.xlu0 %v4494_v51, %s5959_s10  ;;  %v2318_v1 = vpop.permute.xlu2 %2317  ;;  %v5796_v16 = vld [vmem:[#allocation3 + $0x490] sm:$0xff]  ;;  %v7315_v51 = vpop.f32.mrf.mxu0 }
 0x4f4   : > { %v1790_v57 = vpop.permute.xlu0 %1789  ;;  %v5797_v53 = vld [vmem:[#allocation3 + $0x498] sm:$0xff]  ;;  %2334 = vst.msk [vmem:[#allocation3 + $0x4fc] sm:$0xf] %vm454_vm4, %v2318_v1 }
 0x4f5   : > { %1806 = vst.msk [vmem:[#allocation3 + $0x44c] sm:$0xf] %vm454_vm4, %v1790_v57  ;;  %4399 = vmatpush.bf16.msrb.mxu1 %v5797_v53 }
 0x4f6   : > { %4209 = vmatmul.bf16.vlgmr.msra.gmra.mxu3 %v5428_v23 }
 0x4f9   : > { %4400 = vmatpush.bf16.msrb.mxu1 %v5796_v16  ;;  %v5351_v16 = vld [vmem:[%s7490_s2 + $0x50] sm:$0xf] }
 0x4fa   : > { %v1982_v32 = vpop.permute.xlu1 %1981 }
 0x4fb   : > { %1998 = vst.msk [vmem:[#allocation3 + $0x48c] sm:$0xf] %vm454_vm4, %v1982_v32  ;;  %v2312_v9 = vpop.permute.xlu2 %2311  ;;  %v5809_v59 = vld [vmem:[#allocation3 + $0x4f8] sm:$0xff] }
 0x4fc   : > { %v5783_v47 = vld [vmem:[#allocation3 + $0x448] sm:$0xff]  ;;  %2331 = vst.msk [vmem:[#allocation3 + $0x4f0] sm:$0xf] %vm454_vm4, %v2312_v9  ;;  %5830 = vmatpush.bf16.msrb.mxu2 %v5809_v59  ;;  %v5753_v32 = vld [vmem:[%s7490_s2 + $0x54] sm:$0xf0] }
 0x4fd   : > { %4226 = vmatpush.bf16.msrb.mxu0 %v5783_v47  ;;  %v2724_v47 = vpop.f32.mrf.mxu1  ;;  %v5352_v9 = vor.u32 %v5753_v32, %v5351_v16 }
 0x4ff   : > { %4020 = vmatmul.bf16.gmra.mxu1 %v5352_v9 }
 0x501   : > { %4227 = vmatpush.bf16.msrb.mxu0 %v5782_v25  ;;  %v7327_v25 = vpop.f32.mrf.mxu0 }
 0x502   : > { %v1976_v34 = vpop.permute.xlu1 %1975 }
 0x503   : > { %1995 = vst.msk [vmem:[#allocation3 + $0x480] sm:$0xf] %vm454_vm4, %v1976_v34  ;;  %v1978_v41 = vpop.permute.xlu2 %1977  ;;  %v5353_v34 = vld [vmem:[%s7490_s2 + $0x58] sm:$0xf0] }
 0x504   : > { %1996 = vst.msk [vmem:[#allocation3 + $0x484] sm:$0xf] %vm454_vm4, %v1978_v41  ;;  %4228 = vmatmul.bf16.vlgmr.msrb.gmra.mxu0 %v5432_v17 }
 0x505   : > { %4414 = vmatpush.bf16.msra.mxu0 %v5809_v59  ;;  %v5752_v59 = vld [vmem:[%s7490_s2 + $0x54] sm:$0xf]  ;;  %v2726_v50 = vpop.f32.mrf.mxu1 }
 0x506   : > { %v5356_v41 = vor.u32 %v5752_v59, %v5353_v34 }
 0x508   : > { %4039 = vmatmul.bf16.gmra.mxu2 %v5356_v41 }
 0x509   : > { %v7348_v30 = vpop.f32.mrf.mxu0 }
 0x50b   : > { %v2270_v36 = vpop.permute.xlu1 %2269  ;;  %v5794_v45 = vld [vmem:[#allocation3 + $0x480] sm:$0xff] }
 0x50c   : > { %2286 = vst.msk [vmem:[#allocation3 + $0x4ec] sm:$0xf] %vm454_vm4, %v2270_v36  ;;  %v2264_v60 = vpop.permute.xlu2 %2263 }
 0x50d   : > { %2283 = vst.msk [vmem:[#allocation3 + $0x4e0] sm:$0xf] %vm454_vm4, %v2264_v60  ;;  %v7357_v61 = vpop.f32.mrf.mxu1 }
 0x513   : > { %v2220_v0 = vpop.permute.xlu1 %2219 }
 0x514   : > { %2237 = vst.msk [vmem:[#allocation3 + $0x4d8] sm:$0xf] %vm454_vm4, %v2220_v0  ;;  %v2222_v43 = vpop.permute.xlu2 %2221  ;;  %v5436_v0 = vor.u32 %v5773_v63, %v5435_v18 }
 0x515   : > { %2238 = vst.msk [vmem:[#allocation3 + $0x4dc] sm:$0xf] %vm454_vm4, %v2222_v43  ;;  %v5772_v43 = vld [vmem:[%s7490_s2 + $0x74] sm:$0xf]  ;;  %v7369_v56 = vpop.f32.mrf.mxu1 }
 0x516   : > { %v5440_v33 = vor.u32 %v5772_v43, %v5437_v29  ;;  %4214 = vmatmul.bf16.gmra.mxu3 %v5436_v0 }
 0x518   : > { %4233 = vmatmul.bf16.gmra.mxu0 %v5440_v33 }
 0x51b   : > { %v2218_v13 = vpop.permute.xlu1 %2217 }
 0x51c   : > { %2236 = vst.msk [vmem:[#allocation3 + $0x4d4] sm:$0xf] %vm454_vm4, %v2218_v13  ;;  %v2172_v49 = vpop.permute.xlu2 %2171 }
 0x51d   : > { %2189 = vst.msk [vmem:[#allocation3 + $0x4c8] sm:$0xf] %vm454_vm4, %v2172_v49  ;;  %v5511_v49 = vld [vmem:[%s7490_s2 + $0x80] sm:$0xf] }
 0x51e   : > { %v5512_v38 = vor.u32 %v5791_v14, %v5511_v49  ;;  %v5790_v14 = vld [vmem:[%s7490_s2 + $0x84] sm:$0xf] }
 0x523   : > { %v2168_v62 = vpop.permute.xlu1 %2167 }
 0x524   : > { %2187 = vst.msk [vmem:[#allocation3 + $0x4c0] sm:$0xf] %vm454_vm4, %v2168_v62  ;;  %v2170_v55 = vpop.permute.xlu2 %2169  ;;  %v7363_v62 = vpop.f32.mrf.mxu0 }
 0x525   : > { %2188 = vst.msk [vmem:[#allocation3 + $0x4c4] sm:$0xf] %vm454_vm4, %v2170_v55  ;;  %v2571_v55 = vadd.f32 %v7249_v58, %v7247_v6  ;;  %v2573_v6 = vadd.f32 %v7275_v26, %v7273_v8  ;;  %v3110_v8 = vpop.f32.mrf.mxu1 }
 0x526   : > { %v3111_v17 = vadd.f32 %v3110_v8, %v7327_v25 }
 0x527   : > { %v2706_v54 = vadd.f32 %v7251_v37, %v2571_v55  ;;  %v5519_v37 = vld [vmem:[%s7490_s2 + $0x90] sm:$0xf] }
 0x528   : > { %v5520_v19 = vor.u32 %v5793_v10, %v5519_v37 }
 0x529   : > { %v2725_v58 = vadd.f32 %v2724_v47, %v2706_v54 }
 0x52d   : > { %v5928_v21 = vpop.permute.xlu0 %5927 }
 0x52e   : > { %v5930_v11 = vunpack.i.h.bf16 %v5928_v21  ;;  %v5929_v48 = vunpack.i.l.bf16 %v5928_v21  ;;  %v7375_v21 = vpop.f32.mrf.mxu0 }
 0x530   : > { %v4490_v57 = vmax.f32 %v6963_v28, %v5930_v11  ;;  %v4489_v5 = vmax.f32 %v6961_v15, %v5929_v48  ;;  %v2896_v28 = vpop.f32.mrf.mxu2  ;;  %v2915_v15 = vpop.f32.mrf.mxu3  ;;  %v2708_v11 = vadd.f32 %v7277_v39, %v2573_v6  ;;  %v5805_v39 = vld [vmem:[#allocation3 + $0x4d8] sm:$0xff] }
 0x531   : > { %v2916_v12 = vadd.f32 %v2915_v15, %v2896_v28 }
 0x532   : > { %v4493_v53 = vpack.c.bf16 %v4490_v57, %v4489_v5  ;;  %v2727_v16 = vadd.f32 %v2726_v50, %v2708_v11  ;;  %v2578_v50 = vadd.f32 %v7313_v20, %v7311_v2  ;;  %v5513_v2 = vld [vmem:[%s7490_s2 + $0x88] sm:$0xf0] }
 0x533   : > { %v2925_v23 = vadd.f32 %v2916_v12, %v2725_v58  ;;  %v5516_v12 = vor.u32 %v5790_v14, %v5513_v2 }
 0x534   : > { %4511 = vrot.lane.b32.xlu1 %v4493_v53, %s5959_s10  ;;  %v2713_v33 = vadd.f32 %v7315_v51, %v2578_v50  ;;  %v5792_v51 = vld [vmem:[%s7490_s2 + $0x94] sm:$0xf] }
 0x535   : > { %v1980_v1 = vpop.permute.xlu0 %1979  ;;  %v3120_v47 = vadd.f32 %v3111_v17, %v2925_v23 }
 0x536   : > { %1997 = vst.msk [vmem:[#allocation3 + $0x488] sm:$0xf] %vm454_vm4, %v1980_v1  ;;  %v3415_v5 = vpop.f32.mrf.mxu0  ;;  %v2576_v1 = vadd.f32 %v7289_v46, %v7287_v44  ;;  %v3112_v44 = vpop.f32.mrf.mxu1  ;;  %v2732_v55 = vadd.f32 %v7369_v56, %v2713_v33 }
 0x537   : > { %v3113_v41 = vadd.f32 %v3112_v44, %v7348_v30 }
 0x538   : > { %v2898_v24 = vpop.f32.mrf.mxu2  ;;  %v2917_v13 = vpop.f32.mrf.mxu3  ;;  %v2711_v9 = vadd.f32 %v7291_v4, %v2576_v1 }
 0x539   : > { %v2918_v32 = vadd.f32 %v2917_v13, %v2898_v24 }
 0x53a   : > { %v2730_v0 = vadd.f32 %v7357_v61, %v2711_v9 }
 0x53b   : > { %v2926_v25 = vadd.f32 %v2918_v32, %v2727_v16 }
 0x53d   : > { %v2314_v36 = vpop.permute.xlu0 %2313  ;;  %v5795_v60 = vld [vmem:[#allocation3 + $0x488] sm:$0xff]  ;;  %v3121_v29 = vadd.f32 %v3113_v41, %v2926_v25  ;;  %v5810_v25 = vld [vmem:[%s7491_s3] sm:$0xff] }
 0x53e   : > { %2332 = vst.msk [vmem:[#allocation3 + $0x4f4] sm:$0xf] %vm454_vm4, %v2314_v36  ;;  %4401 = vmatpush.bf16.msrb.mxu1 %v5795_v60  ;;  %v3417_v60 = vpop.f32.mrf.mxu0  ;;  %v3115_v20 = vpop.f32.mrf.mxu1 }
 0x53f   : > { %v3116_v61 = vadd.f32 %v3115_v20, %v7363_v62 }
 0x540   : > { %v7359_v52 = vpop.f32.mrf.mxu2  ;;  %v7361_v27 = vpop.f32.mrf.mxu3 }
 0x541   : > { %v2921_v43 = vadd.f32 %v7361_v27, %v7359_v52  ;;  %v5802_v27 = vld [vmem:[#allocation3 + $0x4c0] sm:$0xff] }
 0x542   : > { %4402 = vmatpush.bf16.msrb.mxu1 %v5794_v45 }
 0x543   : > { %v2927_v13 = vadd.f32 %v2921_v43, %v2730_v0 }
 0x545   : > { %v2268_v40 = vpop.permute.xlu0 %2267  ;;  %v5808_v7 = vld [vmem:[#allocation3 + $0x4f0] sm:$0xff]  ;;  %4403 = vmatmul.bf16.vlgmr.msrb.gmra.mxu1 %v5512_v38 }
 0x546   : > { %2285 = vst.msk [vmem:[#allocation3 + $0x4e8] sm:$0xf] %vm454_vm4, %v2268_v40  ;;  %4415 = vmatpush.bf16.msra.mxu0 %v5808_v7  ;;  %5831 = vmatpush.bf16.msrb.mxu2 %v5808_v7  ;;  %v5521_v7 = vld [vmem:[%s7490_s2 + $0x98] sm:$0xf0]  ;;  %v3420_v6 = vpop.f32.mrf.mxu0 }
 0x547   : > { %v5524_v37 = vor.u32 %v5792_v51, %v5521_v7 }
 0x548   : > { %v7371_v31 = vpop.f32.mrf.mxu2  ;;  %v7373_v3 = vpop.f32.mrf.mxu3 }
 0x549   : > { %v2923_v54 = vadd.f32 %v7373_v3, %v7371_v31  ;;  %v3117_v31 = vpop.f32.mrf.mxu1 }
 0x54a   : > { %v3118_v3 = vadd.f32 %v3117_v31, %v7375_v21 }
 0x54b   : > { %v2928_v11 = vadd.f32 %v2923_v54, %v2732_v55 }
 0x54d   : > { %v2266_v42 = vpop.permute.xlu0 %2265  ;;  %v5807_v35 = vld [vmem:[#allocation3 + $0x4e8] sm:$0xff] }
 0x54e   : > { %2284 = vst.msk [vmem:[#allocation3 + $0x4e4] sm:$0xf] %vm454_vm4, %v2266_v42  ;;  %4416 = vmatpush.bf16.msra.mxu0 %v5807_v35  ;;  %5832 = vmatpush.bf16.msrb.mxu2 %v5807_v35  ;;  %v3122_v42 = vadd.f32 %v3116_v61, %v2927_v13  ;;  %v3422_v17 = vpop.f32.mrf.mxu0 }
 0x550   : > { %v3286_v26 = vpop.f32.mrf.mxu2  ;;  %v3305_v57 = vpop.f32.mrf.mxu3 }
 0x551   : > { %v3306_v53 = vadd.f32 %v3305_v57, %v3286_v26 }
 0x553   : > { %v3315_v28 = vadd.f32 %v3306_v53, %v3120_v47 }
 0x555   : > { %v2216_v48 = vpop.permute.xlu0 %2215  ;;  %v5806_v22 = vld [vmem:[#allocation3 + $0x4e0] sm:$0xff]  ;;  %4408 = vmatmul.bf16.gmra.mxu1 %v5520_v19  ;;  %v7392_v34 = vadd.f32 %v3415_v5, %v3315_v28  ;;  %v3123_v19 = vadd.f32 %v3118_v3, %v2928_v11 }
 0x556   : > { %2235 = vst.msk [vmem:[#allocation3 + $0x4d0] sm:$0xf] %vm454_vm4, %v2216_v48  ;;  %4417 = vmatpush.bf16.msra.mxu0 %v5806_v22  ;;  %5833 = vmatpush.bf16.msrb.mxu2 %v5806_v22 }
 0x557   : > { %v3466_v4 = vpack.c.bf16 %v7392_v34, %v7392_v34  ;;  %v3430_v18 = vsel %vm3429_vm8, %v7392_v34, 0.0  ;;  %v3446_v21 = vmul.f32 %v7392_v34, %v7392_v34  ;;  %v3672_v34 = vpop.f32.mrf.mxu1 }
 0x558   : > { %v3288_v46 = vpop.f32.mrf.mxu2  ;;  %v3307_v36 = vpop.f32.mrf.mxu3  ;;  %3431 = vadd.xlane.f32.xlu2 %v3430_v18 }
 0x559   : > { %v3308_v63 = vadd.f32 %v3307_v36, %v3288_v46  ;;  %3470 = vst.msk [vmem:[%s7397_s12] sm:$0xf] %vm454_vm4, %v3466_v4  ;;  %v3845_v4 = vpop.f32.mrf.mxu0 }
 0x55a   : > { %4418 = vmatpush.bf16.msra.mxu0 %v5805_v39  ;;  %5834 = vmatpush.bf16.msrb.mxu2 %v5805_v39  ;;  %v3450_v39 = vsel %vm3429_vm8, %v3446_v21, 0.0 }
 0x55b   : > { %v3316_v24 = vadd.f32 %v3308_v63, %v3121_v29 }
 0x55d   : > { %v2174_v15 = vpop.permute.xlu0 %2173  ;;  %v5804_v59 = vld [vmem:[#allocation3 + $0x4d0] sm:$0xff]  ;;  %v3426_v45 = vadd.f32 %v3417_v60, %v3316_v24 }
 0x55e   : > { %2190 = vst.msk [vmem:[#allocation3 + $0x4cc] sm:$0xf] %vm454_vm4, %v2174_v15  ;;  %4419 = vmatpush.bf16.msra.mxu0 %v5804_v59  ;;  %5835 = vmatpush.bf16.msrb.mxu2 %v5804_v59  ;;  %v5811_v59 = vld [vmem:[%s7491_s3 + $0x8] sm:$0xff] }
 0x55f   : > { %v3467_v38 = vpack.c.bf16 %v3426_v45, %v3426_v45  ;;  %v3433_v52 = vsel %vm3429_vm8, %v3426_v45, 0.0  ;;  %v3447_v58 = vmul.f32 %v3426_v45, %v3426_v45  ;;  %v3674_v44 = vpop.f32.mrf.mxu1 }
 0x560   : > { %v3291_v40 = vpop.f32.mrf.mxu2  ;;  %3434 = vadd.xlane.f32.xlu0 %v3433_v52  ;;  %v3310_v35 = vpop.f32.mrf.mxu3 }
 0x561   : > { %3471 = vst.msk [vmem:[%s7397_s12 + $0x4] sm:$0xf] %vm454_vm4, %v3467_v38  ;;  %v3311_v10 = vadd.f32 %v3310_v35, %v3291_v40  ;;  %v3453_v48 = vsel %vm3429_vm8, %v3447_v58, 0.0  ;;  %v3847_v60 = vpop.f32.mrf.mxu0 }
 0x563   : > { %v3317_v62 = vadd.f32 %v3311_v10, %v3122_v42 }
 0x565   : > { %v5803_v30 = vld [vmem:[#allocation3 + $0x4c8] sm:$0xff]  ;;  %v4514_v49 = vpop.permute.xlu0 %4513  ;;  %v3427_v56 = vadd.f32 %v3420_v6, %v3317_v62 }
 0x566   : > { %4529 = vmatpush.bf16.msra.mxu1 %v4514_v49  ;;  %5838 = vmatpush.bf16.msrb.mxu3 %v4514_v49 }
 0x567   : > { %4420 = vmatpush.bf16.msra.mxu0 %v5803_v30  ;;  %5836 = vmatpush.bf16.msrb.mxu2 %v5803_v30  ;;  %v3468_v22 = vpack.c.bf16 %v3427_v56, %v3427_v56  ;;  %v3436_v16 = vsel %vm3429_vm8, %v3427_v56, 0.0  ;;  %v3448_v32 = vmul.f32 %v3427_v56, %v3427_v56  ;;  %v3677_v46 = vpop.f32.mrf.mxu1 }
 0x568   : > { %v3293_v23 = vpop.f32.mrf.mxu2  ;;  %3454 = vadd.xlane.f32.xlu0 %v3453_v48  ;;  %v3312_v8 = vpop.f32.mrf.mxu3  ;;  %3437 = vadd.xlane.f32.xlu1 %v3436_v16 }
 0x569   : > { %3472 = vst.msk [vmem:[%s7397_s12 + $0x8] sm:$0xf] %vm454_vm4, %v3468_v22  ;;  %v3313_v26 = vadd.f32 %v3312_v8, %v3293_v23  ;;  %v3456_v9 = vsel %vm3429_vm8, %v3448_v32, 0.0  ;;  %v3850_v0 = vpop.f32.mrf.mxu0 }
 0x56b   : > { %4421 = vmatpush.bf16.msra.mxu0 %v5802_v27  ;;  %5837 = vmatpush.bf16.msrb.mxu2 %v5802_v27  ;;  %v3318_v57 = vadd.f32 %v3313_v26, %v3123_v19 }
 0x56d   : > { %v3428_v5 = vadd.f32 %v3422_v17, %v3318_v57 }
 0x56e   : > { %4422 = vmatmul.bf16.vlgmr.msra.gmra.mxu0 %v5516_v12  ;;  %4427 = vmatmul.bf16.vlgmr.msrb.gmra.mxu2 %v5524_v37 }
 0x56f   : > { %v3469_v53 = vpack.c.bf16 %v3428_v5, %v3428_v5  ;;  %v3439_v1 = vsel %vm3429_vm8, %v3428_v5, 0.0  ;;  %v3449_v47 = vmul.f32 %v3428_v5, %v3428_v5  ;;  %v3679_v41 = vpop.f32.mrf.mxu1 }
 0x570   : > { %3440 = vadd.xlane.f32.xlu2 %v3439_v1  ;;  %3457 = vadd.xlane.f32.xlu1 %v3456_v9  ;;  %v3691_v36 = vpop.f32.mrf.mxu2  ;;  %v3826_v63 = vpop.f32.mrf.mxu3 }
 0x571   : > { %3473 = vst.msk [vmem:[%s7397_s12 + $0xc] sm:$0xf] %vm454_vm4, %v3469_v53  ;;  %v3459_v28 = vsel %vm3429_vm8, %v3449_v47, 0.0  ;;  %v3852_v33 = vpop.f32.mrf.mxu0  ;;  %v3692_v54 = vadd.f32 %v3691_v36, %v3672_v34 }
 0x573   : > { %v3827_v6 = vadd.f32 %v3826_v63, %v3692_v54 }
 0x575   : > { %v3846_v10 = vadd.f32 %v3845_v4, %v3827_v6 }
 0x577   : > { %v4016_v18 = vpop.f32.mrf.mxu1 }
 0x578   : > { %3451 = vadd.xlane.f32.xlu2 %v3450_v39  ;;  %v3693_v50 = vpop.f32.mrf.mxu2  ;;  %v3828_v29 = vpop.f32.mrf.mxu3 }
 0x579   : > { %v3694_v62 = vadd.f32 %v3693_v50, %v3674_v44 }
 0x57b   : > { %v3829_v3 = vadd.f32 %v3828_v29, %v3694_v62 }
 0x57d   : > { %v3848_v5 = vadd.f32 %v3847_v60, %v3829_v3 }
 0x57f   : > { %v4018_v43 = vpop.f32.mrf.mxu1 }
 0x580   : > { %3460 = vadd.xlane.f32.xlu2 %v3459_v28  ;;  %v3696_v24 = vpop.f32.mrf.mxu2  ;;  %v3831_v30 = vpop.f32.mrf.mxu3 }
 0x581   : > { %v4229_v49 = vpop.f32.mrf.mxu0  ;;  %v3697_v58 = vadd.f32 %v3696_v24, %v3677_v46 }
 0x583   : > { %v3832_v48 = vadd.f32 %v3831_v30, %v3697_v58 }
 0x585   : > { %v3851_v19 = vadd.f32 %v3850_v0, %v3832_v48 }
 0x587   : > { %v4021_v13 = vpop.f32.mrf.mxu1 }
 0x588   : > { %v3698_v45 = vpop.f32.mrf.mxu2  ;;  %v3833_v2 = vpop.f32.mrf.mxu3 }
 0x589   : > { %v4231_v40 = vpop.f32.mrf.mxu0  ;;  %v3699_v8 = vadd.f32 %v3698_v45, %v3679_v41 }
 0x58b   : > { %v3834_v21 = vadd.f32 %v3833_v2, %v3699_v8 }
 0x58d   : > { %v3853_v44 = vadd.f32 %v3852_v33, %v3834_v21 }
 0x58f   : > { %v4023_v14 = vpop.f32.mrf.mxu1 }
 0x590   : > { %v4035_v20 = vpop.f32.mrf.mxu2  ;;  %v4210_v7 = vpop.f32.mrf.mxu3 }
 0x591   : > { %v4036_v11 = vadd.f32 %v4035_v20, %v4016_v18  ;;  %v4230_v22 = vadd.f32 %v4229_v49, %v4210_v7 }
 0x593   : > { %v4045_v23 = vadd.f32 %v4036_v11, %v3846_v10 }
 0x595   : > { %v4234_v61 = vpop.f32.mrf.mxu0  ;;  %v4239_v53 = vadd.f32 %v4230_v22, %v4045_v23 }
 0x598   : > { %v4037_v38 = vpop.f32.mrf.mxu2  ;;  %v4212_v27 = vpop.f32.mrf.mxu3 }
 0x599   : > { %v4038_v1 = vadd.f32 %v4037_v38, %v4018_v43 }
 0x59d   : > { %v4236_v42 = vpop.f32.mrf.mxu0 }
 0x5a0   : > { %v4040_v55 = vpop.f32.mrf.mxu2  ;;  %v4215_v12 = vpop.f32.mrf.mxu3 }
 0x5a1   : > { %v4041_v26 = vadd.f32 %v4040_v55, %v4021_v13  ;;  %v4235_v16 = vadd.f32 %v4234_v61, %v4215_v12 }
 0x5a3   : > { %v4047_v39 = vadd.f32 %v4041_v26, %v3851_v19 }
 0x5a5   : > { %v4241_v46 = vadd.f32 %v4235_v16, %v4047_v39 }
 0x5a6   : > { %v4512_v15 = vpop.permute.xlu1 %4511 }
 0x5a7   : > { %4530 = vmatpush.bf16.msra.mxu1 %v4512_v15  ;;  %5839 = vmatpush.bf16.msrb.mxu3 %v4512_v15  ;;  %v4046_v15 = vadd.f32 %v4038_v1, %v3848_v5 }
 0x5a8   : > { %v4042_v37 = vpop.f32.mrf.mxu2  ;;  %v4217_v32 = vpop.f32.mrf.mxu3 }
 0x5a9   : > { %v4043_v4 = vadd.f32 %v4042_v37, %v4023_v14  ;;  %v4237_v29 = vadd.f32 %v4236_v42, %v4217_v32 }
 0x5aa   : > { %5597 = vmatmul.msk.bf16.vlgmr.msra.gmra.mxu1 %vm3399_vm7, %v5810_v25  ;;  %5598 = vmatmul.msk.bf16.vlgmr.msrb.gmra.mxu3 %vm3399_vm7, %v5811_v59  ;;  %v4232_v25 = vadd.f32 %v4231_v40, %v4212_v27 }
 0x5ab   : > { %v4048_v43 = vadd.f32 %v4043_v4, %v3853_v44 }
 0x5ac   : > { %v4240_v18 = vadd.f32 %v4232_v25, %v4046_v15 }
 0x5ad   : > { %v4242_v2 = vadd.f32 %v4237_v29, %v4048_v43 }
 0x5c2   : > { %v4404_v51 = vpop.f32.mrf.mxu1 }
 0x5ca   : > { %v4406_v52 = vpop.f32.mrf.mxu1 }
 0x5cb   : > { %v3432_v37 = vpop.xlane.xlu2 %3431 }
 0x5d2   : > { %v4409_v35 = vpop.f32.mrf.mxu1 }
 0x5d3   : > { %v3435_v62 = vpop.xlane.xlu0 %3434 }
 0x5da   : > { %v4411_v31 = vpop.f32.mrf.mxu1 }
 0x5db   : > { %v3438_v48 = vpop.xlane.xlu1 %3437 }
 0x5e3   : > { %v3441_v10 = vpop.xlane.xlu2 %3440  ;;  %v3458_v3 = vpop.xlane.xlu1 %3457 }
 0x5eb   : > { %v4423_v56 = vpop.f32.mrf.mxu0  ;;  %v3452_v11 = vpop.xlane.xlu2 %3451 }
 0x5ec   : > { %v4424_v17 = vadd.f32 %v4423_v56, %v4404_v51  ;;  %v3455_v56 = vpop.xlane.xlu0 %3454 }
 0x5ee   : > { %v4433_v47 = vadd.f32 %v4424_v17, %v4239_v53 }
 0x5f1   : > { %v4428_v57 = vpop.f32.mrf.mxu2 }
 0x5f2   : > { %v4429_v59 = vadd.f32 %v4428_v57, %v4409_v35 }
 0x5f3   : > { %v4425_v28 = vpop.f32.mrf.mxu0 }
 0x5f4   : > { %v4426_v41 = vadd.f32 %v4425_v28, %v4406_v52  ;;  %v4435_v63 = vadd.f32 %v4429_v59, %v4241_v46 }
 0x5f6   : > { %v4434_v13 = vadd.f32 %v4426_v41, %v4240_v18 }
 0x5f9   : > { %v4430_v50 = vpop.f32.mrf.mxu2 }
 0x5fa   : > { %v4431_v30 = vadd.f32 %v4430_v50, %v4411_v31  ;;  %v3461_v31 = vpop.xlane.xlu2 %3460 }
 0x5fc   : > { %v4436_v51 = vadd.f32 %v4431_v30, %v4242_v2 }
 0x627   : > { %v4532_v9 = vpop.f32.mrf.mxu1 }
 0x628   : > { %v4542_v34 = vadd.f32 %v4532_v9, %v4433_v47 }
 0x62a   : > { %v4582_v36 = vpack.c.bf16 %v4542_v34, %v4542_v34  ;;  %v4546_v60 = vsel %vm3429_vm8, %v4542_v34, 0.0  ;;  %v4562_v52 = vmul.f32 %v4542_v34, %v4542_v34 }
 0x62b   : > { %4547 = vadd.xlane.f32.xlu0 %v4546_v60 }
 0x62c   : > { %5599 = vst.msk [vmem:[%s7397_s12 + $0x10] sm:$0xf] %vm454_vm4, %v4582_v36  ;;  %v4566_v42 = vsel %vm3429_vm8, %v4562_v52, 0.0 }
 0x62d   : > { %v4537_v0 = vpop.f32.mrf.mxu3 }
 0x62e   : > { %v4544_v24 = vadd.f32 %v4537_v0, %v4435_v63 }
 0x62f   : > { %v4534_v33 = vpop.f32.mrf.mxu1 }
 0x630   : > { %v4584_v45 = vpack.c.bf16 %v4544_v24, %v4544_v24  ;;  %v4543_v49 = vadd.f32 %v4534_v33, %v4434_v13  ;;  %v4552_v14 = vsel %vm3429_vm8, %v4544_v24, 0.0  ;;  %v4564_v35 = vmul.f32 %v4544_v24, %v4544_v24 }
 0x631   : > { %4553 = vadd.xlane.f32.xlu2 %v4552_v14 }
 0x632   : > { %5601 = vst.msk [vmem:[%s7397_s12 + $0x18] sm:$0xf] %vm454_vm4, %v4584_v45  ;;  %v4583_v20 = vpack.c.bf16 %v4543_v49, %v4543_v49  ;;  %v4549_v40 = vsel %vm3429_vm8, %v4543_v49, 0.0  ;;  %v4563_v7 = vmul.f32 %v4543_v49, %v4543_v49  ;;  %v4572_v58 = vsel %vm3429_vm8, %v4564_v35, 0.0 }
 0x633   : > { %4550 = vadd.xlane.f32.xlu1 %v4549_v40 }
 0x634   : > { %5600 = vst.msk [vmem:[%s7397_s12 + $0x14] sm:$0xf] %vm454_vm4, %v4583_v20  ;;  %v4569_v54 = vsel %vm3429_vm8, %v4563_v7, 0.0 }
 0x635   : > { %v4539_v38 = vpop.f32.mrf.mxu3 }
 0x636   : > { %v4545_v61 = vadd.f32 %v4539_v38, %v4436_v51 }
 0x638   : > { %v4585_v27 = vpack.c.bf16 %v4545_v61, %v4545_v61  ;;  %v4555_v55 = vsel %vm3429_vm8, %v4545_v61, 0.0  ;;  %v4565_v6 = vmul.f32 %v4545_v61, %v4545_v61 }
 0x639   : > { %4556 = vadd.xlane.f32.xlu0 %v4555_v55  ;;  %4570 = vadd.xlane.f32.xlu2 %v4569_v54 }
 0x63a   : > { %5602 = vst.msk [vmem:[%s7397_s12 + $0x1c] sm:$0xf] %vm454_vm4, %v4585_v27  ;;  %v4575_v12 = vsel %vm3429_vm8, %v4565_v6, 0.0 }
 0x63b   : > { %4567 = vadd.xlane.f32.xlu1 %v4566_v42 }
 0x641   : > { %4573 = vadd.xlane.f32.xlu0 %v4572_v58 }
 0x643   : > { %4576 = vadd.xlane.f32.xlu1 %v4575_v12 }
 0x69e   : > { %v4548_v23 = vpop.xlane.xlu0 %4547 }
 0x69f   : > { %v4558_v22 = vadd.f32 %v4548_v23, %v3432_v37 }
 0x6a1   : > { %4592 = vst.msk [vmem:[%s276_s30] sm:$0xff] %vm4591_vm9, %v4558_v22 }
 0x6a4   : > { %v4554_v19 = vpop.xlane.xlu2 %4553 }
 0x6a5   : > { %v4560_v8 = vadd.f32 %v4554_v19, %v3438_v48 }
 0x6a6   : > { %v4551_v26 = vpop.xlane.xlu1 %4550 }
 0x6a7   : > { %4594 = vst.msk [vmem:[%s276_s30 + $0x10] sm:$0xff] %vm4591_vm9, %v4560_v8  ;;  %v4559_v17 = vadd.f32 %v4551_v26, %v3435_v62 }
 0x6a9   : > { %4593 = vst.msk [vmem:[%s276_s30 + $0x8] sm:$0xff] %vm4591_vm9, %v4559_v17 }
 0x6ac   : > { %v4557_v57 = vpop.xlane.xlu0 %4556  ;;  %v4571_v5 = vpop.xlane.xlu2 %4570 }
 0x6ad   : > { %v4561_v53 = vadd.f32 %v4557_v57, %v3441_v10  ;;  %v4579_v1 = vadd.f32 %v4571_v5, %v3455_v56 }
 0x6ae   : > { %v4568_v21 = vpop.xlane.xlu1 %4567 }
 0x6af   : > { %4595 = vst.msk [vmem:[%s276_s30 + $0x18] sm:$0xff] %vm4591_vm9, %v4561_v53  ;;  %v4578_v39 = vadd.f32 %v4568_v21, %v3452_v11 }
 0x6b0   : > { %4597 = vst.msk [vmem:[%s281_s7 + $0x8] sm:$0xff] %vm4591_vm9, %v4579_v1 }
 0x6b1   : > { %4596 = vst.msk [vmem:[%s281_s7] sm:$0xff] %vm4591_vm9, %v4578_v39 }
 0x6b4   : > { %v4574_v16 = vpop.xlane.xlu0 %4573 }
 0x6b5   : > { %v4580_v32 = vadd.f32 %v4574_v16, %v3458_v3 }
 0x6b6   : > { %v4577_v47 = vpop.xlane.xlu1 %4576 }
 0x6b7   : > { %4598 = vst.msk [vmem:[%s281_s7 + $0x10] sm:$0xff] %vm4591_vm9, %v4580_v32  ;;  %v4581_v28 = vadd.f32 %v4577_v47, %v3461_v31 }
 0x6b9   : > { %4599 = vst.msk [vmem:[%s281_s7 + $0x18] sm:$0xff] %vm4591_vm9, %v4581_v28 }
 0x6ba PF: > { %s17_s21 = sadd.s32 1, %s5937_s21  }
 0x6bb   : > { %p14_p5 = scmp.ge.s32.totalorder %s17_s21, 4  }
 0x6bd   :  { %16 = sbr.rel (!%p14_p5) target bundleno = 1 (0x1), region = 98 }

</bundles_post_ra>
